<compile_context>
chip_gen: v7x
topology: tpu7x:2x2x1
jax: 0.10.0
libtpu: 0.0.40
codegen_flags: <defaults>
</compile_context>

<pallas_src>
import functools

import jax
import jax.numpy as jnp
from jax.experimental import pallas as pl
from jax.experimental.pallas import tpu as pltpu

NEG_SLOPE = 0.01  # nn.LeakyReLU() default negative_slope


def _leaky(y):
    return jnp.where(y >= 0.0, y, NEG_SLOPE * y)


# ----------------------------- Pallas kernels ------------------------------ #

def conv_gemm_act_kernel(p_ref, w_ref, b_ref, o_ref):
    """Fused im2col-GEMM + bias + LeakyReLU for one image (grid=(N,)).

    p_ref: (M, KKC)    im2col patches for this image
    w_ref: (KKC, Cout) conv weight, taps folded into the contraction dim
    b_ref: (1, Cout)
    o_ref: (M, Cout)
    """
    y = jnp.dot(p_ref[...], w_ref[...], preferred_element_type=jnp.float32)
    o_ref[...] = _leaky(y + b_ref[...]).astype(o_ref.dtype)


def conv_gemm_act_linear_kernel(p_ref, w_ref, b_ref, wl_ref, bl_ref, o_ref):
    """conv3 GEMM + LeakyReLU with the final nn.Linear fused, for one image.

    p_ref : (M3, KKC3)       conv3 patches
    w_ref : (KKC3, C3)       conv3 weight
    b_ref : (1, C3)
    wl_ref: (n_out, M3, C3)  linear weight pre-permuted to (out, h*w, c)
    bl_ref: (n_out, 1)
    o_ref : (n_out, 1)
    """
    y = jnp.dot(p_ref[...], w_ref[...], preferred_element_type=jnp.float32)
    y = _leaky(y + b_ref[...])                                  # (M3, C3)
    n_out = o_ref.shape[0]
    # out[o] = sum_{p,c} y[p,c] * Wl[o,p,c]  -> flatten-free fused Linear.
    rows = [jnp.sum(y * wl_ref[o], axis=0, keepdims=True)       # (1, C3)
            for o in range(n_out)]
    q = jnp.concatenate(rows, axis=0)                           # (n_out, C3)
    o_ref[...] = (jnp.sum(q, axis=1, keepdims=True)
                  + bl_ref[...]).astype(o_ref.dtype)


# ------------------------------ JAX glue ----------------------------------- #

def _im2col(x_nhwc, K, stride):
    """(N,H,W,C) -> (N, Ho*Wo, K*K*C); feature order = (kh, kw, cin)."""
    N, H, W, C = x_nhwc.shape
    Ho = (H - K) // stride + 1
    Wo = (W - K) // stride + 1
    cols = []
    for kh in range(K):
        for kw in range(K):
            sl = x_nhwc[:, kh:kh + stride * (Ho - 1) + 1:stride,
                           kw:kw + stride * (Wo - 1) + 1:stride, :]
            cols.append(sl.reshape(N, Ho * Wo, C))
    return jnp.concatenate(cols, axis=-1), Ho, Wo


def conv2d_leaky_relu(x_nhwc, w_mat, b_row, K, stride):
    """VALID Conv2d + bias + LeakyReLU as a single-GEMM-per-image Pallas call."""
    N = x_nhwc.shape[0]
    KKC, Cout = w_mat.shape
    patches, Ho, Wo = _im2col(x_nhwc, K, stride)
    M = Ho * Wo
    out = pl.pallas_call(
        conv_gemm_act_kernel,
        out_shape=jax.ShapeDtypeStruct((N, M, Cout), x_nhwc.dtype),
        grid=(N,),
        in_specs=[
            pl.BlockSpec((None, M, KKC), lambda n: (n, 0, 0)),
            pl.BlockSpec((KKC, Cout), lambda n: (0, 0)),
            pl.BlockSpec((1, Cout), lambda n: (0, 0)),
        ],
        out_specs=pl.BlockSpec((None, M, Cout), lambda n: (n, 0, 0)),
        compiler_params=pltpu.CompilerParams(
            dimension_semantics=("parallel",)),
    )(patches, w_mat, b_row)
    return out.reshape(N, Ho, Wo, Cout)


def conv3_and_linear(x_nhwc, w_mat, b_row, wl3, bl_col, K, stride):
    """conv3 + LeakyReLU + flatten + linear_layer_1, fused in one Pallas call."""
    N = x_nhwc.shape[0]
    KKC, C3 = w_mat.shape
    n_out = wl3.shape[0]
    patches, Ho, Wo = _im2col(x_nhwc, K, stride)
    M = Ho * Wo
    out = pl.pallas_call(
        conv_gemm_act_linear_kernel,
        out_shape=jax.ShapeDtypeStruct((N, n_out, 1), jnp.float32),
        grid=(N,),
        in_specs=[
            pl.BlockSpec((None, M, KKC), lambda n: (n, 0, 0)),
            pl.BlockSpec((KKC, C3), lambda n: (0, 0)),
            pl.BlockSpec((1, C3), lambda n: (0, 0)),
            pl.BlockSpec((n_out, M, C3), lambda n: (0, 0, 0)),
            pl.BlockSpec((n_out, 1), lambda n: (0, 0)),
        ],
        out_specs=pl.BlockSpec((None, n_out, 1), lambda n: (n, 0, 0)),
        compiler_params=pltpu.CompilerParams(
            dimension_semantics=("parallel",)),
    )(patches, w_mat, b_row, wl3, bl_col)
    return out.reshape(N, n_out)


def prepare_params(params, f3):
    """One-time layout prep (hoisted out of the forward pass).

    Conv weights (Cout,Cin,kh,kw) -> (K*K*Cin, Cout) matching _im2col's
    (kh, kw, cin) feature order; linear weight (n_out, C*H*W) in torch CHW
    flatten order -> (n_out, H*W, C) so no activation transpose is needed.
    """
    def conv_mat(w):
        Cout, Cin, K, _ = w.shape
        return jnp.transpose(w, (2, 3, 1, 0)).reshape(K * K * Cin, Cout)

    C3 = params["w3"].shape[0]
    n_out = params["wl"].shape[0]
    wl3 = jnp.transpose(params["wl"].reshape(n_out, C3, f3, f3),
                        (0, 2, 3, 1)).reshape(n_out, f3 * f3, C3)
    return dict(
        w1=conv_mat(params["w1"]), b1=params["b1"].reshape(1, -1),
        w2=conv_mat(params["w2"]), b2=params["b2"].reshape(1, -1),
        w3=conv_mat(params["w3"]), b3=params["b3"].reshape(1, -1),
        wl3=wl3, bl=params["bl"].reshape(n_out, 1),
    )


@functools.partial(jax.jit, static_argnames=("kernel_sizes",))
def agent_network_forward(prep, x_nchw, kernel_sizes):
    """Faithful AgentNetwork.forward: conv1/2/3 + LeakyReLU, flatten, linear_1."""
    k1, k2, k3 = kernel_sizes
    x = jnp.transpose(x_nchw, (0, 2, 3, 1))          # NCHW -> NHWC (free: C=1)
    x = conv2d_leaky_relu(x, prep["w1"], prep["b1"], k1, stride=1)
    x = conv2d_leaky_relu(x, prep["w2"], prep["b2"], k2, stride=2)
    return conv3_and_linear(x, prep["w3"], prep["b3"],
                            prep["wl3"], prep["bl"], k3, stride=1)


# ------------------------- pure-JAX reference check ------------------------ #

def reference_forward(params, x_nchw):
    act = lambda v: jnp.where(v >= 0, v, NEG_SLOPE * v)

    def conv(x, w, b, stride):
        y = jax.lax.conv_general_dilated(
            x, w, window_strides=(stride, stride), padding="VALID",
            dimension_numbers=("NCHW", "OIHW", "NCHW"))
        return act(y + b.reshape(1, -1, 1, 1))

    x = conv(x_nchw, params["w1"], params["b1"], 1)
    x = conv(x, params["w2"], params["b2"], 2)
    x = conv(x, params["w3"], params["b3"], 1)
    x = x.reshape(x.shape[0], -1)
    return x @ params["wl"].T + params["bl"]


# ---------------------------------- main ------------------------------------ #

if __name__ == "__main__":
    key = jax.random.PRNGKey(0)

    n_units_out = 3
    num_feature_maps = 32
    kernel_size = 6
    N, C_in, H, W = 2, 1, 32, 32          # spatial reduced from 96 for the demo

    def init_conv(k, cout, cin, ksz):
        k1, k2 = jax.random.split(k)
        bound = 1.0 / jnp.sqrt(cin * ksz * ksz)
        w = jax.random.uniform(k1, (cout, cin, ksz, ksz), jnp.float32, -bound, bound)
        b = jax.random.uniform(k2, (cout,), jnp.float32, -bound, bound)
        return w, b

    keys = jax.random.split(key, 6)
    w1, b1 = init_conv(keys[0], num_feature_maps, C_in, kernel_size)
    w2, b2 = init_conv(keys[1], num_feature_maps * 2, num_feature_maps, kernel_size // 2)
    w3, b3 = init_conv(keys[2], num_feature_maps, num_feature_maps * 2, kernel_size // 2)

    # same formula as AgentNetwork.calculate_next_feature_map_size
    f = W
    for ksz, s in ((kernel_size, 1), (kernel_size // 2, 2), (kernel_size // 2, 1)):
        f = (f - ksz) // s + 1
    assert f >= 1, f"Ouch! the layer 3 feature is of size {f}"
    flat_features = num_feature_maps * f * f

    bound = 1.0 / jnp.sqrt(flat_features)
    wl = jax.random.uniform(keys[3], (n_units_out, flat_features), jnp.float32, -bound, bound)
    bl = jax.random.uniform(keys[4], (n_units_out,), jnp.float32, -bound, bound)

    params = dict(w1=w1, b1=b1, w2=w2, b2=b2, w3=w3, b3=b3, wl=wl, bl=bl)
    prep = prepare_params(params, f)

    x = jax.random.normal(keys[5], (N, C_in, H, W), jnp.float32)

    ks = (kernel_size, kernel_size // 2, kernel_size // 2)
    out = agent_network_forward(prep, x, kernel_sizes=ks)
    out = jax.block_until_ready(out)

    ref = reference_forward(params, x)
    assert out.shape == (N, n_units_out), out.shape
    assert jnp.allclose(out, ref, atol=1e-3, rtol=1e-3), (
        "max abs err = %g" % float(jnp.max(jnp.abs(out - ref))))

    print("KERNEL_OK")
</pallas_src>

<mosaic_0001>
module attributes {stable_mosaic.version = 11 : i64} {
  func.func @conv_gemm_act_kernel(%arg0: i32, %arg1: memref<1x729x36xf32, #tpu.memory_space<vmem>>, %arg2: memref<36x32xf32, #tpu.memory_space<vmem>>, %arg3: memref<1x32xf32, #tpu.memory_space<vmem>>, %arg4: memref<1x729x32xf32, #tpu.memory_space<vmem>>) attributes {dimension_semantics = [#tpu.dimension_semantics<parallel>], iteration_bounds = array<i64: 2>, scalar_prefetch = 0 : i64, scratch_operands = 0 : i64, tpu.core_type = #tpu.core_type<tc>, window_params = [{transform_indices = @transform_0, window_bounds = array<i64: 1, 729, 36>}, {pipeline_mode = #tpu.pipeline_mode<synchronous>, transform_indices = @transform_1, window_bounds = array<i64: 36, 32>}, {pipeline_mode = #tpu.pipeline_mode<synchronous>, transform_indices = @transform_2, window_bounds = array<i64: 1, 32>}, {transform_indices = @transform_3, window_bounds = array<i64: 1, 729, 32>}]} {
    %c0 = arith.constant 0 : index
    %c0_0 = arith.constant 0 : index
    %c0_1 = arith.constant 0 : index
    %0 = vector.load %arg1[%c0, %c0_0, %c0_1] : memref<1x729x36xf32, #tpu.memory_space<vmem>>, vector<1x729x36xf32>
    %1 = vector.shape_cast %0 : vector<1x729x36xf32> to vector<729x36xf32>
    %c0_2 = arith.constant 0 : index
    %c0_3 = arith.constant 0 : index
    %2 = vector.load %arg2[%c0_2, %c0_3] : memref<36x32xf32, #tpu.memory_space<vmem>>, vector<36x32xf32>
    %cst = arith.constant dense<0.000000e+00> : vector<729x32xf32>
    %3 = tpu.matmul %1, %2, %cst {dimension_numbers = #tpu.dot_dimension_numbers<[1], [0], [0], [1], [0, 0, 1, 1], [], []>} : vector<729x36xf32>, vector<36x32xf32>, vector<729x32xf32> -> vector<729x32xf32>
    %c0_4 = arith.constant 0 : index
    %c0_5 = arith.constant 0 : index
    %4 = vector.load %arg3[%c0_4, %c0_5] : memref<1x32xf32, #tpu.memory_space<vmem>>, vector<1x32xf32>
    %5 = vector.broadcast %4 : vector<1x32xf32> to vector<729x32xf32>
    %6 = arith.addf %3, %5 : vector<729x32xf32>
    %cst_6 = arith.constant 0.000000e+00 : f32
    %7 = vector.broadcast %cst_6 : f32 to vector<729x32xf32>
    %8 = arith.cmpf oge, %6, %7 : vector<729x32xf32>
    %cst_7 = arith.constant 0.00999999977 : f32
    %9 = vector.broadcast %cst_7 : f32 to vector<729x32xf32>
    %10 = arith.mulf %9, %6 : vector<729x32xf32>
    %11 = arith.select %8, %6, %10 : vector<729x32xi1>, vector<729x32xf32>
    %c0_8 = arith.constant 0 : index
    %c0_9 = arith.constant 0 : index
    %c0_10 = arith.constant 0 : index
    %12 = vector.load %arg4[%c0_8, %c0_9, %c0_10] : memref<1x729x32xf32, #tpu.memory_space<vmem>>, vector<1x729x32xf32>
    %13 = vector.shape_cast %12 : vector<1x729x32xf32> to vector<729x32xf32>
    %14 = vector.shape_cast %11 : vector<729x32xf32> to vector<1x729x32xf32>
    tpu.vector_store %arg4[%c0_8, %c0_9, %c0_10], %14 {strides = array<i32>} : memref<1x729x32xf32, #tpu.memory_space<vmem>>, vector<1x729x32xf32>,
    return
  }
  func.func @transform_0(%arg0: i32) -> (i32, i32, i32) {
    %c0_i32 = arith.constant 0 : i32
    %c0_i32_0 = arith.constant 0 : i32
    %c0_i32_1 = arith.constant 0 : i32
    return %arg0, %c0_i32, %c0_i32_0 : i32, i32, i32
  }
  func.func @transform_1(%arg0: i32) -> (i32, i32) {
    %c0_i32 = arith.constant 0 : i32
    %c0_i32_0 = arith.constant 0 : i32
    %c0_i32_1 = arith.constant 0 : i32
    return %c0_i32, %c0_i32_0 : i32, i32
  }
  func.func @transform_2(%arg0: i32) -> (i32, i32) {
    %c0_i32 = arith.constant 0 : i32
    %c0_i32_0 = arith.constant 0 : i32
    %c0_i32_1 = arith.constant 0 : i32
    return %c0_i32, %c0_i32_0 : i32, i32
  }
  func.func @transform_3(%arg0: i32) -> (i32, i32, i32) {
    %c0_i32 = arith.constant 0 : i32
    %c0_i32_0 = arith.constant 0 : i32
    %c0_i32_1 = arith.constant 0 : i32
    return %arg0, %c0_i32, %c0_i32_0 : i32, i32, i32
  }
}

module attributes {stable_mosaic.version = 11 : i64} {
  func.func @conv_gemm_act_kernel(%arg0: i32, %arg1: memref<1x169x288xf32, #tpu.memory_space<vmem>>, %arg2: memref<288x64xf32, #tpu.memory_space<vmem>>, %arg3: memref<1x64xf32, #tpu.memory_space<vmem>>, %arg4: memref<1x169x64xf32, #tpu.memory_space<vmem>>) attributes {dimension_semantics = [#tpu.dimension_semantics<parallel>], iteration_bounds = array<i64: 2>, scalar_prefetch = 0 : i64, scratch_operands = 0 : i64, tpu.core_type = #tpu.core_type<tc>, window_params = [{transform_indices = @transform_0, window_bounds = array<i64: 1, 169, 288>}, {pipeline_mode = #tpu.pipeline_mode<synchronous>, transform_indices = @transform_1, window_bounds = array<i64: 288, 64>}, {pipeline_mode = #tpu.pipeline_mode<synchronous>, transform_indices = @transform_2, window_bounds = array<i64: 1, 64>}, {transform_indices = @transform_3, window_bounds = array<i64: 1, 169, 64>}]} {
    %c0 = arith.constant 0 : index
    %c0_0 = arith.constant 0 : index
    %c0_1 = arith.constant 0 : index
    %0 = vector.load %arg1[%c0, %c0_0, %c0_1] : memref<1x169x288xf32, #tpu.memory_space<vmem>>, vector<1x169x288xf32>
    %1 = vector.shape_cast %0 : vector<1x169x288xf32> to vector<169x288xf32>
    %c0_2 = arith.constant 0 : index
    %c0_3 = arith.constant 0 : index
    %2 = vector.load %arg2[%c0_2, %c0_3] : memref<288x64xf32, #tpu.memory_space<vmem>>, vector<288x64xf32>
    %cst = arith.constant dense<0.000000e+00> : vector<169x64xf32>
    %3 = tpu.matmul %1, %2, %cst {dimension_numbers = #tpu.dot_dimension_numbers<[1], [0], [0], [1], [0, 0, 1, 1], [], []>} : vector<169x288xf32>, vector<288x64xf32>, vector<169x64xf32> -> vector<169x64xf32>
    %c0_4 = arith.constant 0 : index
    %c0_5 = arith.constant 0 : index
    %4 = vector.load %arg3[%c0_4, %c0_5] : memref<1x64xf32, #tpu.memory_space<vmem>>, vector<1x64xf32>
    %5 = vector.broadcast %4 : vector<1x64xf32> to vector<169x64xf32>
    %6 = arith.addf %3, %5 : vector<169x64xf32>
    %cst_6 = arith.constant 0.000000e+00 : f32
    %7 = vector.broadcast %cst_6 : f32 to vector<169x64xf32>
    %8 = arith.cmpf oge, %6, %7 : vector<169x64xf32>
    %cst_7 = arith.constant 0.00999999977 : f32
    %9 = vector.broadcast %cst_7 : f32 to vector<169x64xf32>
    %10 = arith.mulf %9, %6 : vector<169x64xf32>
    %11 = arith.select %8, %6, %10 : vector<169x64xi1>, vector<169x64xf32>
    %c0_8 = arith.constant 0 : index
    %c0_9 = arith.constant 0 : index
    %c0_10 = arith.constant 0 : index
    %12 = vector.load %arg4[%c0_8, %c0_9, %c0_10] : memref<1x169x64xf32, #tpu.memory_space<vmem>>, vector<1x169x64xf32>
    %13 = vector.shape_cast %12 : vector<1x169x64xf32> to vector<169x64xf32>
    %14 = vector.shape_cast %11 : vector<169x64xf32> to vector<1x169x64xf32>
    tpu.vector_store %arg4[%c0_8, %c0_9, %c0_10], %14 {strides = array<i32>} : memref<1x169x64xf32, #tpu.memory_space<vmem>>, vector<1x169x64xf32>,
    return
  }
  func.func @transform_0(%arg0: i32) -> (i32, i32, i32) {
    %c0_i32 = arith.constant 0 : i32
    %c0_i32_0 = arith.constant 0 : i32
    %c0_i32_1 = arith.constant 0 : i32
    return %arg0, %c0_i32, %c0_i32_0 : i32, i32, i32
  }
  func.func @transform_1(%arg0: i32) -> (i32, i32) {
    %c0_i32 = arith.constant 0 : i32
    %c0_i32_0 = arith.constant 0 : i32
    %c0_i32_1 = arith.constant 0 : i32
    return %c0_i32, %c0_i32_0 : i32, i32
  }
  func.func @transform_2(%arg0: i32) -> (i32, i32) {
    %c0_i32 = arith.constant 0 : i32
    %c0_i32_0 = arith.constant 0 : i32
    %c0_i32_1 = arith.constant 0 : i32
    return %c0_i32, %c0_i32_0 : i32, i32
  }
  func.func @transform_3(%arg0: i32) -> (i32, i32, i32) {
    %c0_i32 = arith.constant 0 : i32
    %c0_i32_0 = arith.constant 0 : i32
    %c0_i32_1 = arith.constant 0 : i32
    return %arg0, %c0_i32, %c0_i32_0 : i32, i32, i32
  }
}

module attributes {stable_mosaic.version = 11 : i64} {
  func.func @conv_gemm_act_linear_kernel(%arg0: i32, %arg1: memref<1x121x576xf32, #tpu.memory_space<vmem>>, %arg2: memref<576x32xf32, #tpu.memory_space<vmem>>, %arg3: memref<1x32xf32, #tpu.memory_space<vmem>>, %arg4: memref<3x121x32xf32, #tpu.memory_space<vmem>>, %arg5: memref<3x1xf32, #tpu.memory_space<vmem>>, %arg6: memref<1x3x1xf32, #tpu.memory_space<vmem>>) attributes {dimension_semantics = [#tpu.dimension_semantics<parallel>], iteration_bounds = array<i64: 2>, scalar_prefetch = 0 : i64, scratch_operands = 0 : i64, tpu.core_type = #tpu.core_type<tc>, window_params = [{transform_indices = @transform_0, window_bounds = array<i64: 1, 121, 576>}, {pipeline_mode = #tpu.pipeline_mode<synchronous>, transform_indices = @transform_1, window_bounds = array<i64: 576, 32>}, {pipeline_mode = #tpu.pipeline_mode<synchronous>, transform_indices = @transform_2, window_bounds = array<i64: 1, 32>}, {pipeline_mode = #tpu.pipeline_mode<synchronous>, transform_indices = @transform_3, window_bounds = array<i64: 3, 121, 32>}, {pipeline_mode = #tpu.pipeline_mode<synchronous>, transform_indices = @transform_4, window_bounds = array<i64: 3, 1>}, {transform_indices = @transform_5, window_bounds = array<i64: 1, 3, 1>}]} {
    %c0 = arith.constant 0 : index
    %c0_0 = arith.constant 0 : index
    %c0_1 = arith.constant 0 : index
    %0 = vector.load %arg1[%c0, %c0_0, %c0_1] : memref<1x121x576xf32, #tpu.memory_space<vmem>>, vector<1x121x576xf32>
    %1 = vector.shape_cast %0 : vector<1x121x576xf32> to vector<121x576xf32>
    %c0_2 = arith.constant 0 : index
    %c0_3 = arith.constant 0 : index
    %2 = vector.load %arg2[%c0_2, %c0_3] : memref<576x32xf32, #tpu.memory_space<vmem>>, vector<576x32xf32>
    %cst = arith.constant dense<0.000000e+00> : vector<121x32xf32>
    %3 = tpu.matmul %1, %2, %cst {dimension_numbers = #tpu.dot_dimension_numbers<[1], [0], [0], [1], [0, 0, 1, 1], [], []>} : vector<121x576xf32>, vector<576x32xf32>, vector<121x32xf32> -> vector<121x32xf32>
    %c0_4 = arith.constant 0 : index
    %c0_5 = arith.constant 0 : index
    %4 = vector.load %arg3[%c0_4, %c0_5] : memref<1x32xf32, #tpu.memory_space<vmem>>, vector<1x32xf32>
    %5 = vector.broadcast %4 : vector<1x32xf32> to vector<121x32xf32>
    %6 = arith.addf %3, %5 : vector<121x32xf32>
    %cst_6 = arith.constant 0.000000e+00 : f32
    %7 = vector.broadcast %cst_6 : f32 to vector<121x32xf32>
    %8 = arith.cmpf oge, %6, %7 : vector<121x32xf32>
    %cst_7 = arith.constant 0.00999999977 : f32
    %9 = vector.broadcast %cst_7 : f32 to vector<121x32xf32>
    %10 = arith.mulf %9, %6 : vector<121x32xf32>
    %11 = arith.select %8, %6, %10 : vector<121x32xi1>, vector<121x32xf32>
    %c0_8 = arith.constant 0 : index
    %c0_9 = arith.constant 0 : index
    %c0_10 = arith.constant 0 : index
    %12 = vector.load %arg4[%c0_8, %c0_9, %c0_10] : memref<3x121x32xf32, #tpu.memory_space<vmem>>, vector<1x121x32xf32>
    %13 = vector.shape_cast %12 : vector<1x121x32xf32> to vector<121x32xf32>
    %14 = arith.mulf %11, %13 : vector<121x32xf32>
    %cst_11 = arith.constant dense<0.000000e+00> : vector<32xf32>
    %15 = vector.multi_reduction <add>, %14, %cst_11 [0] : vector<121x32xf32> to vector<32xf32>
    %16 = vector.shape_cast %15 : vector<32xf32> to vector<1x32xf32>
    %c1 = arith.constant 1 : index
    %c0_12 = arith.constant 0 : index
    %c0_13 = arith.constant 0 : index
    %17 = vector.load %arg4[%c1, %c0_12, %c0_13] : memref<3x121x32xf32, #tpu.memory_space<vmem>>, vector<1x121x32xf32>
    %18 = vector.shape_cast %17 : vector<1x121x32xf32> to vector<121x32xf32>
    %19 = arith.mulf %11, %18 : vector<121x32xf32>
    %cst_14 = arith.constant dense<0.000000e+00> : vector<32xf32>
    %20 = vector.multi_reduction <add>, %19, %cst_14 [0] : vector<121x32xf32> to vector<32xf32>
    %21 = vector.shape_cast %20 : vector<32xf32> to vector<1x32xf32>
    %c2 = arith.constant 2 : index
    %c0_15 = arith.constant 0 : index
    %c0_16 = arith.constant 0 : index
    %22 = vector.load %arg4[%c2, %c0_15, %c0_16] : memref<3x121x32xf32, #tpu.memory_space<vmem>>, vector<1x121x32xf32>
    %23 = vector.shape_cast %22 : vector<1x121x32xf32> to vector<121x32xf32>
    %24 = arith.mulf %11, %23 : vector<121x32xf32>
    %cst_17 = arith.constant dense<0.000000e+00> : vector<32xf32>
    %25 = vector.multi_reduction <add>, %24, %cst_17 [0] : vector<121x32xf32> to vector<32xf32>
    %26 = vector.shape_cast %25 : vector<32xf32> to vector<1x32xf32>
    %27 = tpu.concatenate %16, %21, %26 in 0 : vector<1x32xf32>, vector<1x32xf32>, vector<1x32xf32> -> vector<3x32xf32>
    %cst_18 = arith.constant dense<0.000000e+00> : vector<3xf32>
    %28 = vector.multi_reduction <add>, %27, %cst_18 [1] : vector<3x32xf32> to vector<3xf32>
    %29 = vector.shape_cast %28 : vector<3xf32> to vector<3x1xf32>
    %c0_19 = arith.constant 0 : index
    %c0_20 = arith.constant 0 : index
    %30 = vector.load %arg5[%c0_19, %c0_20] : memref<3x1xf32, #tpu.memory_space<vmem>>, vector<3x1xf32>
    %31 = arith.addf %29, %30 : vector<3x1xf32>
    %c0_21 = arith.constant 0 : index
    %c0_22 = arith.constant 0 : index
    %c0_23 = arith.constant 0 : index
    %32 = vector.load %arg6[%c0_21, %c0_22, %c0_23] : memref<1x3x1xf32, #tpu.memory_space<vmem>>, vector<1x3x1xf32>
    %33 = vector.shape_cast %32 : vector<1x3x1xf32> to vector<3x1xf32>
    %34 = vector.shape_cast %31 : vector<3x1xf32> to vector<1x3x1xf32>
    tpu.vector_store %arg6[%c0_21, %c0_22, %c0_23], %34 {strides = array<i32>} : memref<1x3x1xf32, #tpu.memory_space<vmem>>, vector<1x3x1xf32>,
    return
  }
  func.func @transform_0(%arg0: i32) -> (i32, i32, i32) {
    %c0_i32 = arith.constant 0 : i32
    %c0_i32_0 = arith.constant 0 : i32
    %c0_i32_1 = arith.constant 0 : i32
    return %arg0, %c0_i32, %c0_i32_0 : i32, i32, i32
  }
  func.func @transform_1(%arg0: i32) -> (i32, i32) {
    %c0_i32 = arith.constant 0 : i32
    %c0_i32_0 = arith.constant 0 : i32
    %c0_i32_1 = arith.constant 0 : i32
    return %c0_i32, %c0_i32_0 : i32, i32
  }
  func.func @transform_2(%arg0: i32) -> (i32, i32) {
    %c0_i32 = arith.constant 0 : i32
    %c0_i32_0 = arith.constant 0 : i32
    %c0_i32_1 = arith.constant 0 : i32
    return %c0_i32, %c0_i32_0 : i32, i32
  }
  func.func @transform_3(%arg0: i32) -> (i32, i32, i32) {
    %c0_i32 = arith.constant 0 : i32
    %c0_i32_0 = arith.constant 0 : i32
    %c0_i32_1 = arith.constant 0 : i32
    %c0_i32_2 = arith.constant 0 : i32
    return %c0_i32, %c0_i32_0, %c0_i32_1 : i32, i32, i32
  }
  func.func @transform_4(%arg0: i32) -> (i32, i32) {
    %c0_i32 = arith.constant 0 : i32
    %c0_i32_0 = arith.constant 0 : i32
    %c0_i32_1 = arith.constant 0 : i32
    return %c0_i32, %c0_i32_0 : i32, i32
  }
  func.func @transform_5(%arg0: i32) -> (i32, i32, i32) {
    %c0_i32 = arith.constant 0 : i32
    %c0_i32_0 = arith.constant 0 : i32
    %c0_i32_1 = arith.constant 0 : i32
    return %arg0, %c0_i32, %c0_i32_0 : i32, i32, i32
  }
}

</mosaic_0001>

<bundles_post_ra>
// kernel: agent_network_forward.3
= control target key start
LH: loop header
LB: loop body
LE: loop exit
PB: predicated region body
PF: predicated region fallthrough
CT: control target
= control target key end

     0   :  { %s1906_s12 = smov 0   ;;  %s2415_s0 = inlined_call_operand.vmem [shape: f32[2,729,36], index: 0, kind: input, shape index: {}]   ;;  %s2416_s1 = inlined_call_operand.vmem [shape: f32[36,32], index: 1, kind: input, shape index: {}]   ;;  %s2417_s2 = inlined_call_operand.vmem [shape: f32[1,32], index: 2, kind: input, shape index: {}]   ;;  %s2418_s3 = inlined_call_operand.vmem [shape: f32[2,729,32], index: 3, kind: output, shape index: {}]  }
   0x1 LB: > { %s1506_s13 = sadd.s32 4294967295, %s1884_s12   ;;  %p1510_p0 = scmp.ge.s32.totalorder %s1884_s12, 1  ;;  %s1884_s12 = sphi %s1906_s12, %s13_s12  }
   0x2   : > { %p137_p1 = scmp.lt.s32.totalorder %s1884_s12, 3 }
   0x4   : > { %p138_p2 = pnand %p1510_p0, %p137_p1 }
   0x5   : > { %v263_v0 = vld [vmem:[%s2416_s1] sm:$0xff] (!%p138_p2)  ;;  %v264_v1 = vld [vmem:[%s2416_s1 + $0x8] sm:$0xff] (!%p138_p2)  ;;  %v265_v2 = vld [vmem:[%s2416_s1 + $0x10] sm:$0xff] (!%p138_p2)  ;;  %p161_p3 = scmp.lt.s32.totalorder (!%p138_p2), %s1506_s13, 1  ;;  %vm552_vm0 = vcmask (!%p138_p2), 1043456   ;;  %vm275_vm1 = vcmask (!%p138_p2), 293888  }
   0x6   : > { %141 = sbr.rel (%p138_p2) target bundleno = 329 (0x149), region = 32  ;;  %v1854_v3 = vpack.c.bf16 (!%p138_p2), %v264_v1, %v263_v0  ;;  %v266_v4 = vld [vmem:[%s2416_s1 + $0x18] sm:$0xff] (!%p138_p2)  ;;  %v267_v6 = vld [vmem:[%s2416_s1 + $0x20] sm:$0xf] (!%p138_p2)  ;;  %vm1357_vm2 = vcmask (!%p138_p2), 261120  }
   0x7   : > { %v1858_v5 = vpack.c.bf16 (!%p138_p2), %v266_v4, %v265_v2 }
   0x8   : > { %1855 = vmatprep.subr.bf16.mxu0 (!%p138_p2), %v1854_v3  ;;  %1862 = vmatprep.subr.bf16.mxu1 (!%p138_p2), %v1854_v3 }
   0x9   : > { %1857 = vmatpush3.bf16.msra.mxu0 (!%p138_p2), %v1854_v3  ;;  %1865 = vmatpush3.bf16.msra.mxu1 (!%p138_p2), %v1854_v3 }
   0xa   : > { %1859 = vmatprep.subr.bf16.mxu0 (!%p138_p2), %v1858_v5  ;;  %1863 = vmatprep.subr.bf16.mxu1 (!%p138_p2), %v1858_v5 }
   0xd   : > { %s2420_s13 = smov (!%p161_p3, %s1506_s13), 1  ;;  %1861 = vmatpush3.bf16.msra.mxu0 %v1858_v5  ;;  %1866 = vmatpush3.bf16.msra.mxu1 %v1858_v5 }
   0xe   : > { %s1868_s22 = smul.u32 736, %s2420_s13  ;;  %1714 = vmatprep.subr.msk.mxu0 %vm552_vm0, %v267_v6  ;;  %1864 = vmatprep.subr.msk.mxu1 %vm552_vm0, %v267_v6 }
  0x10   : > { %s1937_s27 = scalar_lea.vmem %s2415_s0, %s1868_s22  ;;  %s2141_s5 = scalar_lea.vmem %s2418_s3, %s1868_s22 }
  0x11   : > { %v171_v7 = vld [vmem:[%s1937_s27] sm:$0xff]  ;;  %v217_v8 = vld [vmem:[%s1937_s27 + $0x170] sm:$0xff]  ;;  %v172_v9 = vld [vmem:[%s1937_s27 + $0x8] sm:$0xff]  ;;  %1715 = vmatpush3.msk.msra.mxu0 %vm552_vm0, %v267_v6  ;;  %1867 = vmatpush3.msk.msra.mxu1 %vm552_vm0, %v267_v6 }
  0x12   : > { %1716 = vmatprep.mubr.msk.f32.mxu0 %vm275_vm1, %v171_v7  ;;  %1785 = vmatprep.mubr.msk.f32.mxu1 %vm275_vm1, %v217_v8  ;;  %v218_v10 = vld [vmem:[%s1937_s27 + $0x178] sm:$0xff]  ;;  %v173_v11 = vld [vmem:[%s1937_s27 + $0x10] sm:$0xff]  ;;  %v219_v12 = vld [vmem:[%s1937_s27 + $0x180] sm:$0xff] }
  0x13   : > { %1717 = vmatmul.mubr.msk.f32.vlgmr.msra.gmra.mrb[0].mxu0 %vm275_vm1, %v172_v9  ;;  %1786 = vmatmul.mubr.msk.f32.vlgmr.msra.gmra.mrb[0].mxu1 %vm275_vm1, %v218_v10  ;;  %v174_v13 = vld [vmem:[%s1937_s27 + $0x18] sm:$0xff]  ;;  %v220_v14 = vld [vmem:[%s1937_s27 + $0x188] sm:$0xff]  ;;  %v175_v15 = vld [vmem:[%s1937_s27 + $0x20] sm:$0xff] }
  0x14   : > { %1719 = vmatprep.mubr.msk.f32.mxu0 %vm275_vm1, %v173_v11  ;;  %1788 = vmatprep.mubr.msk.f32.mxu1 %vm275_vm1, %v219_v12  ;;  %v221_v16 = vld [vmem:[%s1937_s27 + $0x190] sm:$0xff]  ;;  %v176_v17 = vld [vmem:[%s1937_s27 + $0x28] sm:$0xff]  ;;  %v222_v18 = vld [vmem:[%s1937_s27 + $0x198] sm:$0xff] }
  0x15   : > { %v177_v19 = vld [vmem:[%s1937_s27 + $0x30] sm:$0xff]  ;;  %v223_v20 = vld [vmem:[%s1937_s27 + $0x1a0] sm:$0xff]  ;;  %v178_v21 = vld [vmem:[%s1937_s27 + $0x38] sm:$0xff] }
  0x16   : > { %v224_v22 = vld [vmem:[%s1937_s27 + $0x1a8] sm:$0xff]  ;;  %v179_v23 = vld [vmem:[%s1937_s27 + $0x40] sm:$0xff]  ;;  %v225_v24 = vld [vmem:[%s1937_s27 + $0x1b0] sm:$0xff] }
  0x17   : > { %1720 = vmatmul.mubr.msk.f32.gmra.mrb[2].mxu0 %vm275_vm1, %v174_v13  ;;  %1789 = vmatmul.mubr.msk.f32.gmra.mrb[2].mxu1 %vm275_vm1, %v220_v14  ;;  %v180_v25 = vld [vmem:[%s1937_s27 + $0x48] sm:$0xff]  ;;  %v226_v26 = vld [vmem:[%s1937_s27 + $0x1b8] sm:$0xff]  ;;  %v181_v27 = vld [vmem:[%s1937_s27 + $0x50] sm:$0xff] }
  0x18   : > { %1722 = vmatprep.mubr.msk.f32.mxu0 %vm275_vm1, %v175_v15  ;;  %1791 = vmatprep.mubr.msk.f32.mxu1 %vm275_vm1, %v221_v16  ;;  %v227_v28 = vld [vmem:[%s1937_s27 + $0x1c0] sm:$0xff]  ;;  %v182_v29 = vld [vmem:[%s1937_s27 + $0x58] sm:$0xff]  ;;  %v228_v30 = vld [vmem:[%s1937_s27 + $0x1c8] sm:$0xff] }
  0x19   : > { %v183_v31 = vld [vmem:[%s1937_s27 + $0x60] sm:$0xff]  ;;  %v229_v32 = vld [vmem:[%s1937_s27 + $0x1d0] sm:$0xff]  ;;  %v184_v33 = vld [vmem:[%s1937_s27 + $0x68] sm:$0xff] }
  0x1a   : > { %v230_v34 = vld [vmem:[%s1937_s27 + $0x1d8] sm:$0xff]  ;;  %v185_v35 = vld [vmem:[%s1937_s27 + $0x70] sm:$0xff]  ;;  %v231_v36 = vld [vmem:[%s1937_s27 + $0x1e0] sm:$0xff] }
  0x1b   : > { %1723 = vmatmul.mubr.msk.f32.gmra.mrb[4].mxu0 %vm275_vm1, %v176_v17  ;;  %1792 = vmatmul.mubr.msk.f32.gmra.mrb[4].mxu1 %vm275_vm1, %v222_v18  ;;  %v186_v37 = vld [vmem:[%s1937_s27 + $0x78] sm:$0xff]  ;;  %v232_v38 = vld [vmem:[%s1937_s27 + $0x1e8] sm:$0xff]  ;;  %v187_v39 = vld [vmem:[%s1937_s27 + $0x80] sm:$0xff] }
  0x1c   : > { %1725 = vmatprep.mubr.msk.f32.mxu0 %vm275_vm1, %v177_v19  ;;  %1794 = vmatprep.mubr.msk.f32.mxu1 %vm275_vm1, %v223_v20  ;;  %v233_v40 = vld [vmem:[%s1937_s27 + $0x1f0] sm:$0xff]  ;;  %v188_v41 = vld [vmem:[%s1937_s27 + $0x88] sm:$0xff]  ;;  %v234_v42 = vld [vmem:[%s1937_s27 + $0x1f8] sm:$0xff] }
  0x1d   : > { %v189_v43 = vld [vmem:[%s1937_s27 + $0x90] sm:$0xff]  ;;  %v235_v44 = vld [vmem:[%s1937_s27 + $0x200] sm:$0xff]  ;;  %v190_v45 = vld [vmem:[%s1937_s27 + $0x98] sm:$0xff] }
  0x1e   : > { %v236_v46 = vld [vmem:[%s1937_s27 + $0x208] sm:$0xff]  ;;  %v191_v47 = vld [vmem:[%s1937_s27 + $0xa0] sm:$0xff]  ;;  %v237_v48 = vld [vmem:[%s1937_s27 + $0x210] sm:$0xff] }
  0x1f   : > { %1726 = vmatmul.mubr.msk.f32.gmra.mrb[6].mxu0 %vm275_vm1, %v178_v21  ;;  %1795 = vmatmul.mubr.msk.f32.gmra.mrb[6].mxu1 %vm275_vm1, %v224_v22  ;;  %v192_v49 = vld [vmem:[%s1937_s27 + $0xa8] sm:$0xff]  ;;  %v238_v50 = vld [vmem:[%s1937_s27 + $0x218] sm:$0xff]  ;;  %v193_v51 = vld [vmem:[%s1937_s27 + $0xb0] sm:$0xff] }
  0x20   : > { %1728 = vmatprep.mubr.msk.f32.mxu0 %vm275_vm1, %v179_v23  ;;  %1797 = vmatprep.mubr.msk.f32.mxu1 %vm275_vm1, %v225_v24  ;;  %v239_v52 = vld [vmem:[%s1937_s27 + $0x220] sm:$0xff]  ;;  %v194_v53 = vld [vmem:[%s1937_s27 + $0xb8] sm:$0xff]  ;;  %v240_v54 = vld [vmem:[%s1937_s27 + $0x228] sm:$0xff] }
  0x21   : > { %v195_v55 = vld [vmem:[%s1937_s27 + $0xc0] sm:$0xff]  ;;  %v241_v56 = vld [vmem:[%s1937_s27 + $0x230] sm:$0xff]  ;;  %v196_v57 = vld [vmem:[%s1937_s27 + $0xc8] sm:$0xff] }
  0x22   : > { %v242_v58 = vld [vmem:[%s1937_s27 + $0x238] sm:$0xff]  ;;  %v197_v59 = vld [vmem:[%s1937_s27 + $0xd0] sm:$0xff]  ;;  %v243_v60 = vld [vmem:[%s1937_s27 + $0x240] sm:$0xff] }
  0x23   : > { %1729 = vmatmul.mubr.msk.f32.gmra.mrb[8].mxu0 %vm275_vm1, %v180_v25  ;;  %1798 = vmatmul.mubr.msk.f32.gmra.mrb[8].mxu1 %vm275_vm1, %v226_v26  ;;  %v198_v61 = vld [vmem:[%s1937_s27 + $0xd8] sm:$0xff]  ;;  %v244_v62 = vld [vmem:[%s1937_s27 + $0x248] sm:$0xff]  ;;  %v199_v63 = vld [vmem:[%s1937_s27 + $0xe0] sm:$0xff] }
  0x24   : > { %1731 = vmatprep.mubr.msk.f32.mxu0 %vm275_vm1, %v181_v27  ;;  %1800 = vmatprep.mubr.msk.f32.mxu1 %vm275_vm1, %v227_v28  ;;  %v245_v0 = vld [vmem:[%s1937_s27 + $0x250] sm:$0xff]  ;;  %v200_v1 = vld [vmem:[%s1937_s27 + $0xe8] sm:$0xff]  ;;  %v246_v2 = vld [vmem:[%s1937_s27 + $0x258] sm:$0xff] }
  0x25   : > { %v201_v3 = vld [vmem:[%s1937_s27 + $0xf0] sm:$0xff]  ;;  %v247_v4 = vld [vmem:[%s1937_s27 + $0x260] sm:$0xff]  ;;  %v202_v5 = vld [vmem:[%s1937_s27 + $0xf8] sm:$0xff] }
  0x26   : > { %v248_v6 = vld [vmem:[%s1937_s27 + $0x268] sm:$0xff]  ;;  %v203_v7 = vld [vmem:[%s1937_s27 + $0x100] sm:$0xff]  ;;  %v249_v8 = vld [vmem:[%s1937_s27 + $0x270] sm:$0xff] }
  0x27   : > { %1732 = vmatmul.mubr.msk.f32.gmra.mrb[10].mxu0 %vm275_vm1, %v182_v29  ;;  %1801 = vmatmul.mubr.msk.f32.gmra.mrb[10].mxu1 %vm275_vm1, %v228_v30  ;;  %v204_v9 = vld [vmem:[%s1937_s27 + $0x108] sm:$0xff]  ;;  %v250_v10 = vld [vmem:[%s1937_s27 + $0x278] sm:$0xff]  ;;  %v205_v11 = vld [vmem:[%s1937_s27 + $0x110] sm:$0xff] }
  0x28   : > { %1734 = vmatprep.mubr.msk.f32.mxu0 %vm275_vm1, %v183_v31  ;;  %1803 = vmatprep.mubr.msk.f32.mxu1 %vm275_vm1, %v229_v32  ;;  %v251_v12 = vld [vmem:[%s1937_s27 + $0x280] sm:$0xff]  ;;  %v206_v13 = vld [vmem:[%s1937_s27 + $0x118] sm:$0xff]  ;;  %v252_v14 = vld [vmem:[%s1937_s27 + $0x288] sm:$0xff] }
  0x29   : > { %v207_v15 = vld [vmem:[%s1937_s27 + $0x120] sm:$0xff]  ;;  %v253_v16 = vld [vmem:[%s1937_s27 + $0x290] sm:$0xff]  ;;  %v208_v17 = vld [vmem:[%s1937_s27 + $0x128] sm:$0xff] }
  0x2a   : > { %v254_v18 = vld [vmem:[%s1937_s27 + $0x298] sm:$0xff]  ;;  %v209_v19 = vld [vmem:[%s1937_s27 + $0x130] sm:$0xff]  ;;  %v255_v20 = vld [vmem:[%s1937_s27 + $0x2a0] sm:$0xff] }
  0x2b   : > { %1735 = vmatmul.mubr.msk.f32.gmra.mrb[12].mxu0 %vm275_vm1, %v184_v33  ;;  %1804 = vmatmul.mubr.msk.f32.gmra.mrb[12].mxu1 %vm275_vm1, %v230_v34  ;;  %v210_v21 = vld [vmem:[%s1937_s27 + $0x138] sm:$0xff]  ;;  %v256_v22 = vld [vmem:[%s1937_s27 + $0x2a8] sm:$0xff]  ;;  %v211_v23 = vld [vmem:[%s1937_s27 + $0x140] sm:$0xff] }
  0x2c   : > { %1737 = vmatprep.mubr.msk.f32.mxu0 %vm275_vm1, %v185_v35  ;;  %1806 = vmatprep.mubr.msk.f32.mxu1 %vm275_vm1, %v231_v36  ;;  %v257_v24 = vld [vmem:[%s1937_s27 + $0x2b0] sm:$0xff]  ;;  %v212_v25 = vld [vmem:[%s1937_s27 + $0x148] sm:$0xff]  ;;  %v258_v26 = vld [vmem:[%s1937_s27 + $0x2b8] sm:$0xff] }
  0x2d   : > { %v213_v27 = vld [vmem:[%s1937_s27 + $0x150] sm:$0xff]  ;;  %v259_v28 = vld [vmem:[%s1937_s27 + $0x2c0] sm:$0xff]  ;;  %v214_v29 = vld [vmem:[%s1937_s27 + $0x158] sm:$0xff] }
  0x2e   : > { %v260_v30 = vld [vmem:[%s1937_s27 + $0x2c8] sm:$0xff]  ;;  %v215_v31 = vld [vmem:[%s1937_s27 + $0x160] sm:$0xff]  ;;  %v261_v32 = vld [vmem:[%s1937_s27 + $0x2d0] sm:$0xff] }
  0x2f   : > { %1738 = vmatmul.mubr.msk.f32.gmra.mrb[14].mxu0 %vm275_vm1, %v186_v37  ;;  %1807 = vmatmul.mubr.msk.f32.gmra.mrb[14].mxu1 %vm275_vm1, %v232_v38  ;;  %v216_v33 = vld [vmem:[%s1937_s27 + $0x168] sm:$0xff]  ;;  %v262_v34 = vld [vmem:[%s1937_s27 + $0x2d8] sm:$0x1]  ;;  %v2130_v35 = vld [vmem:[%s2417_s2] ss:$0 sm:$0xff] }
  0x30   : > { %1740 = vmatprep.mubr.msk.f32.mxu0 %vm275_vm1, %v187_v39  ;;  %1809 = vmatprep.mubr.msk.f32.mxu1 %vm275_vm1, %v233_v40 }
  0x33   : > { %1741 = vmatmul.mubr.msk.f32.gmra.mrb[16].mxu0 %vm275_vm1, %v188_v41  ;;  %1810 = vmatmul.mubr.msk.f32.gmra.mrb[16].mxu1 %vm275_vm1, %v234_v42 }
  0x34   : > { %1743 = vmatprep.mubr.msk.f32.mxu0 %vm275_vm1, %v189_v43  ;;  %1812 = vmatprep.mubr.msk.f32.mxu1 %vm275_vm1, %v235_v44 }
  0x37   : > { %1744 = vmatmul.mubr.msk.f32.gmra.mrb[18].mxu0 %vm275_vm1, %v190_v45  ;;  %1813 = vmatmul.mubr.msk.f32.gmra.mrb[18].mxu1 %vm275_vm1, %v236_v46 }
  0x38   : > { %1746 = vmatprep.mubr.msk.f32.mxu0 %vm275_vm1, %v191_v47  ;;  %1815 = vmatprep.mubr.msk.f32.mxu1 %vm275_vm1, %v237_v48 }
  0x3b   : > { %1747 = vmatmul.mubr.msk.f32.gmra.mrb[20].mxu0 %vm275_vm1, %v192_v49  ;;  %1816 = vmatmul.mubr.msk.f32.gmra.mrb[20].mxu1 %vm275_vm1, %v238_v50 }
  0x3c   : > { %1749 = vmatprep.mubr.msk.f32.mxu0 %vm275_vm1, %v193_v51  ;;  %1818 = vmatprep.mubr.msk.f32.mxu1 %vm275_vm1, %v239_v52 }
  0x3f   : > { %1750 = vmatmul.mubr.msk.f32.gmra.mrb[22].mxu0 %vm275_vm1, %v194_v53  ;;  %1819 = vmatmul.mubr.msk.f32.gmra.mrb[22].mxu1 %vm275_vm1, %v240_v54 }
  0x40   : > { %1752 = vmatprep.mubr.msk.f32.mxu0 %vm275_vm1, %v195_v55  ;;  %1821 = vmatprep.mubr.msk.f32.mxu1 %vm275_vm1, %v241_v56 }
  0x43   : > { %1753 = vmatmul.mubr.msk.f32.gmra.mrb[24].mxu0 %vm275_vm1, %v196_v57  ;;  %1822 = vmatmul.mubr.msk.f32.gmra.mrb[24].mxu1 %vm275_vm1, %v242_v58 }
  0x44   : > { %1755 = vmatprep.mubr.msk.f32.mxu0 %vm275_vm1, %v197_v59  ;;  %1824 = vmatprep.mubr.msk.f32.mxu1 %vm275_vm1, %v243_v60 }
  0x47   : > { %1756 = vmatmul.mubr.msk.f32.gmra.mrb[26].mxu0 %vm275_vm1, %v198_v61  ;;  %1825 = vmatmul.mubr.msk.f32.gmra.mrb[26].mxu1 %vm275_vm1, %v244_v62 }
  0x48   : > { %1758 = vmatprep.mubr.msk.f32.mxu0 %vm275_vm1, %v199_v63  ;;  %1827 = vmatprep.mubr.msk.f32.mxu1 %vm275_vm1, %v245_v0 }
  0x4b   : > { %1759 = vmatmul.mubr.msk.f32.gmra.mrb[28].mxu0 %vm275_vm1, %v200_v1  ;;  %1828 = vmatmul.mubr.msk.f32.gmra.mrb[28].mxu1 %vm275_vm1, %v246_v2 }
  0x4c   : > { %1761 = vmatprep.mubr.msk.f32.mxu0 %vm275_vm1, %v201_v3  ;;  %1830 = vmatprep.mubr.msk.f32.mxu1 %vm275_vm1, %v247_v4 }
  0x4f   : > { %1762 = vmatmul.mubr.msk.f32.gmra.mrb[30].mxu0 %vm275_vm1, %v202_v5  ;;  %1831 = vmatmul.mubr.msk.f32.gmra.mrb[30].mxu1 %vm275_vm1, %v248_v6 }
  0x50   : > { %1764 = vmatprep.mubr.msk.f32.mxu0 %vm275_vm1, %v203_v7  ;;  %1833 = vmatprep.mubr.msk.f32.mxu1 %vm275_vm1, %v249_v8 }
  0x53   : > { %1765 = vmatmul.mubr.msk.f32.gmra.mrb[32].mxu0 %vm275_vm1, %v204_v9  ;;  %1834 = vmatmul.mubr.msk.f32.gmra.mrb[32].mxu1 %vm275_vm1, %v250_v10 }
  0x54   : > { %1767 = vmatprep.mubr.msk.f32.mxu0 %vm275_vm1, %v205_v11  ;;  %1836 = vmatprep.mubr.msk.f32.mxu1 %vm275_vm1, %v251_v12 }
  0x57   : > { %1768 = vmatmul.mubr.msk.f32.gmra.mrb[34].mxu0 %vm275_vm1, %v206_v13  ;;  %1837 = vmatmul.mubr.msk.f32.gmra.mrb[34].mxu1 %vm275_vm1, %v252_v14 }
  0x58   : > { %1770 = vmatprep.mubr.msk.f32.mxu0 %vm275_vm1, %v207_v15  ;;  %1839 = vmatprep.mubr.msk.f32.mxu1 %vm275_vm1, %v253_v16 }
  0x5b   : > { %1771 = vmatmul.mubr.msk.f32.gmra.mrb[36].mxu0 %vm275_vm1, %v208_v17  ;;  %1840 = vmatmul.mubr.msk.f32.gmra.mrb[36].mxu1 %vm275_vm1, %v254_v18 }
  0x5c   : > { %1773 = vmatprep.mubr.msk.f32.mxu0 %vm275_vm1, %v209_v19  ;;  %1842 = vmatprep.mubr.msk.f32.mxu1 %vm275_vm1, %v255_v20 }
  0x5f   : > { %1774 = vmatmul.mubr.msk.f32.gmra.mrb[38].mxu0 %vm275_vm1, %v210_v21  ;;  %1843 = vmatmul.mubr.msk.f32.gmra.mrb[38].mxu1 %vm275_vm1, %v256_v22 }
  0x60   : > { %1776 = vmatprep.mubr.msk.f32.mxu0 %vm275_vm1, %v211_v23  ;;  %1845 = vmatprep.mubr.msk.f32.mxu1 %vm275_vm1, %v257_v24 }
  0x63   : > { %1777 = vmatmul.mubr.msk.f32.gmra.mrb[40].mxu0 %vm275_vm1, %v212_v25  ;;  %1846 = vmatmul.mubr.msk.f32.gmra.mrb[40].mxu1 %vm275_vm1, %v258_v26 }
  0x64   : > { %1779 = vmatprep.mubr.msk.f32.mxu0 %vm275_vm1, %v213_v27  ;;  %1848 = vmatprep.mubr.msk.f32.mxu1 %vm275_vm1, %v259_v28 }
  0x67   : > { %1780 = vmatmul.mubr.msk.f32.gmra.mrb[42].mxu0 %vm275_vm1, %v214_v29  ;;  %1849 = vmatmul.mubr.msk.f32.gmra.mrb[42].mxu1 %vm275_vm1, %v260_v30 }
  0x68   : > { %1782 = vmatprep.mubr.msk.f32.mxu0 %vm275_vm1, %v215_v31  ;;  %1851 = vmatprep.mubr.msk.f32.mxu1 %vm275_vm1, %v261_v32 }
  0x6b   : > { %1783 = vmatmul.mubr.msk.f32.gmra.mrb[44].mxu0 %vm275_vm1, %v216_v33  ;;  %1852 = vmatmul.mubr.msk.f32.gmra.mrb[44].mxu1 %vm275_vm1, %v262_v34 }
  0xe6   : > { %v1718_v36 = vpop.f32.mrb[0].mxu0  ;;  %v1787_v37 = vpop.f32.mrb[0].mxu1 }
  0xe7   : > { %v628_v38 = vadd.f32 %v1718_v36, %v2130_v35  ;;  %v858_v39 = vadd.f32 %v1787_v37, %v2130_v35  ;;  %v622_v40 = vpop.f32.mrb[1].mxu0  ;;  %v852_v41 = vpop.f32.mrb[1].mxu1 }
  0xe8   : > { %v623_v42 = vadd.f32 %v2130_v35, %v622_v40  ;;  %v853_v43 = vadd.f32 %v2130_v35, %v852_v41 }
  0xe9   : > { %vm1082_vm3 = vcmp.ge.f32.partialorder %v628_v38, 0.0  ;;  %v1174_v44 = vmul.f32 0.01, %v628_v38  ;;  %vm1128_vm4 = vcmp.ge.f32.partialorder %v858_v39, 0.0  ;;  %v1220_v45 = vmul.f32 0.01, %v858_v39 }
  0xea   : > { %vm1081_vm5 = vcmp.ge.f32.partialorder %v623_v42, 0.0  ;;  %v1173_v46 = vmul.f32 0.01, %v623_v42  ;;  %vm1127_vm6 = vcmp.ge.f32.partialorder %v853_v43, 0.0  ;;  %v1219_v47 = vmul.f32 0.01, %v853_v43 }
  0xeb   : > { %v1266_v48 = vsel %vm1082_vm3, %v628_v38, %v1174_v44  ;;  %v1312_v49 = vsel %vm1128_vm4, %v858_v39, %v1220_v45  ;;  %v1721_v50 = vpop.f32.mrb[2].mxu0  ;;  %v1790_v51 = vpop.f32.mrb[2].mxu1 }
  0xec   : > { %1359 = vst.msk [vmem:[%s2141_s5 + $0x8] sm:$0xff] %vm1357_vm2, %v1266_v48  ;;  %1405 = vst.msk [vmem:[%s2141_s5 + $0x178] sm:$0xff] %vm1357_vm2, %v1312_v49  ;;  %v1265_v52 = vsel %vm1081_vm5, %v623_v42, %v1173_v46  ;;  %v1311_v53 = vsel %vm1127_vm6, %v853_v43, %v1219_v47  ;;  %v638_v54 = vadd.f32 %v1721_v50, %v2130_v35  ;;  %v632_v56 = vpop.f32.mrb[3].mxu0  ;;  %v862_v57 = vpop.f32.mrb[3].mxu1 }
  0xed   : > { %v868_v55 = vadd.f32 %v1790_v51, %v2130_v35  ;;  %1358 = vst.msk [vmem:[%s2141_s5] sm:$0xff] %vm1357_vm2, %v1265_v52  ;;  %1404 = vst.msk [vmem:[%s2141_s5 + $0x170] sm:$0xff] %vm1357_vm2, %v1311_v53  ;;  %v633_v58 = vadd.f32 %v2130_v35, %v632_v56  ;;  %v863_v59 = vadd.f32 %v2130_v35, %v862_v57 }
  0xee   : > { %vm1084_vm7 = vcmp.ge.f32.partialorder %v638_v54, 0.0  ;;  %v1176_v60 = vmul.f32 0.01, %v638_v54  ;;  %v1724_v2 = vpop.f32.mrb[4].mxu0  ;;  %v1793_v3 = vpop.f32.mrb[4].mxu1 }
  0xef   : > { %vm1130_vm8 = vcmp.ge.f32.partialorder %v868_v55, 0.0  ;;  %v1222_v61 = vmul.f32 0.01, %v868_v55  ;;  %vm1083_vm9 = vcmp.ge.f32.partialorder %v633_v58, 0.0  ;;  %v1175_v62 = vmul.f32 0.01, %v633_v58 }
  0xf0   : > { %vm1129_vm10 = vcmp.ge.f32.partialorder %v863_v59, 0.0  ;;  %v1221_v63 = vmul.f32 0.01, %v863_v59  ;;  %v1268_v0 = vsel %vm1084_vm7, %v638_v54, %v1176_v60  ;;  %v648_v6 = vadd.f32 %v1724_v2, %v2130_v35  ;;  %v642_v8 = vpop.f32.mrb[5].mxu0  ;;  %v872_v9 = vpop.f32.mrb[5].mxu1 }
  0xf1   : > { %v1314_v1 = vsel %vm1130_vm8, %v868_v55, %v1222_v61  ;;  %1361 = vst.msk [vmem:[%s2141_s5 + $0x18] sm:$0xff] %vm1357_vm2, %v1268_v0  ;;  %v1267_v4 = vsel %vm1083_vm9, %v633_v58, %v1175_v62  ;;  %v878_v7 = vadd.f32 %v1793_v3, %v2130_v35  ;;  %v643_v10 = vadd.f32 %v2130_v35, %v642_v8 }
  0xf2   : > { %1407 = vst.msk [vmem:[%s2141_s5 + $0x188] sm:$0xff] %vm1357_vm2, %v1314_v1  ;;  %v1313_v5 = vsel %vm1129_vm10, %v863_v59, %v1221_v63  ;;  %1360 = vst.msk [vmem:[%s2141_s5 + $0x10] sm:$0xff] %vm1357_vm2, %v1267_v4  ;;  %v873_v11 = vadd.f32 %v2130_v35, %v872_v9  ;;  %v1727_v12 = vpop.f32.mrb[6].mxu0  ;;  %v1796_v13 = vpop.f32.mrb[6].mxu1  ;;  %vm1086_vm11 = vcmp.ge.f32.partialorder %v648_v6, 0.0 }
  0xf3   : > { %1406 = vst.msk [vmem:[%s2141_s5 + $0x180] sm:$0xff] %vm1357_vm2, %v1313_v5  ;;  %v1178_v14 = vmul.f32 0.01, %v648_v6  ;;  %vm1132_vm12 = vcmp.ge.f32.partialorder %v878_v7, 0.0  ;;  %v1224_v15 = vmul.f32 0.01, %v878_v7  ;;  %v658_v20 = vadd.f32 %v1727_v12, %v2130_v35 }
  0xf4   : > { %vm1085_vm13 = vcmp.ge.f32.partialorder %v643_v10, 0.0  ;;  %v1177_v16 = vmul.f32 0.01, %v643_v10  ;;  %vm1131_vm14 = vcmp.ge.f32.partialorder %v873_v11, 0.0  ;;  %v1223_v17 = vmul.f32 0.01, %v873_v11 }
  0xf5   : > { %v1270_v18 = vsel %vm1086_vm11, %v648_v6, %v1178_v14  ;;  %v1316_v19 = vsel %vm1132_vm12, %v878_v7, %v1224_v15  ;;  %v888_v21 = vadd.f32 %v1796_v13, %v2130_v35  ;;  %v652_v22 = vpop.f32.mrb[7].mxu0  ;;  %v882_v23 = vpop.f32.mrb[7].mxu1  ;;  %vm1088_vm15 = vcmp.ge.f32.partialorder %v658_v20, 0.0 }
  0xf6   : > { %1363 = vst.msk [vmem:[%s2141_s5 + $0x28] sm:$0xff] %vm1357_vm2, %v1270_v18  ;;  %1409 = vst.msk [vmem:[%s2141_s5 + $0x198] sm:$0xff] %vm1357_vm2, %v1316_v19  ;;  %v1269_v24 = vsel %vm1085_vm13, %v643_v10, %v1177_v16  ;;  %v1315_v25 = vsel %vm1131_vm14, %v873_v11, %v1223_v17  ;;  %v653_v26 = vadd.f32 %v2130_v35, %v652_v22  ;;  %v1730_v28 = vpop.f32.mrb[8].mxu0  ;;  %v1799_v29 = vpop.f32.mrb[8].mxu1  ;;  %v1180_v30 = vmul.f32 0.01, %v658_v20 }
  0xf7   : > { %v883_v27 = vadd.f32 %v2130_v35, %v882_v23  ;;  %1362 = vst.msk [vmem:[%s2141_s5 + $0x20] sm:$0xff] %vm1357_vm2, %v1269_v24  ;;  %1408 = vst.msk [vmem:[%s2141_s5 + $0x190] sm:$0xff] %vm1357_vm2, %v1315_v25  ;;  %vm1134_vm0 = vcmp.ge.f32.partialorder %v888_v21, 0.0  ;;  %v1226_v31 = vmul.f32 0.01, %v888_v21  ;;  %v668_v37 = vadd.f32 %v1730_v28, %v2130_v35  ;;  %v662_v39 = vpop.f32.mrb[9].mxu0 }
  0xf8   : > { %vm1087_vm1 = vcmp.ge.f32.partialorder %v653_v26, 0.0  ;;  %v1179_v32 = vmul.f32 0.01, %v653_v26  ;;  %v1272_v34 = vsel %vm1088_vm15, %v658_v20, %v1180_v30  ;;  %v898_v38 = vadd.f32 %v1799_v29, %v2130_v35  ;;  %v892_v40 = vpop.f32.mrb[9].mxu1 }
  0xf9   : > { %vm1133_vm3 = vcmp.ge.f32.partialorder %v883_v27, 0.0  ;;  %v1225_v33 = vmul.f32 0.01, %v883_v27  ;;  %v1318_v36 = vsel %vm1134_vm0, %v888_v21, %v1226_v31  ;;  %1365 = vst.msk [vmem:[%s2141_s5 + $0x38] sm:$0xff] %vm1357_vm2, %v1272_v34  ;;  %v663_v43 = vadd.f32 %v2130_v35, %v662_v39 }
  0xfa   : > { %1411 = vst.msk [vmem:[%s2141_s5 + $0x1a8] sm:$0xff] %vm1357_vm2, %v1318_v36  ;;  %v1271_v41 = vsel %vm1087_vm1, %v653_v26, %v1179_v32  ;;  %v893_v44 = vadd.f32 %v2130_v35, %v892_v40  ;;  %v1733_v45 = vpop.f32.mrb[10].mxu0  ;;  %v1802_v46 = vpop.f32.mrb[10].mxu1  ;;  %vm1090_vm4 = vcmp.ge.f32.partialorder %v668_v37, 0.0  ;;  %v1182_v47 = vmul.f32 0.01, %v668_v37 }
  0xfb   : > { %v1317_v42 = vsel %vm1133_vm3, %v883_v27, %v1225_v33  ;;  %1364 = vst.msk [vmem:[%s2141_s5 + $0x30] sm:$0xff] %vm1357_vm2, %v1271_v41  ;;  %vm1136_vm5 = vcmp.ge.f32.partialorder %v898_v38, 0.0  ;;  %v1228_v48 = vmul.f32 0.01, %v898_v38  ;;  %vm1089_vm6 = vcmp.ge.f32.partialorder %v663_v43, 0.0  ;;  %v672_v55 = vpop.f32.mrb[11].mxu0 }
  0xfc   : > { %1410 = vst.msk [vmem:[%s2141_s5 + $0x1a0] sm:$0xff] %vm1357_vm2, %v1317_v42  ;;  %v1181_v49 = vmul.f32 0.01, %v663_v43  ;;  %vm1135_vm7 = vcmp.ge.f32.partialorder %v893_v44, 0.0  ;;  %v1227_v50 = vmul.f32 0.01, %v893_v44  ;;  %v1274_v51 = vsel %vm1090_vm4, %v668_v37, %v1182_v47 }
  0xfd   : > { %v1320_v52 = vsel %vm1136_vm5, %v898_v38, %v1228_v48  ;;  %v678_v53 = vadd.f32 %v1733_v45, %v2130_v35  ;;  %v908_v54 = vadd.f32 %v1802_v46, %v2130_v35  ;;  %v902_v56 = vpop.f32.mrb[11].mxu1  ;;  %1367 = vst.msk [vmem:[%s2141_s5 + $0x48] sm:$0xff] %vm1357_vm2, %v1274_v51  ;;  %v673_v59 = vadd.f32 %v2130_v35, %v672_v55 }
  0xfe   : > { %1413 = vst.msk [vmem:[%s2141_s5 + $0x1b8] sm:$0xff] %vm1357_vm2, %v1320_v52  ;;  %v1273_v57 = vsel %vm1089_vm6, %v663_v43, %v1181_v49  ;;  %v1319_v58 = vsel %vm1135_vm7, %v893_v44, %v1227_v50  ;;  %v903_v60 = vadd.f32 %v2130_v35, %v902_v56  ;;  %v1736_v61 = vpop.f32.mrb[12].mxu0  ;;  %v1805_v62 = vpop.f32.mrb[12].mxu1 }
  0xff   : > { %1366 = vst.msk [vmem:[%s2141_s5 + $0x40] sm:$0xff] %vm1357_vm2, %v1273_v57  ;;  %1412 = vst.msk [vmem:[%s2141_s5 + $0x1b0] sm:$0xff] %vm1357_vm2, %v1319_v58  ;;  %vm1092_vm8 = vcmp.ge.f32.partialorder %v678_v53, 0.0  ;;  %v1184_v63 = vmul.f32 0.01, %v678_v53  ;;  %vm1138_vm9 = vcmp.ge.f32.partialorder %v908_v54, 0.0  ;;  %v688_v5 = vadd.f32 %v1736_v61, %v2130_v35 }
 0x100   : > { %v1230_v0 = vmul.f32 0.01, %v908_v54  ;;  %vm1091_vm10 = vcmp.ge.f32.partialorder %v673_v59, 0.0  ;;  %v1183_v1 = vmul.f32 0.01, %v673_v59  ;;  %vm1137_vm11 = vcmp.ge.f32.partialorder %v903_v60, 0.0 }
 0x101   : > { %v1229_v2 = vmul.f32 0.01, %v903_v60  ;;  %v1276_v3 = vsel %vm1092_vm8, %v678_v53, %v1184_v63  ;;  %v918_v6 = vadd.f32 %v1805_v62, %v2130_v35  ;;  %v682_v7 = vpop.f32.mrb[13].mxu0  ;;  %v912_v8 = vpop.f32.mrb[13].mxu1  ;;  %vm1094_vm12 = vcmp.ge.f32.partialorder %v688_v5, 0.0 }
 0x102   : > { %v1322_v4 = vsel %vm1138_vm9, %v908_v54, %v1230_v0  ;;  %1369 = vst.msk [vmem:[%s2141_s5 + $0x58] sm:$0xff] %vm1357_vm2, %v1276_v3  ;;  %v1275_v9 = vsel %vm1091_vm10, %v673_v59, %v1183_v1  ;;  %v683_v11 = vadd.f32 %v2130_v35, %v682_v7  ;;  %v913_v12 = vadd.f32 %v2130_v35, %v912_v8  ;;  %v1739_v13 = vpop.f32.mrb[14].mxu0  ;;  %v1808_v14 = vpop.f32.mrb[14].mxu1 }
 0x103   : > { %1415 = vst.msk [vmem:[%s2141_s5 + $0x1c8] sm:$0xff] %vm1357_vm2, %v1322_v4  ;;  %v1321_v10 = vsel %vm1137_vm11, %v903_v60, %v1229_v2  ;;  %1368 = vst.msk [vmem:[%s2141_s5 + $0x50] sm:$0xff] %vm1357_vm2, %v1275_v9  ;;  %v1186_v15 = vmul.f32 0.01, %v688_v5  ;;  %vm1140_vm13 = vcmp.ge.f32.partialorder %v918_v6, 0.0  ;;  %v698_v21 = vadd.f32 %v1739_v13, %v2130_v35  ;;  %v692_v23 = vpop.f32.mrb[15].mxu0 }
 0x104   : > { %1414 = vst.msk [vmem:[%s2141_s5 + $0x1c0] sm:$0xff] %vm1357_vm2, %v1321_v10  ;;  %v1232_v16 = vmul.f32 0.01, %v918_v6  ;;  %vm1093_vm14 = vcmp.ge.f32.partialorder %v683_v11, 0.0  ;;  %v1185_v17 = vmul.f32 0.01, %v683_v11  ;;  %v928_v22 = vadd.f32 %v1808_v14, %v2130_v35 }
 0x105   : > { %vm1139_vm15 = vcmp.ge.f32.partialorder %v913_v12, 0.0  ;;  %v1231_v18 = vmul.f32 0.01, %v913_v12  ;;  %v1278_v19 = vsel %vm1094_vm12, %v688_v5, %v1186_v15  ;;  %v922_v24 = vpop.f32.mrb[15].mxu1  ;;  %v693_v27 = vadd.f32 %v2130_v35, %v692_v23 }
 0x106   : > { %v1324_v20 = vsel %vm1140_vm13, %v918_v6, %v1232_v16  ;;  %1371 = vst.msk [vmem:[%s2141_s5 + $0x68] sm:$0xff] %vm1357_vm2, %v1278_v19  ;;  %v1277_v25 = vsel %vm1093_vm14, %v683_v11, %v1185_v17  ;;  %v923_v28 = vadd.f32 %v2130_v35, %v922_v24  ;;  %v1742_v29 = vpop.f32.mrb[16].mxu0  ;;  %v1811_v30 = vpop.f32.mrb[16].mxu1  ;;  %vm1096_vm0 = vcmp.ge.f32.partialorder %v698_v21, 0.0 }
 0x107   : > { %1417 = vst.msk [vmem:[%s2141_s5 + $0x1d8] sm:$0xff] %vm1357_vm2, %v1324_v20  ;;  %v1323_v26 = vsel %vm1139_vm15, %v913_v12, %v1231_v18  ;;  %1370 = vst.msk [vmem:[%s2141_s5 + $0x60] sm:$0xff] %vm1357_vm2, %v1277_v25  ;;  %v1188_v31 = vmul.f32 0.01, %v698_v21  ;;  %vm1142_vm1 = vcmp.ge.f32.partialorder %v928_v22, 0.0  ;;  %vm1095_vm3 = vcmp.ge.f32.partialorder %v693_v27, 0.0 }
 0x108   : > { %1416 = vst.msk [vmem:[%s2141_s5 + $0x1d0] sm:$0xff] %vm1357_vm2, %v1323_v26  ;;  %v1234_v32 = vmul.f32 0.01, %v928_v22  ;;  %v1187_v33 = vmul.f32 0.01, %v693_v27  ;;  %vm1141_vm4 = vcmp.ge.f32.partialorder %v923_v28, 0.0  ;;  %v708_v38 = vadd.f32 %v1742_v29, %v2130_v35 }
 0x109   : > { %v1233_v34 = vmul.f32 0.01, %v923_v28  ;;  %v1280_v36 = vsel %vm1096_vm0, %v698_v21, %v1188_v31  ;;  %v938_v39 = vadd.f32 %v1811_v30, %v2130_v35  ;;  %v702_v40 = vpop.f32.mrb[17].mxu0  ;;  %v932_v41 = vpop.f32.mrb[17].mxu1 }
 0x10a   : > { %v1326_v37 = vsel %vm1142_vm1, %v928_v22, %v1234_v32  ;;  %1373 = vst.msk [vmem:[%s2141_s5 + $0x78] sm:$0xff] %vm1357_vm2, %v1280_v36  ;;  %v1279_v42 = vsel %vm1095_vm3, %v693_v27, %v1187_v33  ;;  %v703_v44 = vadd.f32 %v2130_v35, %v702_v40  ;;  %v933_v45 = vadd.f32 %v2130_v35, %v932_v41  ;;  %v1745_v46 = vpop.f32.mrb[18].mxu0  ;;  %v1814_v47 = vpop.f32.mrb[18].mxu1 }
 0x10b   : > { %1419 = vst.msk [vmem:[%s2141_s5 + $0x1e8] sm:$0xff] %vm1357_vm2, %v1326_v37  ;;  %v1325_v43 = vsel %vm1141_vm4, %v923_v28, %v1233_v34  ;;  %1372 = vst.msk [vmem:[%s2141_s5 + $0x70] sm:$0xff] %vm1357_vm2, %v1279_v42  ;;  %vm1098_vm5 = vcmp.ge.f32.partialorder %v708_v38, 0.0  ;;  %v1190_v48 = vmul.f32 0.01, %v708_v38  ;;  %vm1144_vm6 = vcmp.ge.f32.partialorder %v938_v39, 0.0 }
 0x10c   : > { %1418 = vst.msk [vmem:[%s2141_s5 + $0x1e0] sm:$0xff] %vm1357_vm2, %v1325_v43  ;;  %v1236_v49 = vmul.f32 0.01, %v938_v39  ;;  %vm1097_vm7 = vcmp.ge.f32.partialorder %v703_v44, 0.0  ;;  %v1189_v50 = vmul.f32 0.01, %v703_v44  ;;  %v718_v54 = vadd.f32 %v1745_v46, %v2130_v35 }
 0x10d   : > { %vm1143_vm8 = vcmp.ge.f32.partialorder %v933_v45, 0.0  ;;  %v1235_v51 = vmul.f32 0.01, %v933_v45  ;;  %v1282_v52 = vsel %vm1098_vm5, %v708_v38, %v1190_v48  ;;  %v948_v55 = vadd.f32 %v1814_v47, %v2130_v35  ;;  %v712_v56 = vpop.f32.mrb[19].mxu0  ;;  %v942_v57 = vpop.f32.mrb[19].mxu1 }
 0x10e   : > { %v1328_v53 = vsel %vm1144_vm6, %v938_v39, %v1236_v49  ;;  %1375 = vst.msk [vmem:[%s2141_s5 + $0x88] sm:$0xff] %vm1357_vm2, %v1282_v52  ;;  %v1281_v58 = vsel %vm1097_vm7, %v703_v44, %v1189_v50  ;;  %v713_v60 = vadd.f32 %v2130_v35, %v712_v56  ;;  %v943_v61 = vadd.f32 %v2130_v35, %v942_v57  ;;  %v1748_v62 = vpop.f32.mrb[20].mxu0  ;;  %v1817_v63 = vpop.f32.mrb[20].mxu1 }
 0x10f   : > { %1421 = vst.msk [vmem:[%s2141_s5 + $0x1f8] sm:$0xff] %vm1357_vm2, %v1328_v53  ;;  %v1327_v59 = vsel %vm1143_vm8, %v933_v45, %v1235_v51  ;;  %1374 = vst.msk [vmem:[%s2141_s5 + $0x80] sm:$0xff] %vm1357_vm2, %v1281_v58  ;;  %vm1100_vm9 = vcmp.ge.f32.partialorder %v718_v54, 0.0  ;;  %v1192_v0 = vmul.f32 0.01, %v718_v54  ;;  %vm1146_vm10 = vcmp.ge.f32.partialorder %v948_v55, 0.0 }
 0x110   : > { %1420 = vst.msk [vmem:[%s2141_s5 + $0x1f0] sm:$0xff] %vm1357_vm2, %v1327_v59  ;;  %v1238_v1 = vmul.f32 0.01, %v948_v55  ;;  %vm1099_vm11 = vcmp.ge.f32.partialorder %v713_v60, 0.0  ;;  %v1191_v2 = vmul.f32 0.01, %v713_v60  ;;  %v728_v6 = vadd.f32 %v1748_v62, %v2130_v35 }
 0x111   : > { %vm1145_vm12 = vcmp.ge.f32.partialorder %v943_v61, 0.0  ;;  %v1237_v3 = vmul.f32 0.01, %v943_v61  ;;  %v1284_v4 = vsel %vm1100_vm9, %v718_v54, %v1192_v0  ;;  %v958_v7 = vadd.f32 %v1817_v63, %v2130_v35  ;;  %v722_v8 = vpop.f32.mrb[21].mxu0  ;;  %v952_v9 = vpop.f32.mrb[21].mxu1 }
 0x112   : > { %v1330_v5 = vsel %vm1146_vm10, %v948_v55, %v1238_v1  ;;  %1377 = vst.msk [vmem:[%s2141_s5 + $0x98] sm:$0xff] %vm1357_vm2, %v1284_v4  ;;  %v1283_v10 = vsel %vm1099_vm11, %v713_v60, %v1191_v2  ;;  %v723_v12 = vadd.f32 %v2130_v35, %v722_v8  ;;  %v953_v13 = vadd.f32 %v2130_v35, %v952_v9  ;;  %v1751_v14 = vpop.f32.mrb[22].mxu0  ;;  %v1820_v15 = vpop.f32.mrb[22].mxu1 }
 0x113   : > { %1423 = vst.msk [vmem:[%s2141_s5 + $0x208] sm:$0xff] %vm1357_vm2, %v1330_v5  ;;  %v1329_v11 = vsel %vm1145_vm12, %v943_v61, %v1237_v3  ;;  %1376 = vst.msk [vmem:[%s2141_s5 + $0x90] sm:$0xff] %vm1357_vm2, %v1283_v10  ;;  %vm1102_vm13 = vcmp.ge.f32.partialorder %v728_v6, 0.0  ;;  %v1194_v16 = vmul.f32 0.01, %v728_v6  ;;  %vm1148_vm14 = vcmp.ge.f32.partialorder %v958_v7, 0.0 }
 0x114   : > { %1422 = vst.msk [vmem:[%s2141_s5 + $0x200] sm:$0xff] %vm1357_vm2, %v1329_v11  ;;  %v1240_v17 = vmul.f32 0.01, %v958_v7  ;;  %vm1101_vm15 = vcmp.ge.f32.partialorder %v723_v12, 0.0  ;;  %v1193_v18 = vmul.f32 0.01, %v723_v12  ;;  %v738_v22 = vadd.f32 %v1751_v14, %v2130_v35 }
 0x115   : > { %vm1147_vm0 = vcmp.ge.f32.partialorder %v953_v13, 0.0  ;;  %v1239_v19 = vmul.f32 0.01, %v953_v13  ;;  %v1286_v20 = vsel %vm1102_vm13, %v728_v6, %v1194_v16  ;;  %v968_v23 = vadd.f32 %v1820_v15, %v2130_v35  ;;  %v732_v24 = vpop.f32.mrb[23].mxu0  ;;  %v962_v25 = vpop.f32.mrb[23].mxu1 }
 0x116   : > { %v1332_v21 = vsel %vm1148_vm14, %v958_v7, %v1240_v17  ;;  %1379 = vst.msk [vmem:[%s2141_s5 + $0xa8] sm:$0xff] %vm1357_vm2, %v1286_v20  ;;  %v1285_v26 = vsel %vm1101_vm15, %v723_v12, %v1193_v18  ;;  %v733_v28 = vadd.f32 %v2130_v35, %v732_v24  ;;  %v963_v29 = vadd.f32 %v2130_v35, %v962_v25  ;;  %v1754_v30 = vpop.f32.mrb[24].mxu0  ;;  %v1823_v31 = vpop.f32.mrb[24].mxu1 }
 0x117   : > { %1425 = vst.msk [vmem:[%s2141_s5 + $0x218] sm:$0xff] %vm1357_vm2, %v1332_v21  ;;  %v1331_v27 = vsel %vm1147_vm0, %v953_v13, %v1239_v19  ;;  %1378 = vst.msk [vmem:[%s2141_s5 + $0xa0] sm:$0xff] %vm1357_vm2, %v1285_v26  ;;  %vm1104_vm1 = vcmp.ge.f32.partialorder %v738_v22, 0.0  ;;  %v1196_v32 = vmul.f32 0.01, %v738_v22  ;;  %vm1150_vm3 = vcmp.ge.f32.partialorder %v968_v23, 0.0 }
 0x118   : > { %1424 = vst.msk [vmem:[%s2141_s5 + $0x210] sm:$0xff] %vm1357_vm2, %v1331_v27  ;;  %v1242_v33 = vmul.f32 0.01, %v968_v23  ;;  %vm1103_vm4 = vcmp.ge.f32.partialorder %v733_v28, 0.0  ;;  %v1195_v34 = vmul.f32 0.01, %v733_v28  ;;  %v748_v39 = vadd.f32 %v1754_v30, %v2130_v35 }
 0x119   : > { %vm1149_vm5 = vcmp.ge.f32.partialorder %v963_v29, 0.0  ;;  %v1241_v36 = vmul.f32 0.01, %v963_v29  ;;  %v1288_v37 = vsel %vm1104_vm1, %v738_v22, %v1196_v32  ;;  %v978_v40 = vadd.f32 %v1823_v31, %v2130_v35  ;;  %v742_v41 = vpop.f32.mrb[25].mxu0  ;;  %v972_v42 = vpop.f32.mrb[25].mxu1 }
 0x11a   : > { %v1334_v38 = vsel %vm1150_vm3, %v968_v23, %v1242_v33  ;;  %1381 = vst.msk [vmem:[%s2141_s5 + $0xb8] sm:$0xff] %vm1357_vm2, %v1288_v37  ;;  %v1287_v43 = vsel %vm1103_vm4, %v733_v28, %v1195_v34  ;;  %v743_v45 = vadd.f32 %v2130_v35, %v742_v41  ;;  %v973_v46 = vadd.f32 %v2130_v35, %v972_v42  ;;  %v1757_v47 = vpop.f32.mrb[26].mxu0  ;;  %v1826_v48 = vpop.f32.mrb[26].mxu1 }
 0x11b   : > { %1427 = vst.msk [vmem:[%s2141_s5 + $0x228] sm:$0xff] %vm1357_vm2, %v1334_v38  ;;  %v1333_v44 = vsel %vm1149_vm5, %v963_v29, %v1241_v36  ;;  %1380 = vst.msk [vmem:[%s2141_s5 + $0xb0] sm:$0xff] %vm1357_vm2, %v1287_v43  ;;  %vm1106_vm6 = vcmp.ge.f32.partialorder %v748_v39, 0.0  ;;  %v1198_v49 = vmul.f32 0.01, %v748_v39  ;;  %vm1152_vm7 = vcmp.ge.f32.partialorder %v978_v40, 0.0 }
 0x11c   : > { %1426 = vst.msk [vmem:[%s2141_s5 + $0x220] sm:$0xff] %vm1357_vm2, %v1333_v44  ;;  %v1244_v50 = vmul.f32 0.01, %v978_v40  ;;  %vm1105_vm8 = vcmp.ge.f32.partialorder %v743_v45, 0.0  ;;  %v1197_v51 = vmul.f32 0.01, %v743_v45  ;;  %v758_v55 = vadd.f32 %v1757_v47, %v2130_v35 }
 0x11d   : > { %vm1151_vm9 = vcmp.ge.f32.partialorder %v973_v46, 0.0  ;;  %v1243_v52 = vmul.f32 0.01, %v973_v46  ;;  %v1290_v53 = vsel %vm1106_vm6, %v748_v39, %v1198_v49  ;;  %v988_v56 = vadd.f32 %v1826_v48, %v2130_v35  ;;  %v752_v57 = vpop.f32.mrb[27].mxu0  ;;  %v982_v58 = vpop.f32.mrb[27].mxu1 }
 0x11e   : > { %v1336_v54 = vsel %vm1152_vm7, %v978_v40, %v1244_v50  ;;  %1383 = vst.msk [vmem:[%s2141_s5 + $0xc8] sm:$0xff] %vm1357_vm2, %v1290_v53  ;;  %v1289_v59 = vsel %vm1105_vm8, %v743_v45, %v1197_v51  ;;  %v753_v61 = vadd.f32 %v2130_v35, %v752_v57  ;;  %v983_v62 = vadd.f32 %v2130_v35, %v982_v58  ;;  %v1760_v63 = vpop.f32.mrb[28].mxu0  ;;  %v1829_v0 = vpop.f32.mrb[28].mxu1 }
 0x11f   : > { %1429 = vst.msk [vmem:[%s2141_s5 + $0x238] sm:$0xff] %vm1357_vm2, %v1336_v54  ;;  %v1335_v60 = vsel %vm1151_vm9, %v973_v46, %v1243_v52  ;;  %1382 = vst.msk [vmem:[%s2141_s5 + $0xc0] sm:$0xff] %vm1357_vm2, %v1289_v59  ;;  %vm1108_vm10 = vcmp.ge.f32.partialorder %v758_v55, 0.0  ;;  %v1200_v1 = vmul.f32 0.01, %v758_v55  ;;  %vm1154_vm11 = vcmp.ge.f32.partialorder %v988_v56, 0.0 }
 0x120   : > { %1428 = vst.msk [vmem:[%s2141_s5 + $0x230] sm:$0xff] %vm1357_vm2, %v1335_v60  ;;  %v1246_v2 = vmul.f32 0.01, %v988_v56  ;;  %vm1107_vm12 = vcmp.ge.f32.partialorder %v753_v61, 0.0  ;;  %v1199_v3 = vmul.f32 0.01, %v753_v61  ;;  %v768_v7 = vadd.f32 %v1760_v63, %v2130_v35 }
 0x121   : > { %vm1153_vm13 = vcmp.ge.f32.partialorder %v983_v62, 0.0  ;;  %v1245_v4 = vmul.f32 0.01, %v983_v62  ;;  %v1292_v5 = vsel %vm1108_vm10, %v758_v55, %v1200_v1  ;;  %v998_v8 = vadd.f32 %v1829_v0, %v2130_v35  ;;  %v762_v9 = vpop.f32.mrb[29].mxu0  ;;  %v992_v10 = vpop.f32.mrb[29].mxu1 }
 0x122   : > { %v1338_v6 = vsel %vm1154_vm11, %v988_v56, %v1246_v2  ;;  %1385 = vst.msk [vmem:[%s2141_s5 + $0xd8] sm:$0xff] %vm1357_vm2, %v1292_v5  ;;  %v1291_v11 = vsel %vm1107_vm12, %v753_v61, %v1199_v3  ;;  %v763_v13 = vadd.f32 %v2130_v35, %v762_v9  ;;  %v993_v14 = vadd.f32 %v2130_v35, %v992_v10  ;;  %v1763_v15 = vpop.f32.mrb[30].mxu0  ;;  %v1832_v16 = vpop.f32.mrb[30].mxu1 }
 0x123   : > { %1431 = vst.msk [vmem:[%s2141_s5 + $0x248] sm:$0xff] %vm1357_vm2, %v1338_v6  ;;  %v1337_v12 = vsel %vm1153_vm13, %v983_v62, %v1245_v4  ;;  %1384 = vst.msk [vmem:[%s2141_s5 + $0xd0] sm:$0xff] %vm1357_vm2, %v1291_v11  ;;  %vm1110_vm14 = vcmp.ge.f32.partialorder %v768_v7, 0.0  ;;  %v1202_v17 = vmul.f32 0.01, %v768_v7  ;;  %vm1156_vm15 = vcmp.ge.f32.partialorder %v998_v8, 0.0 }
 0x124   : > { %1430 = vst.msk [vmem:[%s2141_s5 + $0x240] sm:$0xff] %vm1357_vm2, %v1337_v12  ;;  %v1248_v18 = vmul.f32 0.01, %v998_v8  ;;  %vm1109_vm0 = vcmp.ge.f32.partialorder %v763_v13, 0.0  ;;  %v1201_v19 = vmul.f32 0.01, %v763_v13  ;;  %v778_v23 = vadd.f32 %v1763_v15, %v2130_v35 }
 0x125   : > { %vm1155_vm1 = vcmp.ge.f32.partialorder %v993_v14, 0.0  ;;  %v1247_v20 = vmul.f32 0.01, %v993_v14  ;;  %v1294_v21 = vsel %vm1110_vm14, %v768_v7, %v1202_v17  ;;  %v1008_v24 = vadd.f32 %v1832_v16, %v2130_v35  ;;  %v772_v25 = vpop.f32.mrb[31].mxu0  ;;  %v1002_v26 = vpop.f32.mrb[31].mxu1 }
 0x126   : > { %v1340_v22 = vsel %vm1156_vm15, %v998_v8, %v1248_v18  ;;  %1387 = vst.msk [vmem:[%s2141_s5 + $0xe8] sm:$0xff] %vm1357_vm2, %v1294_v21  ;;  %v1293_v27 = vsel %vm1109_vm0, %v763_v13, %v1201_v19  ;;  %v773_v29 = vadd.f32 %v2130_v35, %v772_v25  ;;  %v1003_v30 = vadd.f32 %v2130_v35, %v1002_v26  ;;  %v1766_v31 = vpop.f32.mrb[32].mxu0  ;;  %v1835_v32 = vpop.f32.mrb[32].mxu1 }
 0x127   : > { %1433 = vst.msk [vmem:[%s2141_s5 + $0x258] sm:$0xff] %vm1357_vm2, %v1340_v22  ;;  %v1339_v28 = vsel %vm1155_vm1, %v993_v14, %v1247_v20  ;;  %1386 = vst.msk [vmem:[%s2141_s5 + $0xe0] sm:$0xff] %vm1357_vm2, %v1293_v27  ;;  %vm1112_vm3 = vcmp.ge.f32.partialorder %v778_v23, 0.0  ;;  %v1204_v33 = vmul.f32 0.01, %v778_v23  ;;  %vm1158_vm4 = vcmp.ge.f32.partialorder %v1008_v24, 0.0 }
 0x128   : > { %1432 = vst.msk [vmem:[%s2141_s5 + $0x250] sm:$0xff] %vm1357_vm2, %v1339_v28  ;;  %v1250_v34 = vmul.f32 0.01, %v1008_v24  ;;  %vm1111_vm5 = vcmp.ge.f32.partialorder %v773_v29, 0.0  ;;  %v1203_v36 = vmul.f32 0.01, %v773_v29  ;;  %v788_v40 = vadd.f32 %v1766_v31, %v2130_v35 }
 0x129   : > { %vm1157_vm6 = vcmp.ge.f32.partialorder %v1003_v30, 0.0  ;;  %v1249_v37 = vmul.f32 0.01, %v1003_v30  ;;  %v1296_v38 = vsel %vm1112_vm3, %v778_v23, %v1204_v33  ;;  %v1018_v41 = vadd.f32 %v1835_v32, %v2130_v35  ;;  %v782_v42 = vpop.f32.mrb[33].mxu0  ;;  %v1012_v43 = vpop.f32.mrb[33].mxu1 }
 0x12a   : > { %v1342_v39 = vsel %vm1158_vm4, %v1008_v24, %v1250_v34  ;;  %1389 = vst.msk [vmem:[%s2141_s5 + $0xf8] sm:$0xff] %vm1357_vm2, %v1296_v38  ;;  %v1295_v44 = vsel %vm1111_vm5, %v773_v29, %v1203_v36  ;;  %v783_v46 = vadd.f32 %v2130_v35, %v782_v42  ;;  %v1013_v47 = vadd.f32 %v2130_v35, %v1012_v43  ;;  %v1769_v48 = vpop.f32.mrb[34].mxu0  ;;  %v1838_v49 = vpop.f32.mrb[34].mxu1 }
 0x12b   : > { %1435 = vst.msk [vmem:[%s2141_s5 + $0x268] sm:$0xff] %vm1357_vm2, %v1342_v39  ;;  %v1341_v45 = vsel %vm1157_vm6, %v1003_v30, %v1249_v37  ;;  %1388 = vst.msk [vmem:[%s2141_s5 + $0xf0] sm:$0xff] %vm1357_vm2, %v1295_v44  ;;  %vm1114_vm7 = vcmp.ge.f32.partialorder %v788_v40, 0.0  ;;  %v1206_v50 = vmul.f32 0.01, %v788_v40  ;;  %vm1160_vm8 = vcmp.ge.f32.partialorder %v1018_v41, 0.0 }
 0x12c   : > { %1434 = vst.msk [vmem:[%s2141_s5 + $0x260] sm:$0xff] %vm1357_vm2, %v1341_v45  ;;  %v1252_v51 = vmul.f32 0.01, %v1018_v41  ;;  %vm1113_vm9 = vcmp.ge.f32.partialorder %v783_v46, 0.0  ;;  %v1205_v52 = vmul.f32 0.01, %v783_v46  ;;  %v798_v56 = vadd.f32 %v1769_v48, %v2130_v35 }
 0x12d   : > { %vm1159_vm10 = vcmp.ge.f32.partialorder %v1013_v47, 0.0  ;;  %v1251_v53 = vmul.f32 0.01, %v1013_v47  ;;  %v1298_v54 = vsel %vm1114_vm7, %v788_v40, %v1206_v50  ;;  %v1028_v57 = vadd.f32 %v1838_v49, %v2130_v35  ;;  %v792_v58 = vpop.f32.mrb[35].mxu0  ;;  %v1022_v59 = vpop.f32.mrb[35].mxu1 }
 0x12e   : > { %v1344_v55 = vsel %vm1160_vm8, %v1018_v41, %v1252_v51  ;;  %1391 = vst.msk [vmem:[%s2141_s5 + $0x108] sm:$0xff] %vm1357_vm2, %v1298_v54  ;;  %v1297_v60 = vsel %vm1113_vm9, %v783_v46, %v1205_v52  ;;  %v793_v62 = vadd.f32 %v2130_v35, %v792_v58  ;;  %v1023_v63 = vadd.f32 %v2130_v35, %v1022_v59  ;;  %v1772_v0 = vpop.f32.mrb[36].mxu0  ;;  %v1841_v1 = vpop.f32.mrb[36].mxu1 }
 0x12f   : > { %1437 = vst.msk [vmem:[%s2141_s5 + $0x278] sm:$0xff] %vm1357_vm2, %v1344_v55  ;;  %v1343_v61 = vsel %vm1159_vm10, %v1013_v47, %v1251_v53  ;;  %1390 = vst.msk [vmem:[%s2141_s5 + $0x100] sm:$0xff] %vm1357_vm2, %v1297_v60  ;;  %vm1116_vm11 = vcmp.ge.f32.partialorder %v798_v56, 0.0  ;;  %v1208_v2 = vmul.f32 0.01, %v798_v56  ;;  %vm1162_vm12 = vcmp.ge.f32.partialorder %v1028_v57, 0.0 }
 0x130   : > { %1436 = vst.msk [vmem:[%s2141_s5 + $0x270] sm:$0xff] %vm1357_vm2, %v1343_v61  ;;  %v1254_v3 = vmul.f32 0.01, %v1028_v57  ;;  %vm1115_vm13 = vcmp.ge.f32.partialorder %v793_v62, 0.0  ;;  %v1207_v4 = vmul.f32 0.01, %v793_v62  ;;  %v808_v8 = vadd.f32 %v1772_v0, %v2130_v35 }
 0x131   : > { %vm1161_vm14 = vcmp.ge.f32.partialorder %v1023_v63, 0.0  ;;  %v1253_v5 = vmul.f32 0.01, %v1023_v63  ;;  %v1300_v6 = vsel %vm1116_vm11, %v798_v56, %v1208_v2  ;;  %v1038_v9 = vadd.f32 %v1841_v1, %v2130_v35  ;;  %v802_v10 = vpop.f32.mrb[37].mxu0  ;;  %v1032_v11 = vpop.f32.mrb[37].mxu1 }
 0x132   : > { %v1346_v7 = vsel %vm1162_vm12, %v1028_v57, %v1254_v3  ;;  %1393 = vst.msk [vmem:[%s2141_s5 + $0x118] sm:$0xff] %vm1357_vm2, %v1300_v6  ;;  %v1299_v12 = vsel %vm1115_vm13, %v793_v62, %v1207_v4  ;;  %v803_v14 = vadd.f32 %v2130_v35, %v802_v10  ;;  %v1033_v15 = vadd.f32 %v2130_v35, %v1032_v11  ;;  %v1775_v16 = vpop.f32.mrb[38].mxu0  ;;  %v1844_v17 = vpop.f32.mrb[38].mxu1 }
 0x133   : > { %1439 = vst.msk [vmem:[%s2141_s5 + $0x288] sm:$0xff] %vm1357_vm2, %v1346_v7  ;;  %v1345_v13 = vsel %vm1161_vm14, %v1023_v63, %v1253_v5  ;;  %1392 = vst.msk [vmem:[%s2141_s5 + $0x110] sm:$0xff] %vm1357_vm2, %v1299_v12  ;;  %vm1118_vm15 = vcmp.ge.f32.partialorder %v808_v8, 0.0  ;;  %v1210_v18 = vmul.f32 0.01, %v808_v8  ;;  %vm1164_vm0 = vcmp.ge.f32.partialorder %v1038_v9, 0.0 }
 0x134   : > { %1438 = vst.msk [vmem:[%s2141_s5 + $0x280] sm:$0xff] %vm1357_vm2, %v1345_v13  ;;  %v1256_v19 = vmul.f32 0.01, %v1038_v9  ;;  %vm1117_vm1 = vcmp.ge.f32.partialorder %v803_v14, 0.0  ;;  %v1209_v20 = vmul.f32 0.01, %v803_v14  ;;  %v818_v24 = vadd.f32 %v1775_v16, %v2130_v35 }
 0x135   : > { %vm1163_vm3 = vcmp.ge.f32.partialorder %v1033_v15, 0.0  ;;  %v1255_v21 = vmul.f32 0.01, %v1033_v15  ;;  %v1302_v22 = vsel %vm1118_vm15, %v808_v8, %v1210_v18  ;;  %v1048_v25 = vadd.f32 %v1844_v17, %v2130_v35  ;;  %v812_v26 = vpop.f32.mrb[39].mxu0  ;;  %v1042_v27 = vpop.f32.mrb[39].mxu1 }
 0x136   : > { %v1348_v23 = vsel %vm1164_vm0, %v1038_v9, %v1256_v19  ;;  %1395 = vst.msk [vmem:[%s2141_s5 + $0x128] sm:$0xff] %vm1357_vm2, %v1302_v22  ;;  %v1301_v28 = vsel %vm1117_vm1, %v803_v14, %v1209_v20  ;;  %v813_v30 = vadd.f32 %v2130_v35, %v812_v26  ;;  %v1043_v31 = vadd.f32 %v2130_v35, %v1042_v27  ;;  %v1778_v32 = vpop.f32.mrb[40].mxu0  ;;  %v1847_v33 = vpop.f32.mrb[40].mxu1  ;;  %v1877_v63 = vld [vmem:[%s2417_s2] ss:$0 sm:$0xff] }
 0x137   : > { %1441 = vst.msk [vmem:[%s2141_s5 + $0x298] sm:$0xff] %vm1357_vm2, %v1348_v23  ;;  %v1347_v29 = vsel %vm1163_vm3, %v1033_v15, %v1255_v21  ;;  %1394 = vst.msk [vmem:[%s2141_s5 + $0x120] sm:$0xff] %vm1357_vm2, %v1301_v28  ;;  %vm1120_vm4 = vcmp.ge.f32.partialorder %v818_v24, 0.0  ;;  %v1212_v34 = vmul.f32 0.01, %v818_v24  ;;  %vm1166_vm5 = vcmp.ge.f32.partialorder %v1048_v25, 0.0 }
 0x138   : > { %1440 = vst.msk [vmem:[%s2141_s5 + $0x290] sm:$0xff] %vm1357_vm2, %v1347_v29  ;;  %v1258_v36 = vmul.f32 0.01, %v1048_v25  ;;  %vm1119_vm6 = vcmp.ge.f32.partialorder %v813_v30, 0.0  ;;  %v1211_v37 = vmul.f32 0.01, %v813_v30  ;;  %v828_v41 = vadd.f32 %v1778_v32, %v2130_v35 }
 0x139   : > { %vm1165_vm7 = vcmp.ge.f32.partialorder %v1043_v31, 0.0  ;;  %v1257_v38 = vmul.f32 0.01, %v1043_v31  ;;  %v1304_v39 = vsel %vm1120_vm4, %v818_v24, %v1212_v34  ;;  %v1058_v42 = vadd.f32 %v1847_v33, %v2130_v35  ;;  %v822_v43 = vpop.f32.mrb[41].mxu0  ;;  %v1052_v44 = vpop.f32.mrb[41].mxu1 }
 0x13a   : > { %v1350_v40 = vsel %vm1166_vm5, %v1048_v25, %v1258_v36  ;;  %1397 = vst.msk [vmem:[%s2141_s5 + $0x138] sm:$0xff] %vm1357_vm2, %v1304_v39  ;;  %v1303_v45 = vsel %vm1119_vm6, %v813_v30, %v1211_v37  ;;  %v823_v47 = vadd.f32 %v2130_v35, %v822_v43  ;;  %v1053_v48 = vadd.f32 %v2130_v35, %v1052_v44  ;;  %v1781_v49 = vpop.f32.mrb[42].mxu0  ;;  %v1850_v50 = vpop.f32.mrb[42].mxu1 }
 0x13b   : > { %1443 = vst.msk [vmem:[%s2141_s5 + $0x2a8] sm:$0xff] %vm1357_vm2, %v1350_v40  ;;  %v1349_v46 = vsel %vm1165_vm7, %v1043_v31, %v1257_v38  ;;  %1396 = vst.msk [vmem:[%s2141_s5 + $0x130] sm:$0xff] %vm1357_vm2, %v1303_v45  ;;  %vm1122_vm8 = vcmp.ge.f32.partialorder %v828_v41, 0.0  ;;  %v1214_v51 = vmul.f32 0.01, %v828_v41  ;;  %vm1168_vm9 = vcmp.ge.f32.partialorder %v1058_v42, 0.0 }
 0x13c   : > { %1442 = vst.msk [vmem:[%s2141_s5 + $0x2a0] sm:$0xff] %vm1357_vm2, %v1349_v46  ;;  %v1260_v52 = vmul.f32 0.01, %v1058_v42  ;;  %vm1449_vm10 = vcmask 253952   ;;  %vm1121_vm11 = vcmp.ge.f32.partialorder %v823_v47, 0.0  ;;  %vm1167_vm12 = vcmp.ge.f32.partialorder %v1053_v48, 0.0 }
 0x13d   : > { %v1213_v53 = vmul.f32 0.01, %v823_v47  ;;  %v1259_v54 = vmul.f32 0.01, %v1053_v48  ;;  %v1306_v55 = vsel %vm1122_vm8, %v828_v41, %v1214_v51  ;;  %v838_v57 = vadd.f32 %v1781_v49, %v2130_v35  ;;  %v832_v59 = vpop.f32.mrb[43].mxu0  ;;  %v1062_v60 = vpop.f32.mrb[43].mxu1 }
 0x13e   : > { %v1352_v56 = vsel %vm1168_vm9, %v1058_v42, %v1260_v52  ;;  %v1068_v58 = vadd.f32 %v1850_v50, %v2130_v35  ;;  %1399 = vst.msk [vmem:[%s2141_s5 + $0x148] sm:$0xff] %vm1357_vm2, %v1306_v55  ;;  %v833_v0 = vadd.f32 %v1877_v63, %v832_v59  ;;  %v1063_v1 = vadd.f32 %v1877_v63, %v1062_v60  ;;  %v1784_v2 = vpop.f32.mrb[44].mxu0  ;;  %v1853_v3 = vpop.f32.mrb[44].mxu1 }
 0x13f   : > { %1445 = vst.msk [vmem:[%s2141_s5 + $0x2b8] sm:$0xff] %vm1357_vm2, %v1352_v56  ;;  %v1305_v61 = vsel %vm1121_vm11, %v823_v47, %v1213_v53  ;;  %v1351_v62 = vsel %vm1167_vm12, %v1053_v48, %v1259_v54  ;;  %vm1124_vm13 = vcmp.ge.f32.partialorder %v838_v57, 0.0  ;;  %v1216_v35 = vmul.f32 0.01, %v838_v57  ;;  %v842_v11 = vpop.f32.mrb[45].mxu0  ;;  %v1072_v12 = vpop.f32.mrb[45].mxu1 }
 0x140   : > { %1398 = vst.msk [vmem:[%s2141_s5 + $0x140] sm:$0xff] %vm1357_vm2, %v1305_v61  ;;  %1444 = vst.msk [vmem:[%s2141_s5 + $0x2b0] sm:$0xff] %vm1357_vm2, %v1351_v62  ;;  %vm1170_vm14 = vcmp.ge.f32.partialorder %v1068_v58, 0.0  ;;  %v1262_v4 = vmul.f32 0.01, %v1068_v58  ;;  %vm1123_vm15 = vcmp.ge.f32.partialorder %v833_v0, 0.0  ;;  %v848_v9 = vadd.f32 %v1877_v63, %v1784_v2 }
 0x141   : > { %v1215_v5 = vmul.f32 0.01, %v833_v0  ;;  %vm1169_vm0 = vcmp.ge.f32.partialorder %v1063_v1, 0.0  ;;  %v1261_v6 = vmul.f32 0.01, %v1063_v1  ;;  %v1308_v7 = vsel %vm1124_vm13, %v838_v57, %v1216_v35 }
 0x142   : > { %v1354_v8 = vsel %vm1170_vm14, %v1068_v58, %v1262_v4  ;;  %v1078_v10 = vadd.f32 %v1877_v63, %v1853_v3  ;;  %1401 = vst.msk [vmem:[%s2141_s5 + $0x158] sm:$0xff] %vm1357_vm2, %v1308_v7  ;;  %v843_v15 = vadd.f32 %v1877_v63, %v842_v11  ;;  %v1073_v16 = vadd.f32 %v1877_v63, %v1072_v12 }
 0x143   : > { %1447 = vst.msk [vmem:[%s2141_s5 + $0x2c8] sm:$0xff] %vm1357_vm2, %v1354_v8  ;;  %v1307_v13 = vsel %vm1123_vm15, %v833_v0, %v1215_v5  ;;  %v1353_v14 = vsel %vm1169_vm0, %v1063_v1, %v1261_v6  ;;  %vm1126_vm1 = vcmp.ge.f32.partialorder %v848_v9, 0.0  ;;  %v1218_v17 = vmul.f32 0.01, %v848_v9 }
 0x144   : > { %1400 = vst.msk [vmem:[%s2141_s5 + $0x150] sm:$0xff] %vm1357_vm2, %v1307_v13  ;;  %1446 = vst.msk [vmem:[%s2141_s5 + $0x2c0] sm:$0xff] %vm1357_vm2, %v1353_v14  ;;  %vm1172_vm3 = vcmp.ge.f32.partialorder %v1078_v10, 0.0  ;;  %v1264_v18 = vmul.f32 0.01, %v1078_v10  ;;  %vm1125_vm4 = vcmp.ge.f32.partialorder %v843_v15, 0.0 }
 0x145   : > { %v1217_v19 = vmul.f32 0.01, %v843_v15  ;;  %vm1171_vm5 = vcmp.ge.f32.partialorder %v1073_v16, 0.0  ;;  %v1263_v20 = vmul.f32 0.01, %v1073_v16  ;;  %v1310_v21 = vsel %vm1126_vm1, %v848_v9, %v1218_v17 }
 0x146   : > { %v1356_v22 = vsel %vm1172_vm3, %v1078_v10, %v1264_v18  ;;  %1403 = vst.msk [vmem:[%s2141_s5 + $0x168] sm:$0xff] %vm1357_vm2, %v1310_v21 }
 0x147   : > { %1450 = vst.msk [vmem:[%s2141_s5 + $0x2d8] sm:$0x1] %vm1449_vm10, %v1356_v22  ;;  %v1309_v23 = vsel %vm1125_vm4, %v843_v15, %v1217_v19  ;;  %v1355_v24 = vsel %vm1171_vm5, %v1073_v16, %v1263_v20 }
 0x148   : > { %1402 = vst.msk [vmem:[%s2141_s5 + $0x160] sm:$0xff] %vm1357_vm2, %v1309_v23  ;;  %1448 = vst.msk [vmem:[%s2141_s5 + $0x2d0] sm:$0xff] %vm1357_vm2, %v1355_v24 }
 0x149 PF: > { %s13_s12 = sadd.s32 1, %s1884_s12  }
 0x14a   : > { %p10_p4 = scmp.ge.s32.totalorder %s13_s12, 4  }
 0x14c   :  { %12 = sbr.rel (!%p10_p4) target bundleno = 1 (0x1), region = 62 }

// kernel: agent_network_forward.4
= control target key start
LH: loop header
LB: loop body
LE: loop exit
PB: predicated region body
PF: predicated region fallthrough
CT: control target
= control target key end

     0   :  { %s1069_s12 = smov 0   ;;  %s1407_s0 = inlined_call_operand.vmem [shape: f32[2,169,288], index: 0, kind: input, shape index: {}]   ;;  %s1408_s1 = inlined_call_operand.vmem [shape: f32[288,64], index: 1, kind: input, shape index: {}]   ;;  %s1409_s2 = inlined_call_operand.vmem [shape: f32[1,64], index: 2, kind: input, shape index: {}]   ;;  %s1410_s3 = inlined_call_operand.vmem [shape: f32[2,169,64], index: 3, kind: output, shape index: {}]  }
   0x1 LB: > { %s842_s13 = sadd.s32 4294967295, %s1046_s12   ;;  %p846_p0 = scmp.ge.s32.totalorder %s1046_s12, 1  ;;  %s1046_s12 = sphi %s1069_s12, %s13_s12  }
   0x2   : > { %p137_p1 = scmp.lt.s32.totalorder %s1046_s12, 3 }
   0x4   : > { %p138_p2 = pnand %p846_p0, %p137_p1 }
   0x5   : > { %v237_v0 = vld [vmem:[%s1408_s1] sm:$0xff] (!%p138_p2)  ;;  %v238_v1 = vld [vmem:[%s1408_s1 + $0x8] sm:$0xff] (!%p138_p2)  ;;  %v239_v2 = vld [vmem:[%s1408_s1 + $0x10] sm:$0xff] (!%p138_p2)  ;;  %p161_p3 = scmp.lt.s32.totalorder (!%p138_p2), %s842_s13, 1  ;;  %v1048_v3 = vmov (!%p138_p2), 0.0|0.0   ;;  %vm280_vm0 = vcmask (!%p138_p2), 261120  }
   0x6   : > { %141 = sbr.rel (%p138_p2) target bundleno = 355 (0x163), region = 32  ;;  %941 = vmatprep.subr.bf16.mxu0 (!%p138_p2), %v1048_v3  ;;  %997 = vmatprep.subr.bf16.mxu1 (!%p138_p2), %v1048_v3  ;;  %v942_v4 = vpack.c.bf16 (!%p138_p2), %v238_v1, %v237_v0  ;;  %v240_v5 = vld [vmem:[%s1408_s1 + $0x18] sm:$0xff] (!%p138_p2)  ;;  %v241_v7 = vld [vmem:[%s1408_s1 + $0x20] sm:$0xff] (!%p138_p2)  ;;  %v242_v8 = vld [vmem:[%s1408_s1 + $0x28] sm:$0xff] (!%p138_p2)  ;;  %vm763_vm2 = vcmask (!%p138_p2), 523264  }
   0x7   : > { %v945_v6 = vpack.c.bf16 (!%p138_p2), %v240_v5, %v239_v2  ;;  %v948_v9 = vpack.c.bf16 (!%p138_p2), %v242_v8, %v241_v7  ;;  %v243_v10 = vld [vmem:[%s1408_s1 + $0x30] sm:$0xff] (!%p138_p2)  ;;  %v244_v11 = vld [vmem:[%s1408_s1 + $0x38] sm:$0xff] (!%p138_p2)  ;;  %v245_v15 = vld [vmem:[%s1408_s1 + $0x40] sm:$0xff] (!%p138_p2) }
   0x8   : > { %943 = vmatpush1.bf16.msra.mxu0 (!%p138_p2), %v942_v4  ;;  %1013 = vmatpush1.bf16.msra.mxu1 (!%p138_p2), %v942_v4  ;;  %v951_v13 = vpack.c.bf16 (!%p138_p2), %v244_v11, %v243_v10  ;;  %v246_v16 = vld [vmem:[%s1408_s1 + $0x48] sm:$0xff] (!%p138_p2)  ;;  %v247_v18 = vld [vmem:[%s1408_s1 + $0x50] sm:$0xff] (!%p138_p2)  ;;  %v248_v19 = vld [vmem:[%s1408_s1 + $0x58] sm:$0xff] (!%p138_p2) }
   0x9   : > { %944 = vmatprep.subr.bf16.mxu0 (!%p138_p2), %v1048_v3  ;;  %998 = vmatprep.subr.bf16.mxu1 (!%p138_p2), %v1048_v3  ;;  %v954_v17 = vpack.c.bf16 (!%p138_p2), %v246_v16, %v245_v15  ;;  %v957_v20 = vpack.c.bf16 (!%p138_p2), %v248_v19, %v247_v18  ;;  %v249_v21 = vld [vmem:[%s1408_s1 + $0x60] sm:$0xff] (!%p138_p2)  ;;  %v250_v22 = vld [vmem:[%s1408_s1 + $0x68] sm:$0xff] (!%p138_p2)  ;;  %v251_v24 = vld [vmem:[%s1408_s1 + $0x70] sm:$0xff] (!%p138_p2) }
   0xa   : > { %v960_v23 = vpack.c.bf16 (!%p138_p2), %v250_v22, %v249_v21  ;;  %v252_v25 = vld [vmem:[%s1408_s1 + $0x78] sm:$0xff] (!%p138_p2)  ;;  %v253_v27 = vld [vmem:[%s1408_s1 + $0x80] sm:$0xff] (!%p138_p2)  ;;  %v254_v28 = vld [vmem:[%s1408_s1 + $0x88] sm:$0xff] (!%p138_p2) }
   0xb   : > { %v963_v26 = vpack.c.bf16 (!%p138_p2), %v252_v25, %v251_v24  ;;  %v966_v29 = vpack.c.bf16 (!%p138_p2), %v254_v28, %v253_v27  ;;  %v255_v30 = vld [vmem:[%s1408_s1 + $0x90] sm:$0xff] (!%p138_p2)  ;;  %v256_v31 = vld [vmem:[%s1408_s1 + $0x98] sm:$0xff] (!%p138_p2)  ;;  %v257_v33 = vld [vmem:[%s1408_s1 + $0xa0] sm:$0xff] (!%p138_p2) }
   0xc   : > { %946 = vmatpush1.bf16.msra.mxu0 (!%p138_p2), %v945_v6  ;;  %1014 = vmatpush1.bf16.msra.mxu1 (!%p138_p2), %v945_v6  ;;  %v969_v32 = vpack.c.bf16 (!%p138_p2), %v256_v31, %v255_v30  ;;  %v258_v34 = vld [vmem:[%s1408_s1 + $0xa8] sm:$0xff] (!%p138_p2)  ;;  %v259_v36 = vld [vmem:[%s1408_s1 + $0xb0] sm:$0xff] (!%p138_p2)  ;;  %v260_v37 = vld [vmem:[%s1408_s1 + $0xb8] sm:$0xff] (!%p138_p2) }
   0xd   : > { %s1412_s13 = smov (!%p161_p3, %s842_s13), 1  ;;  %947 = vmatprep.subr.bf16.mxu0 %v1048_v3  ;;  %999 = vmatprep.subr.bf16.mxu1 %v1048_v3  ;;  %v972_v35 = vpack.c.bf16 %v258_v34, %v257_v33  ;;  %v975_v38 = vpack.c.bf16 %v260_v37, %v259_v36  ;;  %v261_v39 = vld [vmem:[%s1408_s1 + $0xc0] sm:$0xff]  ;;  %v262_v40 = vld [vmem:[%s1408_s1 + $0xc8] sm:$0xff]  ;;  %v263_v42 = vld [vmem:[%s1408_s1 + $0xd0] sm:$0xff] }
   0xe   : > { %s1029_s26 = smul.u32 528, %s1412_s13  ;;  %v978_v41 = vpack.c.bf16 %v262_v40, %v261_v39  ;;  %v264_v43 = vld [vmem:[%s1408_s1 + $0xd8] sm:$0xff]  ;;  %v265_v45 = vld [vmem:[%s1408_s1 + $0xe0] sm:$0xff]  ;;  %v266_v46 = vld [vmem:[%s1408_s1 + $0xe8] sm:$0xff] }
   0xf   : > { %v981_v44 = vpack.c.bf16 %v264_v43, %v263_v42  ;;  %v984_v47 = vpack.c.bf16 %v266_v46, %v265_v45  ;;  %v267_v48 = vld [vmem:[%s1408_s1 + $0xf0] sm:$0xff]  ;;  %v268_v49 = vld [vmem:[%s1408_s1 + $0xf8] sm:$0xff]  ;;  %v269_v50 = vld [vmem:[%s1408_s1 + $0x100] sm:$0xff]  ;;  %s1030_s18 = smul.u32 176, %s1412_s13 }
  0x10   : > { %s1105_s29 = scalar_lea.vmem %s1407_s0, %s1029_s26  ;;  %949 = vmatpush1.bf16.msra.mxu0 %v948_v9  ;;  %1015 = vmatpush1.bf16.msra.mxu1 %v948_v9  ;;  %v270_v51 = vld [vmem:[%s1408_s1 + $0x108] sm:$0xff]  ;;  %v987_v52 = vpack.c.bf16 %v268_v49, %v267_v48  ;;  %v271_v54 = vld [vmem:[%s1408_s1 + $0x110] sm:$0xff]  ;;  %v272_v55 = vld [vmem:[%s1408_s1 + $0x118] sm:$0xff] }
  0x11   : > { %v172_v12 = vld [vmem:[%s1105_s29 + $0x8] sm:$0xff]  ;;  %v223_v14 = vld [vmem:[%s1105_s29 + $0x1a0] sm:$0xff]  ;;  %950 = vmatprep.subr.bf16.mxu0 %v1048_v3  ;;  %1000 = vmatprep.subr.bf16.mxu1 %v1048_v3  ;;  %v989_v53 = vpack.c.bf16 %v270_v51, %v269_v50  ;;  %v222_v57 = vld [vmem:[%s1105_s29 + $0x198] sm:$0xff]  ;;  %v993_v60 = vpack.c.bf16 %v272_v55, %v271_v54  ;;  %s1335_s21 = scalar_lea.vmem %s1410_s3, %s1030_s18 }
  0x12   : > { %411 = vmatprep.mubr.f32.mxu0 %v172_v12  ;;  %496 = vmatprep.mubr.f32.mxu1 %v223_v14  ;;  %v171_v56 = vld [vmem:[%s1105_s29] sm:$0xff]  ;;  %v226_v59 = vld [vmem:[%s1105_s29 + $0x1b8] sm:$0xff]  ;;  %v225_v62 = vld [vmem:[%s1105_s29 + $0x1b0] sm:$0xff] }
  0x13   : > { %v175_v58 = vld [vmem:[%s1105_s29 + $0x20] sm:$0xff]  ;;  %v174_v61 = vld [vmem:[%s1105_s29 + $0x18] sm:$0xff]  ;;  %v229_v0 = vld [vmem:[%s1105_s29 + $0x1d0] sm:$0xff] }
  0x14   : > { %952 = vmatpush1.bf16.msra.mxu0 %v951_v13  ;;  %1016 = vmatpush1.bf16.msra.mxu1 %v951_v13  ;;  %v178_v63 = vld [vmem:[%s1105_s29 + $0x38] sm:$0xff]  ;;  %v177_v1 = vld [vmem:[%s1105_s29 + $0x30] sm:$0xff]  ;;  %v228_v2 = vld [vmem:[%s1105_s29 + $0x1c8] sm:$0xff] }
  0x15   : > { %953 = vmatprep.subr.bf16.mxu0 %v1048_v3  ;;  %1001 = vmatprep.subr.bf16.mxu1 %v1048_v3  ;;  %v232_v4 = vld [vmem:[%s1105_s29 + $0x1e8] sm:$0xff]  ;;  %v231_v6 = vld [vmem:[%s1105_s29 + $0x1e0] sm:$0xff]  ;;  %v234_v10 = vld [vmem:[%s1105_s29 + $0x1f8] sm:$0x1] }
  0x16   : > { %v180_v5 = vld [vmem:[%s1105_s29 + $0x48] sm:$0xff]  ;;  %v235_v8 = vld [vmem:[%s1105_s29 + $0x200] sm:$0x1]  ;;  %v173_v12 = vld [vmem:[%s1105_s29 + $0x10] sm:$0xff] }
  0x17   : > { %v184_v7 = vld [vmem:[%s1105_s29 + $0x68] sm:$0xff]  ;;  %v183_v9 = vld [vmem:[%s1105_s29 + $0x60] sm:$0xff]  ;;  %v186_v13 = vld [vmem:[%s1105_s29 + $0x78] sm:$0xff] }
  0x18   : > { %955 = vmatpush1.bf16.msra.mxu0 %v954_v17  ;;  %1017 = vmatpush1.bf16.msra.mxu1 %v954_v17  ;;  %v187_v11 = vld [vmem:[%s1105_s29 + $0x80] sm:$0xff]  ;;  %v176_v14 = vld [vmem:[%s1105_s29 + $0x28] sm:$0xff]  ;;  %v190_v15 = vld [vmem:[%s1105_s29 + $0x98] sm:$0xff] }
  0x19   : > { %956 = vmatprep.subr.bf16.mxu0 %v1048_v3  ;;  %1002 = vmatprep.subr.bf16.mxu1 %v1048_v3  ;;  %v179_v16 = vld [vmem:[%s1105_s29 + $0x40] sm:$0xff]  ;;  %v189_v17 = vld [vmem:[%s1105_s29 + $0x90] sm:$0xff]  ;;  %v182_v18 = vld [vmem:[%s1105_s29 + $0x58] sm:$0xff] }
  0x1a   : > { %v193_v19 = vld [vmem:[%s1105_s29 + $0xb0] sm:$0xff]  ;;  %v192_v21 = vld [vmem:[%s1105_s29 + $0xa8] sm:$0xff]  ;;  %v191_v24 = vld [vmem:[%s1105_s29 + $0xa0] sm:$0xff] }
  0x1b   : > { %v188_v22 = vld [vmem:[%s1105_s29 + $0x88] sm:$0xff]  ;;  %v195_v25 = vld [vmem:[%s1105_s29 + $0xc0] sm:$0xff]  ;;  %v197_v28 = vld [vmem:[%s1105_s29 + $0xd0] sm:$0xff] }
  0x1c   : > { %958 = vmatpush1.bf16.msra.mxu0 %v957_v20  ;;  %1018 = vmatpush1.bf16.msra.mxu1 %v957_v20  ;;  %v185_v20 = vld [vmem:[%s1105_s29 + $0x70] sm:$0xff]  ;;  %v199_v27 = vld [vmem:[%s1105_s29 + $0xe0] sm:$0xff]  ;;  %v200_v30 = vld [vmem:[%s1105_s29 + $0xe8] sm:$0xff] }
  0x1d   : > { %959 = vmatprep.subr.bf16.mxu0 %v1048_v3  ;;  %1003 = vmatprep.subr.bf16.mxu1 %v1048_v3  ;;  %v202_v31 = vld [vmem:[%s1105_s29 + $0xf8] sm:$0xff]  ;;  %v201_v33 = vld [vmem:[%s1105_s29 + $0xf0] sm:$0xff]  ;;  %v204_v37 = vld [vmem:[%s1105_s29 + $0x108] sm:$0xff] }
  0x1e   : > { %v206_v34 = vld [vmem:[%s1105_s29 + $0x118] sm:$0xff]  ;;  %v209_v36 = vld [vmem:[%s1105_s29 + $0x130] sm:$0xff]  ;;  %v208_v39 = vld [vmem:[%s1105_s29 + $0x128] sm:$0xff] }
  0x1f   : > { %v215_v40 = vld [vmem:[%s1105_s29 + $0x160] sm:$0xff]  ;;  %v218_v42 = vld [vmem:[%s1105_s29 + $0x178] sm:$0xff]  ;;  %v224_v46 = vld [vmem:[%s1105_s29 + $0x1a8] sm:$0xff] }
  0x20   : > { %961 = vmatpush1.bf16.msra.mxu0 %v960_v23  ;;  %1019 = vmatpush1.bf16.msra.mxu1 %v960_v23  ;;  %v196_v23 = vld [vmem:[%s1105_s29 + $0xc8] sm:$0xff]  ;;  %v211_v43 = vld [vmem:[%s1105_s29 + $0x140] sm:$0xff]  ;;  %v210_v45 = vld [vmem:[%s1105_s29 + $0x138] sm:$0xff] }
  0x21   : > { %962 = vmatprep.subr.bf16.mxu0 %v1048_v3  ;;  %1004 = vmatprep.subr.bf16.mxu1 %v1048_v3  ;;  %v227_v48 = vld [vmem:[%s1105_s29 + $0x1c0] sm:$0xff]  ;;  %v213_v49 = vld [vmem:[%s1105_s29 + $0x150] sm:$0xff]  ;;  %v230_v50 = vld [vmem:[%s1105_s29 + $0x1d8] sm:$0xff] }
  0x22   : > { %v217_v51 = vld [vmem:[%s1105_s29 + $0x170] sm:$0xff]  ;;  %v236_v54 = vld [vmem:[%s1105_s29 + $0x208] sm:$0x1] }
  0x23   : > { %v220_v55 = vld [vmem:[%s1105_s29 + $0x188] sm:$0xff] }
  0x24   : > { %964 = vmatpush1.bf16.msra.mxu0 %v963_v26  ;;  %1020 = vmatpush1.bf16.msra.mxu1 %v963_v26  ;;  %v194_v26 = vld [vmem:[%s1105_s29 + $0xb8] sm:$0xff] }
  0x25   : > { %965 = vmatprep.subr.bf16.mxu0 %v1048_v3  ;;  %1005 = vmatprep.subr.bf16.mxu1 %v1048_v3 }
  0x28   : > { %967 = vmatpush1.bf16.msra.mxu0 %v966_v29  ;;  %1021 = vmatpush1.bf16.msra.mxu1 %v966_v29  ;;  %v198_v29 = vld [vmem:[%s1105_s29 + $0xd8] sm:$0xff] }
  0x29   : > { %968 = vmatprep.subr.bf16.mxu0 %v1048_v3  ;;  %1006 = vmatprep.subr.bf16.mxu1 %v1048_v3 }
  0x2c   : > { %970 = vmatpush1.bf16.msra.mxu0 %v969_v32  ;;  %1022 = vmatpush1.bf16.msra.mxu1 %v969_v32  ;;  %v203_v32 = vld [vmem:[%s1105_s29 + $0x100] sm:$0xff] }
  0x2d   : > { %971 = vmatprep.subr.bf16.mxu0 %v1048_v3  ;;  %1007 = vmatprep.subr.bf16.mxu1 %v1048_v3 }
  0x30   : > { %973 = vmatpush1.bf16.msra.mxu0 %v972_v35  ;;  %1023 = vmatpush1.bf16.msra.mxu1 %v972_v35  ;;  %v205_v35 = vld [vmem:[%s1105_s29 + $0x110] sm:$0xff] }
  0x31   : > { %974 = vmatprep.subr.bf16.mxu0 %v1048_v3  ;;  %1008 = vmatprep.subr.bf16.mxu1 %v1048_v3 }
  0x34   : > { %976 = vmatpush1.bf16.msra.mxu0 %v975_v38  ;;  %1024 = vmatpush1.bf16.msra.mxu1 %v975_v38  ;;  %v212_v38 = vld [vmem:[%s1105_s29 + $0x148] sm:$0xff] }
  0x35   : > { %977 = vmatprep.subr.bf16.mxu0 %v1048_v3  ;;  %1009 = vmatprep.subr.bf16.mxu1 %v1048_v3 }
  0x38   : > { %979 = vmatpush1.bf16.msra.mxu0 %v978_v41  ;;  %1025 = vmatpush1.bf16.msra.mxu1 %v978_v41  ;;  %v207_v41 = vld [vmem:[%s1105_s29 + $0x120] sm:$0xff] }
  0x39   : > { %980 = vmatprep.subr.bf16.mxu0 %v1048_v3  ;;  %1010 = vmatprep.subr.bf16.mxu1 %v1048_v3 }
  0x3c   : > { %982 = vmatpush1.bf16.msra.mxu0 %v981_v44  ;;  %1026 = vmatpush1.bf16.msra.mxu1 %v981_v44  ;;  %v221_v44 = vld [vmem:[%s1105_s29 + $0x190] sm:$0xff] }
  0x3d   : > { %983 = vmatprep.subr.bf16.mxu0 %v1048_v3  ;;  %1011 = vmatprep.subr.bf16.mxu1 %v1048_v3 }
  0x40   : > { %985 = vmatpush1.bf16.msra.mxu0 %v984_v47  ;;  %1027 = vmatpush1.bf16.msra.mxu1 %v984_v47  ;;  %v214_v47 = vld [vmem:[%s1105_s29 + $0x158] sm:$0xff] }
  0x41   : > { %986 = vmatprep.subr.bf16.mxu0 %v1048_v3  ;;  %1012 = vmatprep.subr.bf16.mxu1 %v1048_v3  ;;  %v181_v3 = vld [vmem:[%s1105_s29 + $0x50] sm:$0xff] }
  0x44   : > { %988 = vmatpush1.bf16.msra.mxu0 %v987_v52  ;;  %1028 = vmatpush1.bf16.msra.mxu1 %v987_v52  ;;  %v233_v52 = vld [vmem:[%s1105_s29 + $0x1f0] sm:$0xff] }
  0x45   : > { %990 = vmatprep.subr.bf16.mxu1 %v989_v53 }
  0x47   : > { %412 = vmatmul.mubr.f32.vlgmr.msra.gmra.mrb[0].mxu0 %v171_v56  ;;  %497 = vmatmul.mubr.f32.vlgmr.msra.gmra.mrb[0].mxu1 %v222_v57  ;;  %v219_v56 = vld [vmem:[%s1105_s29 + $0x180] sm:$0xff] }
  0x48   : > { %416 = vmatprep.mubr.f32.mxu0 %v175_v58  ;;  %501 = vmatprep.mubr.f32.mxu1 %v226_v59 }
  0x49   : > { %992 = vmatpush3.bf16.msra.mxu1 %v989_v53  ;;  %v216_v53 = vld [vmem:[%s1105_s29 + $0x168] sm:$0xff] }
  0x4a   : > { %994 = vmatprep.subr.bf16.mxu1 %v993_v60 }
  0x4b   : > { %417 = vmatmul.mubr.f32.gmra.mrb[2].mxu0 %v174_v61  ;;  %502 = vmatmul.mubr.f32.gmra.mrb[2].mxu1 %v225_v62 }
  0x4c   : > { %421 = vmatprep.mubr.f32.mxu0 %v178_v63  ;;  %506 = vmatprep.mubr.f32.mxu1 %v229_v0 }
  0x4d   : > { %996 = vmatpush3.bf16.msra.mxu1 %v993_v60 }
  0x4f   : > { %422 = vmatmul.mubr.f32.gmra.mrb[4].mxu0 %v177_v1  ;;  %507 = vmatmul.mubr.f32.gmra.mrb[4].mxu1 %v228_v2 }
  0x50   : > { %426 = vmatprep.mubr.f32.mxu0 %v181_v3  ;;  %511 = vmatprep.mubr.f32.mxu1 %v232_v4 }
  0x53   : > { %427 = vmatmul.mubr.f32.gmra.mrb[6].mxu0 %v180_v5  ;;  %512 = vmatmul.mubr.f32.gmra.mrb[6].mxu1 %v231_v6 }
  0x54   : > { %431 = vmatprep.mubr.f32.mxu0 %v184_v7  ;;  %516 = vmatprep.mubr.f32.mxu1 %v235_v8 }
  0x57   : > { %432 = vmatmul.mubr.f32.gmra.mrb[8].mxu0 %v183_v9  ;;  %517 = vmatmul.mubr.f32.gmra.mrb[8].mxu1 %v234_v10 }
  0x58   : > { %436 = vmatprep.mubr.f32.mxu0 %v187_v11  ;;  %908 = vmatprep.mubr.msk.f32.mxu1 %vm280_vm0, %v173_v12  ;;  %v1326_v11 = vld [vmem:[%s1409_s2] ss:$0 sm:$0xff] }
  0x5b   : > { %437 = vmatmul.mubr.f32.gmra.mrb[10].mxu0 %v186_v13  ;;  %909 = vmatmul.mubr.msk.f32.vlgmr.msra.gmra.mrb[10].mxu1 %vm280_vm0, %v176_v14 }
  0x5c   : > { %441 = vmatprep.mubr.f32.mxu0 %v190_v15  ;;  %911 = vmatprep.mubr.msk.f32.mxu1 %vm280_vm0, %v179_v16 }
  0x5f   : > { %442 = vmatmul.mubr.f32.gmra.mrb[12].mxu0 %v189_v17  ;;  %912 = vmatmul.mubr.msk.f32.gmra.mrb[12].mxu1 %vm280_vm0, %v182_v18 }
  0x60   : > { %446 = vmatprep.mubr.f32.mxu0 %v193_v19  ;;  %914 = vmatprep.mubr.msk.f32.mxu1 %vm280_vm0, %v185_v20 }
  0x63   : > { %447 = vmatmul.mubr.f32.gmra.mrb[14].mxu0 %v192_v21  ;;  %915 = vmatmul.mubr.msk.f32.gmra.mrb[14].mxu1 %vm280_vm0, %v188_v22 }
  0x64   : > { %451 = vmatprep.mubr.f32.mxu0 %v196_v23  ;;  %917 = vmatprep.mubr.msk.f32.mxu1 %vm280_vm0, %v191_v24 }
  0x67   : > { %452 = vmatmul.mubr.f32.gmra.mrb[16].mxu0 %v195_v25  ;;  %918 = vmatmul.mubr.msk.f32.gmra.mrb[16].mxu1 %vm280_vm0, %v194_v26 }
  0x68   : > { %456 = vmatprep.mubr.f32.mxu0 %v199_v27  ;;  %920 = vmatprep.mubr.msk.f32.mxu1 %vm280_vm0, %v197_v28 }
  0x6b   : > { %457 = vmatmul.mubr.f32.gmra.mrb[18].mxu0 %v198_v29  ;;  %921 = vmatmul.mubr.msk.f32.gmra.mrb[18].mxu1 %vm280_vm0, %v200_v30 }
  0x6c   : > { %461 = vmatprep.mubr.f32.mxu0 %v202_v31  ;;  %923 = vmatprep.mubr.msk.f32.mxu1 %vm280_vm0, %v203_v32 }
  0x6f   : > { %462 = vmatmul.mubr.f32.gmra.mrb[20].mxu0 %v201_v33  ;;  %924 = vmatmul.mubr.msk.f32.gmra.mrb[20].mxu1 %vm280_vm0, %v206_v34 }
  0x70   : > { %466 = vmatprep.mubr.f32.mxu0 %v205_v35  ;;  %926 = vmatprep.mubr.msk.f32.mxu1 %vm280_vm0, %v209_v36 }
  0x73   : > { %467 = vmatmul.mubr.f32.gmra.mrb[22].mxu0 %v204_v37  ;;  %927 = vmatmul.mubr.msk.f32.gmra.mrb[22].mxu1 %vm280_vm0, %v212_v38 }
  0x74   : > { %471 = vmatprep.mubr.f32.mxu0 %v208_v39  ;;  %929 = vmatprep.mubr.msk.f32.mxu1 %vm280_vm0, %v215_v40 }
  0x77   : > { %472 = vmatmul.mubr.f32.gmra.mrb[24].mxu0 %v207_v41  ;;  %930 = vmatmul.mubr.msk.f32.gmra.mrb[24].mxu1 %vm280_vm0, %v218_v42 }
  0x78   : > { %476 = vmatprep.mubr.f32.mxu0 %v211_v43  ;;  %932 = vmatprep.mubr.msk.f32.mxu1 %vm280_vm0, %v221_v44 }
  0x7b   : > { %477 = vmatmul.mubr.f32.gmra.mrb[26].mxu0 %v210_v45  ;;  %933 = vmatmul.mubr.msk.f32.gmra.mrb[26].mxu1 %vm280_vm0, %v224_v46 }
  0x7c   : > { %481 = vmatprep.mubr.f32.mxu0 %v214_v47  ;;  %935 = vmatprep.mubr.msk.f32.mxu1 %vm280_vm0, %v227_v48 }
  0x7f   : > { %482 = vmatmul.mubr.f32.gmra.mrb[28].mxu0 %v213_v49  ;;  %936 = vmatmul.mubr.msk.f32.gmra.mrb[28].mxu1 %vm280_vm0, %v230_v50 }
  0x80   : > { %486 = vmatprep.mubr.f32.mxu0 %v217_v51  ;;  %938 = vmatprep.mubr.msk.f32.mxu1 %vm280_vm0, %v233_v52 }
  0x83   : > { %487 = vmatmul.mubr.f32.gmra.mrb[30].mxu0 %v216_v53  ;;  %939 = vmatmul.mubr.msk.f32.gmra.mrb[30].mxu1 %vm280_vm0, %v236_v54 }
  0x84   : > { %491 = vmatprep.mubr.f32.mxu0 %v220_v55 }
  0x87   : > { %492 = vmatmul.mubr.f32.gmra.mrb[32].mxu0 %v219_v56 }
 0x11a   : > { %v413_v57 = vpop.f32.mrb[0].mxu0  ;;  %v1313_v58 = vpop.f32.mrb[0].mxu1 }
 0x11b   : > { %v415_v59 = vpop.f32.mrb[1].mxu0  ;;  %v500_v60 = vpop.f32.mrb[1].mxu1  ;;  %v414_v15 = vadd.f32 %v1326_v11, %v413_v57 }
 0x11e   : > { %v418_v61 = vpop.f32.mrb[2].mxu0  ;;  %v1315_v62 = vpop.f32.mrb[2].mxu1 }
 0x11f   : > { %v420_v63 = vpop.f32.mrb[3].mxu0  ;;  %v505_v0 = vpop.f32.mrb[3].mxu1  ;;  %v419_v14 = vadd.f32 %v1326_v11, %v418_v61 }
 0x122   : > { %v423_v1 = vpop.f32.mrb[4].mxu0  ;;  %v1317_v2 = vpop.f32.mrb[4].mxu1 }
 0x123   : > { %v425_v3 = vpop.f32.mrb[5].mxu0  ;;  %v510_v4 = vpop.f32.mrb[5].mxu1  ;;  %v424_v24 = vadd.f32 %v1326_v11, %v423_v1 }
 0x126   : > { %v428_v5 = vpop.f32.mrb[6].mxu0  ;;  %v1319_v6 = vpop.f32.mrb[6].mxu1 }
 0x127   : > { %v430_v7 = vpop.f32.mrb[7].mxu0  ;;  %v515_v8 = vpop.f32.mrb[7].mxu1  ;;  %v429_v22 = vadd.f32 %v1326_v11, %v428_v5 }
 0x12a   : > { %v433_v9 = vpop.f32.mrb[8].mxu0  ;;  %v1321_v10 = vpop.f32.mrb[8].mxu1 }
 0x12b   : > { %v435_v12 = vpop.f32.mrb[9].mxu0  ;;  %v520_v13 = vpop.f32.mrb[9].mxu1  ;;  %v434_v36 = vadd.f32 %v1326_v11, %v433_v9 }
 0x12e   : > { %v438_v16 = vpop.f32.mrb[10].mxu0  ;;  %v910_v17 = vpop.f32.mrb[10].mxu1 }
 0x12f   : > { %v594_v18 = vadd.f32 %v910_v17, %v419_v14  ;;  %v440_v19 = vpop.f32.mrb[11].mxu0  ;;  %v588_v20 = vpop.f32.mrb[11].mxu1  ;;  %v439_v34 = vadd.f32 %v1326_v11, %v438_v16 }
 0x130   : > { %v589_v21 = vadd.f32 %v588_v20, %v414_v15 }
 0x131   : > { %vm698_vm1 = vcmp.ge.f32.partialorder %v594_v18, 0.0  ;;  %v720_v23 = vmul.f32 0.01, %v594_v18 }
 0x132   : > { %vm697_vm3 = vcmp.ge.f32.partialorder %v589_v21, 0.0  ;;  %v719_v25 = vmul.f32 0.01, %v589_v21  ;;  %v443_v26 = vpop.f32.mrb[12].mxu0  ;;  %v913_v27 = vpop.f32.mrb[12].mxu1 }
 0x133   : > { %v742_v28 = vsel %vm698_vm1, %v594_v18, %v720_v23  ;;  %v604_v29 = vadd.f32 %v913_v27, %v429_v22  ;;  %v445_v30 = vpop.f32.mrb[13].mxu0  ;;  %v598_v31 = vpop.f32.mrb[13].mxu1  ;;  %v444_v48 = vadd.f32 %v1326_v11, %v443_v26 }
 0x134   : > { %765 = vst.msk [vmem:[%s1335_s21 + $0x8] sm:$0xff] %vm763_vm2, %v742_v28  ;;  %v741_v32 = vsel %vm697_vm3, %v589_v21, %v719_v25  ;;  %v599_v33 = vadd.f32 %v598_v31, %v424_v24 }
 0x135   : > { %764 = vst.msk [vmem:[%s1335_s21] sm:$0xff] %vm763_vm2, %v741_v32  ;;  %vm700_vm4 = vcmp.ge.f32.partialorder %v604_v29, 0.0  ;;  %v722_v35 = vmul.f32 0.01, %v604_v29 }
 0x136   : > { %vm699_vm5 = vcmp.ge.f32.partialorder %v599_v33, 0.0  ;;  %v721_v37 = vmul.f32 0.01, %v599_v33  ;;  %v448_v38 = vpop.f32.mrb[14].mxu0  ;;  %v916_v39 = vpop.f32.mrb[14].mxu1 }
 0x137   : > { %v744_v40 = vsel %vm700_vm4, %v604_v29, %v722_v35  ;;  %v614_v41 = vadd.f32 %v916_v39, %v439_v34  ;;  %v450_v42 = vpop.f32.mrb[15].mxu0  ;;  %v608_v43 = vpop.f32.mrb[15].mxu1  ;;  %v449_v46 = vadd.f32 %v1326_v11, %v448_v38 }
 0x138   : > { %767 = vst.msk [vmem:[%s1335_s21 + $0x18] sm:$0xff] %vm763_vm2, %v744_v40  ;;  %v743_v44 = vsel %vm699_vm5, %v599_v33, %v721_v37  ;;  %v609_v45 = vadd.f32 %v608_v43, %v434_v36  ;;  %v499_v36 = vadd.f32 %v1326_v11, %v1313_v58  ;;  %v504_v58 = vadd.f32 %v1326_v11, %v1315_v62 }
 0x139   : > { %766 = vst.msk [vmem:[%s1335_s21 + $0x10] sm:$0xff] %vm763_vm2, %v743_v44  ;;  %vm702_vm6 = vcmp.ge.f32.partialorder %v614_v41, 0.0  ;;  %v724_v47 = vmul.f32 0.01, %v614_v41  ;;  %v519_v62 = vadd.f32 %v1326_v11, %v1321_v10 }
 0x13a   : > { %vm701_vm7 = vcmp.ge.f32.partialorder %v609_v45, 0.0  ;;  %v723_v49 = vmul.f32 0.01, %v609_v45  ;;  %v453_v50 = vpop.f32.mrb[16].mxu0  ;;  %v919_v51 = vpop.f32.mrb[16].mxu1 }
 0x13b   : > { %v746_v52 = vsel %vm702_vm6, %v614_v41, %v724_v47  ;;  %v624_v53 = vadd.f32 %v919_v51, %v449_v46  ;;  %v455_v54 = vpop.f32.mrb[17].mxu0  ;;  %v618_v55 = vpop.f32.mrb[17].mxu1  ;;  %v454_v60 = vadd.f32 %v1326_v11, %v453_v50  ;;  %vm785_vm6 = vcmask 516096  }
 0x13c   : > { %769 = vst.msk [vmem:[%s1335_s21 + $0x28] sm:$0xff] %vm763_vm2, %v746_v52  ;;  %v745_v56 = vsel %vm701_vm7, %v609_v45, %v723_v49  ;;  %v619_v57 = vadd.f32 %v618_v55, %v444_v48  ;;  %v509_v49 = vadd.f32 %v1326_v11, %v1317_v2 }
 0x13d   : > { %768 = vst.msk [vmem:[%s1335_s21 + $0x20] sm:$0xff] %vm763_vm2, %v745_v56  ;;  %vm704_vm8 = vcmp.ge.f32.partialorder %v624_v53, 0.0  ;;  %v726_v59 = vmul.f32 0.01, %v624_v53 }
 0x13e   : > { %vm703_vm9 = vcmp.ge.f32.partialorder %v619_v57, 0.0  ;;  %v725_v61 = vmul.f32 0.01, %v619_v57  ;;  %v458_v63 = vpop.f32.mrb[18].mxu0  ;;  %v922_v0 = vpop.f32.mrb[18].mxu1 }
 0x13f   : > { %v748_v1 = vsel %vm704_vm8, %v624_v53, %v726_v59  ;;  %v459_v3 = vadd.f32 %v1326_v11, %v458_v63  ;;  %v460_v4 = vpop.f32.mrb[19].mxu0  ;;  %v628_v5 = vpop.f32.mrb[19].mxu1 }
 0x140   : > { %771 = vst.msk [vmem:[%s1335_s21 + $0x38] sm:$0xff] %vm763_vm2, %v748_v1  ;;  %v747_v7 = vsel %vm703_vm9, %v619_v57, %v725_v61  ;;  %v629_v8 = vadd.f32 %v628_v5, %v454_v60 }
 0x141   : > { %770 = vst.msk [vmem:[%s1335_s21 + $0x30] sm:$0xff] %vm763_vm2, %v747_v7  ;;  %v634_v9 = vadd.f32 %v922_v0, %v459_v3  ;;  %v514_v0 = vadd.f32 %v1326_v11, %v1319_v6 }
 0x142   : > { %vm705_vm10 = vcmp.ge.f32.partialorder %v629_v8, 0.0  ;;  %v727_v12 = vmul.f32 0.01, %v629_v8  ;;  %v463_v13 = vpop.f32.mrb[20].mxu0  ;;  %v925_v14 = vpop.f32.mrb[20].mxu1 }
 0x143   : > { %vm706_vm11 = vcmp.ge.f32.partialorder %v634_v9, 0.0  ;;  %v728_v15 = vmul.f32 0.01, %v634_v9  ;;  %v464_v16 = vadd.f32 %v1326_v11, %v463_v13  ;;  %v465_v17 = vpop.f32.mrb[21].mxu0  ;;  %v638_v18 = vpop.f32.mrb[21].mxu1 }
 0x144   : > { %v749_v19 = vsel %vm705_vm10, %v629_v8, %v727_v12 }
 0x145   : > { %v750_v20 = vsel %vm706_vm11, %v634_v9, %v728_v15  ;;  %772 = vst.msk [vmem:[%s1335_s21 + $0x40] sm:$0xff] %vm763_vm2, %v749_v19  ;;  %v639_v21 = vadd.f32 %v638_v18, %v464_v16 }
 0x146   : > { %773 = vst.msk [vmem:[%s1335_s21 + $0x48] sm:$0xff] %vm763_vm2, %v750_v20  ;;  %v468_v22 = vpop.f32.mrb[22].mxu0  ;;  %v928_v23 = vpop.f32.mrb[22].mxu1 }
 0x147   : > { %vm707_vm12 = vcmp.ge.f32.partialorder %v639_v21, 0.0  ;;  %v729_v24 = vmul.f32 0.01, %v639_v21  ;;  %v469_v25 = vadd.f32 %v1326_v11, %v468_v22  ;;  %v470_v26 = vpop.f32.mrb[23].mxu0  ;;  %v648_v27 = vpop.f32.mrb[23].mxu1 }
 0x149   : > { %v751_v28 = vsel %vm707_vm12, %v639_v21, %v729_v24  ;;  %v644_v29 = vadd.f32 %v925_v14, %v469_v25 }
 0x14a   : > { %774 = vst.msk [vmem:[%s1335_s21 + $0x50] sm:$0xff] %vm763_vm2, %v751_v28  ;;  %v473_v30 = vpop.f32.mrb[24].mxu0  ;;  %v931_v31 = vpop.f32.mrb[24].mxu1 }
 0x14b   : > { %vm708_vm13 = vcmp.ge.f32.partialorder %v644_v29, 0.0  ;;  %v730_v32 = vmul.f32 0.01, %v644_v29  ;;  %v474_v33 = vadd.f32 %v1326_v11, %v473_v30  ;;  %v475_v34 = vpop.f32.mrb[25].mxu0  ;;  %v658_v35 = vpop.f32.mrb[25].mxu1 }
 0x14d   : > { %v752_v37 = vsel %vm708_vm13, %v644_v29, %v730_v32  ;;  %v649_v38 = vadd.f32 %v648_v27, %v474_v33 }
 0x14e   : > { %775 = vst.msk [vmem:[%s1335_s21 + $0x58] sm:$0xff] %vm763_vm2, %v752_v37  ;;  %v478_v39 = vpop.f32.mrb[26].mxu0  ;;  %v934_v40 = vpop.f32.mrb[26].mxu1 }
 0x14f   : > { %vm709_vm14 = vcmp.ge.f32.partialorder %v649_v38, 0.0  ;;  %v731_v41 = vmul.f32 0.01, %v649_v38  ;;  %v479_v42 = vadd.f32 %v1326_v11, %v478_v39  ;;  %v674_v43 = vadd.f32 %v934_v40, %v499_v36  ;;  %v480_v44 = vpop.f32.mrb[27].mxu0  ;;  %v668_v45 = vpop.f32.mrb[27].mxu1 }
 0x151   : > { %v753_v46 = vsel %vm709_vm14, %v649_v38, %v731_v41  ;;  %v654_v47 = vadd.f32 %v928_v23, %v479_v42  ;;  %vm714_vm15 = vcmp.ge.f32.partialorder %v674_v43, 0.0  ;;  %v736_v48 = vmul.f32 0.01, %v674_v43 }
 0x152   : > { %776 = vst.msk [vmem:[%s1335_s21 + $0x60] sm:$0xff] %vm763_vm2, %v753_v46  ;;  %v483_v50 = vpop.f32.mrb[28].mxu0  ;;  %v937_v51 = vpop.f32.mrb[28].mxu1 }
 0x153   : > { %vm710_vm0 = vcmp.ge.f32.partialorder %v654_v47, 0.0  ;;  %v732_v52 = vmul.f32 0.01, %v654_v47  ;;  %v758_v53 = vsel %vm714_vm15, %v674_v43, %v736_v48  ;;  %v484_v54 = vadd.f32 %v1326_v11, %v483_v50  ;;  %v485_v55 = vpop.f32.mrb[29].mxu0  ;;  %v678_v56 = vpop.f32.mrb[29].mxu1 }
 0x154   : > { %781 = vst.msk [vmem:[%s1335_s21 + $0x88] sm:$0xff] %vm763_vm2, %v758_v53  ;;  %v684_v57 = vadd.f32 %v937_v51, %v509_v49  ;;  %v679_v59 = vadd.f32 %v678_v56, %v504_v58 }
 0x155   : > { %v754_v2 = vsel %vm710_vm0, %v654_v47, %v732_v52  ;;  %v659_v60 = vadd.f32 %v658_v35, %v484_v54 }
 0x156   : > { %777 = vst.msk [vmem:[%s1335_s21 + $0x68] sm:$0xff] %vm763_vm2, %v754_v2  ;;  %vm716_vm1 = vcmp.ge.f32.partialorder %v684_v57, 0.0  ;;  %v738_v61 = vmul.f32 0.01, %v684_v57  ;;  %vm715_vm3 = vcmp.ge.f32.partialorder %v679_v59, 0.0  ;;  %v488_v3 = vpop.f32.mrb[30].mxu0 }
 0x157   : > { %v737_v63 = vmul.f32 0.01, %v679_v59  ;;  %vm711_vm4 = vcmp.ge.f32.partialorder %v659_v60, 0.0  ;;  %v733_v1 = vmul.f32 0.01, %v659_v60  ;;  %v940_v4 = vpop.f32.mrb[30].mxu1  ;;  %v489_v7 = vadd.f32 %v1326_v11, %v488_v3 }
 0x158   : > { %v760_v5 = vsel %vm716_vm1, %v684_v57, %v738_v61  ;;  %v694_v8 = vadd.f32 %v940_v4, %v519_v62  ;;  %v490_v9 = vpop.f32.mrb[31].mxu0  ;;  %v688_v12 = vpop.f32.mrb[31].mxu1 }
 0x159   : > { %v759_v10 = vsel %vm715_vm3, %v679_v59, %v737_v63  ;;  %v755_v13 = vsel %vm711_vm4, %v659_v60, %v733_v1  ;;  %783 = vst.msk [vmem:[%s1335_s21 + $0x98] sm:$0xff] %vm763_vm2, %v760_v5  ;;  %v689_v14 = vadd.f32 %v688_v12, %v514_v0  ;;  %v664_v6 = vadd.f32 %v931_v31, %v489_v7 }
 0x15a   : > { %782 = vst.msk [vmem:[%s1335_s21 + $0x90] sm:$0xff] %vm763_vm2, %v759_v10  ;;  %778 = vst.msk [vmem:[%s1335_s21 + $0x70] sm:$0xff] %vm763_vm2, %v755_v13  ;;  %vm718_vm5 = vcmp.ge.f32.partialorder %v694_v8, 0.0  ;;  %v740_v15 = vmul.f32 0.01, %v694_v8  ;;  %v493_v16 = vpop.f32.mrb[32].mxu0 }
 0x15b   : > { %vm717_vm7 = vcmp.ge.f32.partialorder %v689_v14, 0.0  ;;  %v739_v17 = vmul.f32 0.01, %v689_v14  ;;  %v494_v18 = vadd.f32 %v1326_v11, %v493_v16  ;;  %v495_v19 = vpop.f32.mrb[33].mxu0  ;;  %vm712_vm8 = vcmp.ge.f32.partialorder %v664_v6, 0.0 }
 0x15c   : > { %v734_v20 = vmul.f32 0.01, %v664_v6  ;;  %v762_v21 = vsel %vm718_vm5, %v694_v8, %v740_v15 }
 0x15d   : > { %786 = vst.msk [vmem:[%s1335_s21 + $0xa8] sm:$0x1] %vm785_vm6, %v762_v21  ;;  %v761_v22 = vsel %vm717_vm7, %v689_v14, %v739_v17  ;;  %v669_v23 = vadd.f32 %v668_v45, %v494_v18 }
 0x15e   : > { %v756_v24 = vsel %vm712_vm8, %v664_v6, %v734_v20  ;;  %784 = vst.msk [vmem:[%s1335_s21 + $0xa0] sm:$0xff] %vm763_vm2, %v761_v22 }
 0x15f   : > { %779 = vst.msk [vmem:[%s1335_s21 + $0x78] sm:$0xff] %vm763_vm2, %v756_v24  ;;  %vm713_vm9 = vcmp.ge.f32.partialorder %v669_v23, 0.0  ;;  %v735_v25 = vmul.f32 0.01, %v669_v23 }
 0x161   : > { %v757_v26 = vsel %vm713_vm9, %v669_v23, %v735_v25 }
 0x162   : > { %780 = vst.msk [vmem:[%s1335_s21 + $0x80] sm:$0xff] %vm763_vm2, %v757_v26 }
 0x163 PF: > { %s13_s12 = sadd.s32 1, %s1046_s12  }
 0x164   : > { %p10_p4 = scmp.ge.s32.totalorder %s13_s12, 4  }
 0x166   :  { %12 = sbr.rel (!%p10_p4) target bundleno = 1 (0x1), region = 62 }

// kernel: agent_network_forward.5
= control target key start
LH: loop header
LB: loop body
LE: loop exit
PB: predicated region body
PF: predicated region fallthrough
CT: control target
= control target key end

     0   :  { %s1607_s18 = smov 0   ;;  %s2291_s0 = inlined_call_operand.vmem [shape: f32[2,121,576], index: 0, kind: input, shape index: {}]   ;;  %s2292_s1 = inlined_call_operand.vmem [shape: f32[576,32], index: 1, kind: input, shape index: {}]   ;;  %s2293_s2 = inlined_call_operand.vmem [shape: f32[1,32], index: 2, kind: input, shape index: {}]   ;;  %s2294_s3 = inlined_call_operand.vmem [shape: f32[3,121,32], index: 3, kind: input, shape index: {}]   ;;  %s2295_s4 = inlined_call_operand.vmem [shape: f32[3,1], index: 4, kind: input, shape index: {}]   ;;  %s2296_s5 = inlined_call_operand.vmem [shape: f32[2,3,1], index: 5, kind: output, shape index: {}]  }
   0x1 LB: > { %s1190_s19 = sadd.s32 4294967295, %s1575_s18   ;;  %p1194_p0 = scmp.ge.s32.totalorder %s1575_s18, 1  ;;  %s1575_s18 = sphi %s1607_s18, %s15_s18  }
   0x2   : > { %p187_p1 = scmp.lt.s32.totalorder %s1575_s18, 3 }
   0x4   : > { %p188_p2 = pnand %p1194_p0, %p187_p1 }
   0x5   : > { %v319_v0 = vld [vmem:[%s2292_s1 + $0x80] sm:$0xff] (!%p188_p2)  ;;  %v320_v1 = vld [vmem:[%s2292_s1 + $0x88] sm:$0xff] (!%p188_p2)  ;;  %v321_v11 = vld [vmem:[%s2292_s1 + $0x90] sm:$0xff] (!%p188_p2)  ;;  %p1680_p3 = scmp.lt.s32.totalorder (!%p188_p2), %s1190_s19, 1  ;;  %vm382_vm0 = vcmask (!%p188_p2), 523264   ;;  %vm946_vm3 = vcmask (!%p188_p2), 261120  }
   0x6   : > { %191 = sbr.rel (%p188_p2) target bundleno = 532 (0x214), region = 40  ;;  %v351_v2 = vld [vmem:[%s2292_s1 + $0x180] sm:$0xff] (!%p188_p2)  ;;  %v1472_v3 = vpack.c.bf16 (!%p188_p2), %v320_v1, %v319_v0  ;;  %v352_v4 = vld [vmem:[%s2292_s1 + $0x188] sm:$0xff] (!%p188_p2)  ;;  %v322_v13 = vld [vmem:[%s2292_s1 + $0x98] sm:$0xff] (!%p188_p2) }
   0x7   : > { %v303_v5 = vld [vmem:[%s2292_s1] sm:$0xff] (!%p188_p2)  ;;  %v304_v6 = vld [vmem:[%s2292_s1 + $0x8] sm:$0xff] (!%p188_p2)  ;;  %v1504_v7 = vpack.c.bf16 (!%p188_p2), %v352_v4, %v351_v2  ;;  %v353_v14 = vld [vmem:[%s2292_s1 + $0x190] sm:$0xff] (!%p188_p2)  ;;  %v1476_v16 = vpack.c.bf16 (!%p188_p2), %v322_v13, %v321_v11 }
   0x8   : > { %v1474_v8 = vpack.c.bf16 (!%p188_p2), %v304_v6, %v303_v5  ;;  %v335_v9 = vld [vmem:[%s2292_s1 + $0x100] sm:$0xff] (!%p188_p2)  ;;  %v336_v10 = vld [vmem:[%s2292_s1 + $0x108] sm:$0xff] (!%p188_p2)  ;;  %1473 = vmatprep.subr.bf16.mxu0 (!%p188_p2), %v1472_v3  ;;  %v354_v15 = vld [vmem:[%s2292_s1 + $0x198] sm:$0xff] (!%p188_p2) }
   0x9   : > { %v1506_v12 = vpack.c.bf16 (!%p188_p2), %v336_v10, %v335_v9  ;;  %1505 = vmatprep.subr.bf16.mxu1 (!%p188_p2), %v1504_v7  ;;  %v1508_v17 = vpack.c.bf16 (!%p188_p2), %v354_v15, %v353_v14  ;;  %v305_v18 = vld [vmem:[%s2292_s1 + $0x10] sm:$0xff] (!%p188_p2)  ;;  %v306_v19 = vld [vmem:[%s2292_s1 + $0x18] sm:$0xff] (!%p188_p2)  ;;  %v323_v23 = vld [vmem:[%s2292_s1 + $0xa0] sm:$0xff] (!%p188_p2) }
   0xa   : > { %1475 = vmatpush3.bf16.msra.mxu0 (!%p188_p2), %v1474_v8  ;;  %v337_v20 = vld [vmem:[%s2292_s1 + $0x110] sm:$0xff] (!%p188_p2)  ;;  %v1478_v21 = vpack.c.bf16 (!%p188_p2), %v306_v19, %v305_v18  ;;  %v338_v22 = vld [vmem:[%s2292_s1 + $0x118] sm:$0xff] (!%p188_p2)  ;;  %v324_v24 = vld [vmem:[%s2292_s1 + $0xa8] sm:$0xff] (!%p188_p2) }
   0xb   : > { %1507 = vmatpush3.bf16.msra.mxu1 (!%p188_p2), %v1506_v12  ;;  %1477 = vmatprep.subr.bf16.mxu0 (!%p188_p2), %v1476_v16  ;;  %v1510_v25 = vpack.c.bf16 (!%p188_p2), %v338_v22, %v337_v20  ;;  %v1480_v26 = vpack.c.bf16 (!%p188_p2), %v324_v24, %v323_v23  ;;  %v355_v27 = vld [vmem:[%s2292_s1 + $0x1a0] sm:$0xff] (!%p188_p2)  ;;  %v356_v28 = vld [vmem:[%s2292_s1 + $0x1a8] sm:$0xff] (!%p188_p2)  ;;  %v325_v35 = vld [vmem:[%s2292_s1 + $0xb0] sm:$0xff] (!%p188_p2) }
   0xc   : > { %1509 = vmatprep.subr.bf16.mxu1 (!%p188_p2), %v1508_v17  ;;  %v307_v29 = vld [vmem:[%s2292_s1 + $0x20] sm:$0xff] (!%p188_p2)  ;;  %v1512_v30 = vpack.c.bf16 (!%p188_p2), %v356_v28, %v355_v27  ;;  %v308_v31 = vld [vmem:[%s2292_s1 + $0x28] sm:$0xff] (!%p188_p2)  ;;  %v326_v36 = vld [vmem:[%s2292_s1 + $0xb8] sm:$0xff] (!%p188_p2) }
   0xd   : > { %v339_v32 = vld [vmem:[%s2292_s1 + $0x120] sm:$0xff]  ;;  %v340_v33 = vld [vmem:[%s2292_s1 + $0x128] sm:$0xff]  ;;  %v1482_v34 = vpack.c.bf16 %v308_v31, %v307_v29  ;;  %v357_v37 = vld [vmem:[%s2292_s1 + $0x1b0] sm:$0xff]  ;;  %v1484_v39 = vpack.c.bf16 %v326_v36, %v325_v35  ;;  %s2299_s19 = smov (!%p1680_p3, %s1190_s19), 1 }
   0xe   : > { %1479 = vmatpush3.bf16.msra.mxu0 %v1478_v21  ;;  %v1514_v38 = vpack.c.bf16 %v340_v33, %v339_v32  ;;  %v358_v40 = vld [vmem:[%s2292_s1 + $0x1b8] sm:$0xff]  ;;  %v309_v41 = vld [vmem:[%s2292_s1 + $0x30] sm:$0xff]  ;;  %v327_v46 = vld [vmem:[%s2292_s1 + $0xc0] sm:$0xff]  ;;  %s1560_s11 = smul.u32 640, %s2299_s19  ;;  %s1196_s15 = sshll.u32 %s2299_s19, 2 }
   0xf   : > { %1511 = vmatpush3.bf16.msra.mxu1 %v1510_v25  ;;  %1481 = vmatprep.subr.bf16.mxu0 %v1480_v26  ;;  %v310_v42 = vld [vmem:[%s2292_s1 + $0x38] sm:$0xff]  ;;  %v1516_v43 = vpack.c.bf16 %v358_v40, %v357_v37  ;;  %v341_v44 = vld [vmem:[%s2292_s1 + $0x130] sm:$0xff]  ;;  %v328_v47 = vld [vmem:[%s2292_s1 + $0xc8] sm:$0xff]  ;;  %s222_s21 = scalar_lea.vmem %s2296_s5, %s1196_s15 }
  0x10   : > { %1513 = vmatprep.subr.bf16.mxu1 %v1512_v30  ;;  %v342_v45 = vld [vmem:[%s2292_s1 + $0x138] sm:$0xff]  ;;  %v359_v48 = vld [vmem:[%s2292_s1 + $0x1c0] sm:$0xff]  ;;  %v360_v49 = vld [vmem:[%s2292_s1 + $0x1c8] sm:$0xff]  ;;  %v1486_v50 = vpack.c.bf16 %v310_v42, %v309_v41  ;;  %v1488_v52 = vpack.c.bf16 %v328_v47, %v327_v46  ;;  %s1781_s7 = scalar_lea.vmem %s2291_s0, %s1560_s11 }
  0x11   : > { %v1518_v51 = vpack.c.bf16 %v342_v45, %v341_v44  ;;  %v311_v53 = vld [vmem:[%s2292_s1 + $0x40] sm:$0xff]  ;;  %v312_v54 = vld [vmem:[%s2292_s1 + $0x48] sm:$0xff]  ;;  %v1520_v56 = vpack.c.bf16 %v360_v49, %v359_v48  ;;  %v329_v58 = vld [vmem:[%s2292_s1 + $0xd0] sm:$0xff] }
  0x12   : > { %1483 = vmatpush3.bf16.msra.mxu0 %v1482_v34  ;;  %v343_v55 = vld [vmem:[%s2292_s1 + $0x140] sm:$0xff]  ;;  %v344_v57 = vld [vmem:[%s2292_s1 + $0x148] sm:$0xff]  ;;  %v330_v59 = vld [vmem:[%s2292_s1 + $0xd8] sm:$0xff]  ;;  %v1490_v62 = vpack.c.bf16 %v312_v54, %v311_v53 }
  0x13   : > { %1515 = vmatpush3.bf16.msra.mxu1 %v1514_v38  ;;  %1485 = vmatprep.subr.bf16.mxu0 %v1484_v39  ;;  %v361_v60 = vld [vmem:[%s2292_s1 + $0x1d0] sm:$0xff]  ;;  %v362_v61 = vld [vmem:[%s2292_s1 + $0x1d8] sm:$0xff]  ;;  %v1522_v63 = vpack.c.bf16 %v344_v57, %v343_v55  ;;  %v1492_v0 = vpack.c.bf16 %v330_v59, %v329_v58  ;;  %v331_v6 = vld [vmem:[%s2292_s1 + $0xe0] sm:$0xff] }
  0x14   : > { %1517 = vmatprep.subr.bf16.mxu1 %v1516_v43  ;;  %v313_v1 = vld [vmem:[%s2292_s1 + $0x50] sm:$0xff]  ;;  %v314_v2 = vld [vmem:[%s2292_s1 + $0x58] sm:$0xff]  ;;  %v1524_v4 = vpack.c.bf16 %v362_v61, %v361_v60  ;;  %v332_v7 = vld [vmem:[%s2292_s1 + $0xe8] sm:$0xff] }
  0x15   : > { %v345_v3 = vld [vmem:[%s2292_s1 + $0x150] sm:$0xff]  ;;  %v346_v5 = vld [vmem:[%s2292_s1 + $0x158] sm:$0xff]  ;;  %v363_v8 = vld [vmem:[%s2292_s1 + $0x1e0] sm:$0xff]  ;;  %v1494_v10 = vpack.c.bf16 %v314_v2, %v313_v1  ;;  %v1496_v14 = vpack.c.bf16 %v332_v7, %v331_v6 }
  0x16   : > { %1487 = vmatpush3.bf16.msra.mxu0 %v1486_v50  ;;  %v364_v9 = vld [vmem:[%s2292_s1 + $0x1e8] sm:$0xff]  ;;  %v315_v11 = vld [vmem:[%s2292_s1 + $0x60] sm:$0xff]  ;;  %v1526_v13 = vpack.c.bf16 %v346_v5, %v345_v3  ;;  %v226_v17 = vld [vmem:[%s1781_s7 + $0x18] sm:$0xff] }
  0x17   : > { %1519 = vmatpush3.bf16.msra.mxu1 %v1518_v51  ;;  %1489 = vmatprep.subr.bf16.mxu0 %v1488_v52  ;;  %v316_v12 = vld [vmem:[%s2292_s1 + $0x68] sm:$0xff]  ;;  %v347_v15 = vld [vmem:[%s2292_s1 + $0x160] sm:$0xff]  ;;  %v1528_v18 = vpack.c.bf16 %v364_v9, %v363_v8  ;;  %v333_v20 = vld [vmem:[%s2292_s1 + $0xf0] sm:$0xff] }
  0x18   : > { %1521 = vmatprep.subr.bf16.mxu1 %v1520_v56  ;;  %v224_v16 = vld [vmem:[%s1781_s7 + $0x8] sm:$0xff]  ;;  %v334_v21 = vld [vmem:[%s2292_s1 + $0xf8] sm:$0xff]  ;;  %v365_v22 = vld [vmem:[%s2292_s1 + $0x1f0] sm:$0xff]  ;;  %640 = vmatprep.mubr.f32.mxu1 %v226_v17  ;;  %v1498_v24 = vpack.c.bf16 %v316_v12, %v315_v11 }
  0x19   : > { %v348_v19 = vld [vmem:[%s2292_s1 + $0x168] sm:$0xff]  ;;  %495 = vmatprep.mubr.f32.mxu0 %v224_v16  ;;  %v366_v23 = vld [vmem:[%s2292_s1 + $0x1f8] sm:$0xff]  ;;  %v1500_v26 = vpack.c.bf16 %v334_v21, %v333_v20  ;;  %v317_v27 = vld [vmem:[%s2292_s1 + $0x70] sm:$0xff] }
  0x1a   : > { %1491 = vmatpush3.bf16.msra.mxu0 %v1490_v62  ;;  %v1530_v25 = vpack.c.bf16 %v348_v19, %v347_v15  ;;  %v318_v28 = vld [vmem:[%s2292_s1 + $0x78] sm:$0xff]  ;;  %v349_v29 = vld [vmem:[%s2292_s1 + $0x170] sm:$0xff]  ;;  %v1532_v30 = vpack.c.bf16 %v366_v23, %v365_v22  ;;  %v367_v32 = vld [vmem:[%s2292_s1 + $0x200] sm:$0xff] }
  0x1b   : > { %1523 = vmatpush3.bf16.msra.mxu1 %v1522_v63  ;;  %1493 = vmatprep.subr.bf16.mxu0 %v1492_v0  ;;  %v350_v31 = vld [vmem:[%s2292_s1 + $0x178] sm:$0xff]  ;;  %v368_v33 = vld [vmem:[%s2292_s1 + $0x208] sm:$0xff]  ;;  %v1502_v34 = vpack.c.bf16 %v318_v28, %v317_v27  ;;  %v369_v37 = vld [vmem:[%s2292_s1 + $0x210] sm:$0xff] }
  0x1c   : > { %1525 = vmatprep.subr.bf16.mxu1 %v1524_v4  ;;  %v1534_v35 = vpack.c.bf16 %v350_v31, %v349_v29  ;;  %v1536_v36 = vpack.c.bf16 %v368_v33, %v367_v32  ;;  %v370_v38 = vld [vmem:[%s2292_s1 + $0x218] sm:$0xff]  ;;  %v223_v39 = vld [vmem:[%s1781_s7] sm:$0xff]  ;;  %v225_v40 = vld [vmem:[%s1781_s7 + $0x10] sm:$0xff] }
  0x1d   : > { %v229_v41 = vld [vmem:[%s1781_s7 + $0x30] sm:$0xff]  ;;  %v231_v42 = vld [vmem:[%s1781_s7 + $0x40] sm:$0xff]  ;;  %v1540_v43 = vpack.c.bf16 %v370_v38, %v369_v37  ;;  %v372_v45 = vld [vmem:[%s2292_s1 + $0x228] sm:$0xff] }
  0x1e   : > { %1495 = vmatpush3.bf16.msra.mxu0 %v1494_v10  ;;  %v371_v44 = vld [vmem:[%s2292_s1 + $0x220] sm:$0xff]  ;;  %v228_v46 = vld [vmem:[%s1781_s7 + $0x28] sm:$0xff]  ;;  %v230_v47 = vld [vmem:[%s1781_s7 + $0x38] sm:$0xff] }
  0x1f   : > { %1527 = vmatpush3.bf16.msra.mxu1 %v1526_v13  ;;  %1497 = vmatprep.subr.bf16.mxu0 %v1496_v14  ;;  %v234_v48 = vld [vmem:[%s1781_s7 + $0x58] sm:$0xff]  ;;  %v236_v49 = vld [vmem:[%s1781_s7 + $0x68] sm:$0xff]  ;;  %v1544_v50 = vpack.c.bf16 %v372_v45, %v371_v44  ;;  %v233_v51 = vld [vmem:[%s1781_s7 + $0x50] sm:$0xff] }
  0x20   : > { %1529 = vmatprep.subr.bf16.mxu1 %v1528_v18  ;;  %v373_v52 = vld [vmem:[%s2292_s1 + $0x230] sm:$0xff]  ;;  %v235_v53 = vld [vmem:[%s1781_s7 + $0x60] sm:$0xff]  ;;  %v374_v55 = vld [vmem:[%s2292_s1 + $0x238] sm:$0xff] }
  0x21   : > { %v239_v54 = vld [vmem:[%s1781_s7 + $0x80] sm:$0xff]  ;;  %v241_v56 = vld [vmem:[%s1781_s7 + $0x90] sm:$0xff]  ;;  %v1548_v57 = vpack.c.bf16 %v374_v55, %v373_v52  ;;  %v238_v58 = vld [vmem:[%s1781_s7 + $0x78] sm:$0xff] }
  0x22   : > { %1499 = vmatpush3.bf16.msra.mxu0 %v1498_v24  ;;  %v240_v59 = vld [vmem:[%s1781_s7 + $0x88] sm:$0xff]  ;;  %v246_v61 = vld [vmem:[%s1781_s7 + $0xb8] sm:$0xff]  ;;  %v243_v62 = vld [vmem:[%s1781_s7 + $0xa0] sm:$0xff] }
  0x23   : > { %1531 = vmatpush3.bf16.msra.mxu1 %v1530_v25  ;;  %1501 = vmatprep.subr.bf16.mxu0 %v1500_v26  ;;  %v244_v60 = vld [vmem:[%s1781_s7 + $0xa8] sm:$0xff]  ;;  %v245_v63 = vld [vmem:[%s1781_s7 + $0xb0] sm:$0xff]  ;;  %v251_v1 = vld [vmem:[%s1781_s7 + $0xe0] sm:$0xff] }
  0x24   : > { %1533 = vmatprep.subr.bf16.mxu1 %v1532_v30  ;;  %v249_v0 = vld [vmem:[%s1781_s7 + $0xd0] sm:$0xff]  ;;  %v248_v2 = vld [vmem:[%s1781_s7 + $0xc8] sm:$0xff]  ;;  %v250_v3 = vld [vmem:[%s1781_s7 + $0xd8] sm:$0xff] }
  0x25   : > { %v254_v4 = vld [vmem:[%s1781_s7 + $0xf8] sm:$0xff]  ;;  %v256_v5 = vld [vmem:[%s1781_s7 + $0x108] sm:$0xff]  ;;  %v253_v6 = vld [vmem:[%s1781_s7 + $0xf0] sm:$0xff] }
  0x26   : > { %1503 = vmatpush3.bf16.msra.mxu0 %v1502_v34  ;;  %v255_v7 = vld [vmem:[%s1781_s7 + $0x100] sm:$0xff]  ;;  %v261_v9 = vld [vmem:[%s1781_s7 + $0x130] sm:$0xff]  ;;  %v258_v10 = vld [vmem:[%s1781_s7 + $0x118] sm:$0xff] }
  0x27   : > { %1535 = vmatpush3.bf16.msra.mxu1 %v1534_v35  ;;  %1537 = vmatprep.subr.bf16.mxu0 %v1536_v36  ;;  %v259_v8 = vld [vmem:[%s1781_s7 + $0x120] sm:$0xff]  ;;  %v260_v11 = vld [vmem:[%s1781_s7 + $0x128] sm:$0xff]  ;;  %v266_v13 = vld [vmem:[%s1781_s7 + $0x158] sm:$0xff] }
  0x28   : > { %1552 = vmatprep.subr.bf16.mxu1 %v1536_v36  ;;  %v264_v12 = vld [vmem:[%s1781_s7 + $0x148] sm:$0xff]  ;;  %v263_v14 = vld [vmem:[%s1781_s7 + $0x140] sm:$0xff]  ;;  %v265_v15 = vld [vmem:[%s1781_s7 + $0x150] sm:$0xff] }
  0x29   : > { %496 = vmatmul.mubr.f32.vlgmr.msra.gmra.mrb[0].mxu0 %v223_v39  ;;  %v269_v16 = vld [vmem:[%s1781_s7 + $0x170] sm:$0xff]  ;;  %v271_v17 = vld [vmem:[%s1781_s7 + $0x180] sm:$0xff]  ;;  %v268_v18 = vld [vmem:[%s1781_s7 + $0x168] sm:$0xff] }
  0x2a   : > { %641 = vmatmul.mubr.f32.vlgmr.msra.gmra.mrb[0].mxu1 %v225_v40  ;;  %1539 = vmatpush3.bf16.msra.mxu0 %v1536_v36  ;;  %v270_v19 = vld [vmem:[%s1781_s7 + $0x178] sm:$0xff]  ;;  %v276_v21 = vld [vmem:[%s1781_s7 + $0x1a8] sm:$0xff]  ;;  %v273_v22 = vld [vmem:[%s1781_s7 + $0x190] sm:$0xff] }
  0x2b   : > { %500 = vmatprep.mubr.f32.mxu0 %v229_v41  ;;  %645 = vmatprep.mubr.f32.mxu1 %v231_v42  ;;  %v274_v20 = vld [vmem:[%s1781_s7 + $0x198] sm:$0xff]  ;;  %v275_v23 = vld [vmem:[%s1781_s7 + $0x1a0] sm:$0xff]  ;;  %v281_v25 = vld [vmem:[%s1781_s7 + $0x1d0] sm:$0xff] }
  0x2c   : > { %1541 = vmatprep.subr.bf16.mxu0 %v1540_v43  ;;  %1556 = vmatpush3.bf16.msra.mxu1 %v1536_v36  ;;  %v279_v24 = vld [vmem:[%s1781_s7 + $0x1c0] sm:$0xff]  ;;  %v278_v26 = vld [vmem:[%s1781_s7 + $0x1b8] sm:$0xff]  ;;  %v280_v27 = vld [vmem:[%s1781_s7 + $0x1c8] sm:$0xff] }
  0x2d   : > { %501 = vmatmul.mubr.f32.gmra.mrb[2].mxu0 %v228_v46  ;;  %1553 = vmatprep.subr.bf16.mxu1 %v1540_v43  ;;  %v284_v28 = vld [vmem:[%s1781_s7 + $0x1e8] sm:$0xff]  ;;  %v286_v29 = vld [vmem:[%s1781_s7 + $0x1f8] sm:$0xff]  ;;  %v283_v30 = vld [vmem:[%s1781_s7 + $0x1e0] sm:$0xff] }
  0x2e   : > { %646 = vmatmul.mubr.f32.gmra.mrb[2].mxu1 %v230_v47  ;;  %505 = vmatprep.mubr.f32.mxu0 %v234_v48  ;;  %v285_v31 = vld [vmem:[%s1781_s7 + $0x1f0] sm:$0xff]  ;;  %v291_v33 = vld [vmem:[%s1781_s7 + $0x220] sm:$0xff]  ;;  %v288_v34 = vld [vmem:[%s1781_s7 + $0x208] sm:$0xff] }
  0x2f   : > { %650 = vmatprep.mubr.f32.mxu1 %v236_v49  ;;  %1543 = vmatpush3.bf16.msra.mxu0 %v1540_v43  ;;  %v289_v32 = vld [vmem:[%s1781_s7 + $0x210] sm:$0xff]  ;;  %v290_v35 = vld [vmem:[%s1781_s7 + $0x218] sm:$0xff]  ;;  %v296_v37 = vld [vmem:[%s1781_s7 + $0x248] sm:$0xff] }
  0x30   : > { %1545 = vmatprep.subr.bf16.mxu0 %v1544_v50  ;;  %1557 = vmatpush3.bf16.msra.mxu1 %v1540_v43  ;;  %v294_v36 = vld [vmem:[%s1781_s7 + $0x238] sm:$0xff]  ;;  %v293_v38 = vld [vmem:[%s1781_s7 + $0x230] sm:$0xff]  ;;  %v295_v39 = vld [vmem:[%s1781_s7 + $0x240] sm:$0xff] }
  0x31   : > { %506 = vmatmul.mubr.f32.gmra.mrb[4].mxu0 %v233_v51  ;;  %1554 = vmatprep.subr.bf16.mxu1 %v1544_v50  ;;  %v299_v40 = vld [vmem:[%s1781_s7 + $0x260] sm:$0x1]  ;;  %v301_v41 = vld [vmem:[%s1781_s7 + $0x270] sm:$0x1]  ;;  %v298_v42 = vld [vmem:[%s1781_s7 + $0x258] sm:$0x1] }
  0x32   : > { %651 = vmatmul.mubr.f32.gmra.mrb[4].mxu1 %v235_v53  ;;  %510 = vmatprep.mubr.f32.mxu0 %v239_v54  ;;  %v300_v43 = vld [vmem:[%s1781_s7 + $0x268] sm:$0x1]  ;;  %v227_v44 = vld [vmem:[%s1781_s7 + $0x20] sm:$0xff]  ;;  %v237_v48 = vld [vmem:[%s1781_s7 + $0x70] sm:$0xff] }
  0x33   : > { %655 = vmatprep.mubr.f32.mxu1 %v241_v56  ;;  %1547 = vmatpush3.bf16.msra.mxu0 %v1544_v50  ;;  %v267_v45 = vld [vmem:[%s1781_s7 + $0x160] sm:$0xff]  ;;  %v232_v46 = vld [vmem:[%s1781_s7 + $0x48] sm:$0xff]  ;;  %v277_v49 = vld [vmem:[%s1781_s7 + $0x1b0] sm:$0xff] }
  0x34   : > { %1549 = vmatprep.subr.bf16.mxu0 %v1548_v57  ;;  %1558 = vmatpush3.bf16.msra.mxu1 %v1544_v50  ;;  %v272_v47 = vld [vmem:[%s1781_s7 + $0x188] sm:$0xff]  ;;  %v242_v50 = vld [vmem:[%s1781_s7 + $0x98] sm:$0xff]  ;;  %v247_v52 = vld [vmem:[%s1781_s7 + $0xc0] sm:$0xff] }
  0x35   : > { %511 = vmatmul.mubr.f32.gmra.mrb[6].mxu0 %v238_v58  ;;  %1555 = vmatprep.subr.bf16.mxu1 %v1548_v57  ;;  %v282_v51 = vld [vmem:[%s1781_s7 + $0x1d8] sm:$0xff]  ;;  %v287_v53 = vld [vmem:[%s1781_s7 + $0x200] sm:$0xff]  ;;  %v252_v54 = vld [vmem:[%s1781_s7 + $0xe8] sm:$0xff] }
  0x36   : > { %656 = vmatmul.mubr.f32.gmra.mrb[6].mxu1 %v240_v59  ;;  %515 = vmatprep.mubr.f32.mxu0 %v244_v60  ;;  %v292_v55 = vld [vmem:[%s1781_s7 + $0x228] sm:$0xff]  ;;  %v257_v56 = vld [vmem:[%s1781_s7 + $0x110] sm:$0xff]  ;;  %v262_v58 = vld [vmem:[%s1781_s7 + $0x138] sm:$0xff] }
  0x37   : > { %660 = vmatprep.mubr.f32.mxu1 %v246_v61  ;;  %1551 = vmatpush3.bf16.msra.mxu0 %v1548_v57  ;;  %v302_v59 = vld [vmem:[%s1781_s7 + $0x278] sm:$0x1]  ;;  %v1948_v61 = vld [vmem:[%s2293_s2] ss:$0 sm:$0xff] }
  0x38   : > { %1559 = vmatpush3.bf16.msra.mxu1 %v1548_v57  ;;  %v297_v57 = vld [vmem:[%s1781_s7 + $0x250] sm:$0xff] }
  0x39   : > { %516 = vmatmul.mubr.f32.gmra.mrb[8].mxu0 %v243_v62 }
  0x3a   : > { %661 = vmatmul.mubr.f32.gmra.mrb[8].mxu1 %v245_v63  ;;  %520 = vmatprep.mubr.f32.mxu0 %v249_v0 }
  0x3b   : > { %665 = vmatprep.mubr.f32.mxu1 %v251_v1 }
  0x3d   : > { %521 = vmatmul.mubr.f32.gmra.mrb[10].mxu0 %v248_v2 }
  0x3e   : > { %666 = vmatmul.mubr.f32.gmra.mrb[10].mxu1 %v250_v3  ;;  %525 = vmatprep.mubr.f32.mxu0 %v254_v4 }
  0x3f   : > { %670 = vmatprep.mubr.f32.mxu1 %v256_v5 }
  0x41   : > { %526 = vmatmul.mubr.f32.gmra.mrb[12].mxu0 %v253_v6 }
  0x42   : > { %671 = vmatmul.mubr.f32.gmra.mrb[12].mxu1 %v255_v7  ;;  %530 = vmatprep.mubr.f32.mxu0 %v259_v8 }
  0x43   : > { %675 = vmatprep.mubr.f32.mxu1 %v261_v9 }
  0x45   : > { %531 = vmatmul.mubr.f32.gmra.mrb[14].mxu0 %v258_v10 }
  0x46   : > { %676 = vmatmul.mubr.f32.gmra.mrb[14].mxu1 %v260_v11  ;;  %535 = vmatprep.mubr.f32.mxu0 %v264_v12 }
  0x47   : > { %680 = vmatprep.mubr.f32.mxu1 %v266_v13 }
  0x49   : > { %536 = vmatmul.mubr.f32.gmra.mrb[16].mxu0 %v263_v14 }
  0x4a   : > { %681 = vmatmul.mubr.f32.gmra.mrb[16].mxu1 %v265_v15  ;;  %540 = vmatprep.mubr.f32.mxu0 %v269_v16 }
  0x4b   : > { %685 = vmatprep.mubr.f32.mxu1 %v271_v17 }
  0x4d   : > { %541 = vmatmul.mubr.f32.gmra.mrb[18].mxu0 %v268_v18 }
  0x4e   : > { %686 = vmatmul.mubr.f32.gmra.mrb[18].mxu1 %v270_v19  ;;  %545 = vmatprep.mubr.f32.mxu0 %v274_v20 }
  0x4f   : > { %690 = vmatprep.mubr.f32.mxu1 %v276_v21 }
  0x51   : > { %546 = vmatmul.mubr.f32.gmra.mrb[20].mxu0 %v273_v22 }
  0x52   : > { %691 = vmatmul.mubr.f32.gmra.mrb[20].mxu1 %v275_v23  ;;  %550 = vmatprep.mubr.f32.mxu0 %v279_v24 }
  0x53   : > { %695 = vmatprep.mubr.f32.mxu1 %v281_v25 }
  0x55   : > { %551 = vmatmul.mubr.f32.gmra.mrb[22].mxu0 %v278_v26 }
  0x56   : > { %696 = vmatmul.mubr.f32.gmra.mrb[22].mxu1 %v280_v27  ;;  %555 = vmatprep.mubr.f32.mxu0 %v284_v28 }
  0x57   : > { %700 = vmatprep.mubr.f32.mxu1 %v286_v29 }
  0x59   : > { %556 = vmatmul.mubr.f32.gmra.mrb[24].mxu0 %v283_v30 }
  0x5a   : > { %701 = vmatmul.mubr.f32.gmra.mrb[24].mxu1 %v285_v31  ;;  %560 = vmatprep.mubr.f32.mxu0 %v289_v32 }
  0x5b   : > { %705 = vmatprep.mubr.f32.mxu1 %v291_v33 }
  0x5d   : > { %561 = vmatmul.mubr.f32.gmra.mrb[26].mxu0 %v288_v34 }
  0x5e   : > { %706 = vmatmul.mubr.f32.gmra.mrb[26].mxu1 %v290_v35  ;;  %565 = vmatprep.mubr.f32.mxu0 %v294_v36 }
  0x5f   : > { %710 = vmatprep.mubr.f32.mxu1 %v296_v37 }
  0x61   : > { %566 = vmatmul.mubr.f32.gmra.mrb[28].mxu0 %v293_v38 }
  0x62   : > { %711 = vmatmul.mubr.f32.gmra.mrb[28].mxu1 %v295_v39  ;;  %570 = vmatprep.mubr.f32.mxu0 %v299_v40 }
  0x63   : > { %715 = vmatprep.mubr.f32.mxu1 %v301_v41 }
  0x65   : > { %571 = vmatmul.mubr.f32.gmra.mrb[30].mxu0 %v298_v42 }
  0x66   : > { %716 = vmatmul.mubr.f32.gmra.mrb[30].mxu1 %v300_v43  ;;  %1448 = vmatprep.mubr.msk.f32.mxu0 %vm382_vm0, %v227_v44 }
  0x67   : > { %1460 = vmatprep.mubr.msk.f32.mxu1 %vm382_vm0, %v267_v45 }
  0x69   : > { %1449 = vmatmul.mubr.msk.f32.vlgmr.msra.gmra.mrb[32].mxu0 %vm382_vm0, %v232_v46 }
  0x6a   : > { %1461 = vmatmul.mubr.msk.f32.vlgmr.msra.gmra.mrb[32].mxu1 %vm382_vm0, %v272_v47  ;;  %1451 = vmatprep.mubr.msk.f32.mxu0 %vm382_vm0, %v237_v48 }
  0x6b   : > { %1463 = vmatprep.mubr.msk.f32.mxu1 %vm382_vm0, %v277_v49 }
  0x6d   : > { %1452 = vmatmul.mubr.msk.f32.gmra.mrb[34].mxu0 %vm382_vm0, %v242_v50 }
  0x6e   : > { %1464 = vmatmul.mubr.msk.f32.gmra.mrb[34].mxu1 %vm382_vm0, %v282_v51  ;;  %1454 = vmatprep.mubr.msk.f32.mxu0 %vm382_vm0, %v247_v52 }
  0x6f   : > { %1466 = vmatprep.mubr.msk.f32.mxu1 %vm382_vm0, %v287_v53 }
  0x71   : > { %1455 = vmatmul.mubr.msk.f32.gmra.mrb[36].mxu0 %vm382_vm0, %v252_v54 }
  0x72   : > { %1467 = vmatmul.mubr.msk.f32.gmra.mrb[36].mxu1 %vm382_vm0, %v292_v55  ;;  %1457 = vmatprep.mubr.msk.f32.mxu0 %vm382_vm0, %v257_v56 }
  0x73   : > { %1469 = vmatprep.mubr.msk.f32.mxu1 %vm382_vm0, %v297_v57 }
  0x75   : > { %1458 = vmatmul.mubr.msk.f32.gmra.mrb[38].mxu0 %vm382_vm0, %v262_v58 }
  0x76   : > { %1470 = vmatmul.mubr.msk.f32.gmra.mrb[38].mxu1 %vm382_vm0, %v302_v59 }
  0xfc   : > { %v1280_v60 = vpop.f32.mrb[0].mxu0 }
  0xfd   : > { %v1281_v62 = vpop.f32.mrb[1].mxu0  ;;  %v1360_v63 = vpop.f32.mrb[0].mxu1 }
  0xfe   : > { %v1282_v0 = vadd.f32 %v1281_v62, %v1280_v60  ;;  %v1361_v1 = vpop.f32.mrb[1].mxu1 }
  0xff   : > { %v1362_v2 = vadd.f32 %v1361_v1, %v1360_v63 }
 0x100   : > { %v498_v3 = vadd.f32 %v1282_v0, %v1948_v61  ;;  %v1283_v4 = vpop.f32.mrb[2].mxu0 }
 0x101   : > { %v1284_v5 = vpop.f32.mrb[3].mxu0  ;;  %v1363_v6 = vpop.f32.mrb[2].mxu1 }
 0x102   : > { %v1285_v7 = vadd.f32 %v1284_v5, %v1283_v4  ;;  %v1364_v8 = vpop.f32.mrb[3].mxu1  ;;  %v1951_v9 = vadd.f32 %v1362_v2, %v498_v3 }
 0x103   : > { %v1365_v10 = vadd.f32 %v1364_v8, %v1363_v6 }
 0x104   : > { %v503_v11 = vadd.f32 %v1285_v7, %v1948_v61  ;;  %v1286_v12 = vpop.f32.mrb[4].mxu0 }
 0x105   : > { %v1287_v13 = vpop.f32.mrb[5].mxu0  ;;  %v1366_v14 = vpop.f32.mrb[4].mxu1 }
 0x106   : > { %v1288_v15 = vadd.f32 %v1287_v13, %v1286_v12  ;;  %v1367_v16 = vpop.f32.mrb[5].mxu1  ;;  %v1954_v17 = vadd.f32 %v1365_v10, %v503_v11 }
 0x107   : > { %v1368_v18 = vadd.f32 %v1367_v16, %v1366_v14 }
 0x108   : > { %v508_v19 = vadd.f32 %v1288_v15, %v1948_v61  ;;  %v1289_v20 = vpop.f32.mrb[6].mxu0 }
 0x109   : > { %v1290_v21 = vpop.f32.mrb[7].mxu0  ;;  %v1369_v22 = vpop.f32.mrb[6].mxu1 }
 0x10a   : > { %v1291_v23 = vadd.f32 %v1290_v21, %v1289_v20  ;;  %v1370_v24 = vpop.f32.mrb[7].mxu1  ;;  %v1957_v25 = vadd.f32 %v1368_v18, %v508_v19 }
 0x10b   : > { %v1371_v26 = vadd.f32 %v1370_v24, %v1369_v22 }
 0x10c   : > { %v513_v27 = vadd.f32 %v1291_v23, %v1948_v61  ;;  %v1292_v28 = vpop.f32.mrb[8].mxu0 }
 0x10d   : > { %v1293_v29 = vpop.f32.mrb[9].mxu0  ;;  %v1372_v30 = vpop.f32.mrb[8].mxu1 }
 0x10e   : > { %v1294_v31 = vadd.f32 %v1293_v29, %v1292_v28  ;;  %v1373_v32 = vpop.f32.mrb[9].mxu1  ;;  %v1960_v33 = vadd.f32 %v1371_v26, %v513_v27 }
 0x10f   : > { %v1374_v34 = vadd.f32 %v1373_v32, %v1372_v30 }
 0x110   : > { %v518_v35 = vadd.f32 %v1294_v31, %v1948_v61  ;;  %v1295_v36 = vpop.f32.mrb[10].mxu0 }
 0x111   : > { %v1296_v37 = vpop.f32.mrb[11].mxu0  ;;  %v1375_v38 = vpop.f32.mrb[10].mxu1 }
 0x112   : > { %v1297_v39 = vadd.f32 %v1296_v37, %v1295_v36  ;;  %v1376_v40 = vpop.f32.mrb[11].mxu1  ;;  %v1963_v41 = vadd.f32 %v1374_v34, %v518_v35 }
 0x113   : > { %v1377_v42 = vadd.f32 %v1376_v40, %v1375_v38 }
 0x114   : > { %v523_v43 = vadd.f32 %v1297_v39, %v1948_v61  ;;  %v1298_v44 = vpop.f32.mrb[12].mxu0 }
 0x115   : > { %v1299_v45 = vpop.f32.mrb[13].mxu0  ;;  %v1378_v46 = vpop.f32.mrb[12].mxu1 }
 0x116   : > { %v1300_v47 = vadd.f32 %v1299_v45, %v1298_v44  ;;  %v1379_v48 = vpop.f32.mrb[13].mxu1  ;;  %v1966_v49 = vadd.f32 %v1377_v42, %v523_v43 }
 0x117   : > { %v1380_v50 = vadd.f32 %v1379_v48, %v1378_v46 }
 0x118   : > { %v528_v51 = vadd.f32 %v1300_v47, %v1948_v61  ;;  %v1301_v52 = vpop.f32.mrb[14].mxu0 }
 0x119   : > { %v1302_v53 = vpop.f32.mrb[15].mxu0  ;;  %v1381_v54 = vpop.f32.mrb[14].mxu1 }
 0x11a   : > { %v1303_v55 = vadd.f32 %v1302_v53, %v1301_v52  ;;  %v1382_v56 = vpop.f32.mrb[15].mxu1  ;;  %v1969_v57 = vadd.f32 %v1380_v50, %v528_v51 }
 0x11b   : > { %v1383_v58 = vadd.f32 %v1382_v56, %v1381_v54 }
 0x11c   : > { %v533_v59 = vadd.f32 %v1303_v55, %v1948_v61  ;;  %v1304_v60 = vpop.f32.mrb[16].mxu0 }
 0x11d   : > { %v1305_v62 = vpop.f32.mrb[17].mxu0  ;;  %v1384_v63 = vpop.f32.mrb[16].mxu1 }
 0x11e   : > { %v1306_v0 = vadd.f32 %v1305_v62, %v1304_v60  ;;  %v1385_v1 = vpop.f32.mrb[17].mxu1  ;;  %v1972_v2 = vadd.f32 %v1383_v58, %v533_v59 }
 0x11f   : > { %v1386_v3 = vadd.f32 %v1385_v1, %v1384_v63 }
 0x120   : > { %v538_v4 = vadd.f32 %v1306_v0, %v1948_v61  ;;  %v1307_v5 = vpop.f32.mrb[18].mxu0 }
 0x121   : > { %v1308_v6 = vpop.f32.mrb[19].mxu0  ;;  %v1387_v7 = vpop.f32.mrb[18].mxu1 }
 0x122   : > { %v1309_v8 = vadd.f32 %v1308_v6, %v1307_v5  ;;  %v1388_v10 = vpop.f32.mrb[19].mxu1  ;;  %v1975_v11 = vadd.f32 %v1386_v3, %v538_v4 }
 0x123   : > { %v1389_v12 = vadd.f32 %v1388_v10, %v1387_v7 }
 0x124   : > { %v543_v13 = vadd.f32 %v1309_v8, %v1948_v61  ;;  %v1310_v14 = vpop.f32.mrb[20].mxu0 }
 0x125   : > { %v1311_v15 = vpop.f32.mrb[21].mxu0  ;;  %v1390_v16 = vpop.f32.mrb[20].mxu1 }
 0x126   : > { %v1312_v18 = vadd.f32 %v1311_v15, %v1310_v14  ;;  %v1391_v19 = vpop.f32.mrb[21].mxu1  ;;  %v688_v20 = vadd.f32 %v1389_v12, %v543_v13 }
 0x127   : > { %v1392_v21 = vadd.f32 %v1391_v19, %v1390_v16 }
 0x128   : > { %v548_v22 = vadd.f32 %v1312_v18, %v1948_v61  ;;  %v1313_v23 = vpop.f32.mrb[22].mxu0  ;;  %v915_v18 = vld [vmem:[%s2294_s3 + $0x8] sm:$0xff] }
 0x129   : > { %v1314_v24 = vpop.f32.mrb[23].mxu0  ;;  %v1393_v26 = vpop.f32.mrb[22].mxu1 }
 0x12a   : > { %v1315_v27 = vadd.f32 %v1314_v24, %v1313_v23  ;;  %v1394_v28 = vpop.f32.mrb[23].mxu1  ;;  %v1979_v29 = vadd.f32 %v1392_v21, %v548_v22  ;;  %v914_v21 = vld [vmem:[%s2294_s3] sm:$0xff] }
 0x12b   : > { %v1395_v30 = vadd.f32 %v1394_v28, %v1393_v26  ;;  %v1214_v28 = vld [vmem:[%s2294_s3 + $0x80] sm:$0xff] }
 0x12c   : > { %v553_v31 = vadd.f32 %v1315_v27, %v1948_v61  ;;  %v1316_v32 = vpop.f32.mrb[24].mxu0 }
 0x12d   : > { %v1317_v34 = vpop.f32.mrb[25].mxu0  ;;  %v1396_v35 = vpop.f32.mrb[24].mxu1 }
 0x12e   : > { %v1318_v36 = vadd.f32 %v1317_v34, %v1316_v32  ;;  %v1397_v37 = vpop.f32.mrb[25].mxu1  ;;  %v1982_v38 = vadd.f32 %v1395_v30, %v553_v31  ;;  %v1230_v32 = vld [vmem:[%s2294_s3 + $0x100] sm:$0xff] }
 0x12f   : > { %v1398_v39 = vadd.f32 %v1397_v37, %v1396_v35 }
 0x130   : > { %v558_v40 = vadd.f32 %v1318_v36, %v1948_v61  ;;  %v1319_v42 = vpop.f32.mrb[26].mxu0 }
 0x131   : > { %v1320_v43 = vpop.f32.mrb[27].mxu0  ;;  %v1399_v44 = vpop.f32.mrb[26].mxu1 }
 0x132   : > { %v1321_v45 = vadd.f32 %v1320_v43, %v1319_v42  ;;  %v1400_v46 = vpop.f32.mrb[27].mxu1  ;;  %v1985_v47 = vadd.f32 %v1398_v39, %v558_v40 }
 0x133   : > { %v1401_v48 = vadd.f32 %v1400_v46, %v1399_v44 }
 0x134   : > { %v563_v50 = vadd.f32 %v1321_v45, %v1948_v61  ;;  %v1322_v51 = vpop.f32.mrb[28].mxu0 }
 0x135   : > { %v1323_v52 = vpop.f32.mrb[29].mxu0  ;;  %v1402_v53 = vpop.f32.mrb[28].mxu1 }
 0x136   : > { %v1324_v54 = vadd.f32 %v1323_v52, %v1322_v51  ;;  %v1403_v55 = vpop.f32.mrb[29].mxu1  ;;  %v1988_v56 = vadd.f32 %v1401_v48, %v563_v50 }
 0x137   : > { %v1404_v58 = vadd.f32 %v1403_v55, %v1402_v53 }
 0x138   : > { %v568_v59 = vadd.f32 %v1324_v54, %v1948_v61  ;;  %v1325_v60 = vpop.f32.mrb[30].mxu0 }
 0x139   : > { %v1326_v62 = vpop.f32.mrb[31].mxu0  ;;  %v1405_v63 = vpop.f32.mrb[30].mxu1 }
 0x13a   : > { %v1327_v0 = vadd.f32 %v1326_v62, %v1325_v60  ;;  %v1406_v1 = vpop.f32.mrb[31].mxu1  ;;  %v1991_v3 = vadd.f32 %v1404_v58, %v568_v59 }
 0x13b   : > { %v1407_v4 = vadd.f32 %v1406_v1, %v1405_v63 }
 0x13c   : > { %v573_v5 = vadd.f32 %v1327_v0, %v1948_v61  ;;  %v1450_v6 = vpop.f32.mrb[32].mxu0  ;;  %v1215_v61 = vld [vmem:[%s2294_s3 + $0x88] sm:$0xff] }
 0x13d   : > { %v793_v7 = vadd.f32 %v1450_v6, %v1954_v17  ;;  %v1462_v8 = vpop.f32.mrb[32].mxu1  ;;  %v787_v10 = vpop.f32.mrb[33].mxu0  ;;  %v1231_v17 = vld [vmem:[%s2294_s3 + $0x108] sm:$0xff]  ;;  %v1216_v6 = vld [vmem:[%s2294_s3 + $0x90] sm:$0xff] }
 0x13e   : > { %v1995_v12 = vadd.f32 %v1462_v8, %v688_v20  ;;  %v788_v13 = vadd.f32 %v787_v10, %v1951_v9  ;;  %v827_v14 = vpop.f32.mrb[33].mxu1  ;;  %v1998_v15 = vadd.f32 %v1407_v4, %v573_v5  ;;  %v1233_v10 = vld [vmem:[%s2294_s3 + $0x118] sm:$0xff] }
 0x13f   : > { %vm867_vm1 = vcmp.ge.f32.partialorder %v793_v7, 0.0  ;;  %v883_v16 = vmul.f32 0.01, %v793_v7  ;;  %v2010_v19 = vadd.f32 %v827_v14, %v1975_v11 }
 0x140   : > { %vm866_vm2 = vcmp.ge.f32.partialorder %v788_v13, 0.0  ;;  %v882_v9 = vmul.f32 0.01, %v788_v13  ;;  %v1453_v22 = vpop.f32.mrb[34].mxu0  ;;  %vm875_vm6 = vcmp.ge.f32.partialorder %v1995_v12, 0.0 }
 0x141   : > { %v899_v20 = vsel %vm867_vm1, %v793_v7, %v883_v16  ;;  %v1465_v23 = vpop.f32.mrb[34].mxu1  ;;  %v797_v30 = vpop.f32.mrb[35].mxu0  ;;  %v803_v46 = vadd.f32 %v1453_v22, %v1960_v33  ;;  %v1217_v7 = vld [vmem:[%s2294_s3 + $0x98] sm:$0xff]  ;;  %vm874_vm7 = vcmp.ge.f32.partialorder %v2010_v19, 0.0  ;;  %v890_v14 = vmul.f32 0.01, %v2010_v19 }
 0x142   : > { %v931_v24 = vmul.f32 %v915_v18, %v899_v20  ;;  %v1003_v26 = vmul.f32 %v1215_v61, %v899_v20  ;;  %v1073_v27 = vmul.f32 %v1231_v17, %v899_v20  ;;  %v837_v11 = vpop.f32.mrb[35].mxu1  ;;  %v898_v31 = vsel %vm866_vm2, %v788_v13, %v882_v9  ;;  %v1223_v22 = vld [vmem:[%s2294_s3 + $0xc8] sm:$0xff] }
 0x143   : > { %v930_v35 = vmul.f32 %v914_v21, %v898_v31  ;;  %v1002_v39 = vmul.f32 %v1214_v28, %v898_v31  ;;  %v1072_v45 = vmul.f32 %v1230_v32, %v898_v31  ;;  %v2037_v60 = vadd.f32 %v1465_v23, %v1982_v38  ;;  %v923_v21 = vld [vmem:[%s2294_s3 + $0x48] sm:$0xff] }
 0x144   : > { %v948_v34 = vsel %vm946_vm3, %v931_v24, 0.0  ;;  %v1456_v36 = vpop.f32.mrb[36].mxu0  ;;  %v1019_v37 = vsel %vm946_vm3, %v1003_v26, 0.0  ;;  %v1089_v43 = vsel %vm946_vm3, %v1073_v27, 0.0  ;;  %v798_v33 = vadd.f32 %v797_v30, %v1957_v25  ;;  %v916_v25 = vld [vmem:[%s2294_s3 + $0x10] sm:$0xff]  ;;  %v1239_v31 = vld [vmem:[%s2294_s3 + $0x148] sm:$0xff] }
 0x145   : > { %v1468_v40 = vpop.f32.mrb[36].mxu1  ;;  %v807_v42 = vpop.f32.mrb[37].mxu0  ;;  %v947_v44 = vsel %vm946_vm3, %v930_v35, 0.0  ;;  %v1018_v51 = vsel %vm946_vm3, %v1002_v39, 0.0  ;;  %v1088_v53 = vsel %vm946_vm3, %v1072_v45, 0.0  ;;  %v2041_v62 = vadd.f32 %v837_v11, %v1979_v29  ;;  %v1222_v45 = vld [vmem:[%s2294_s3 + $0xc0] sm:$0xff] }
 0x146   : > { %v2026_v48 = vpop.f32.mrb[37].mxu1  ;;  %v949_v50 = vadd.f32 %v948_v34, %v947_v44  ;;  %v1020_v52 = vadd.f32 %v1019_v37, %v1018_v51  ;;  %v1090_v55 = vadd.f32 %v1089_v43, %v1088_v53  ;;  %v885_v0 = vmul.f32 0.01, %v803_v46  ;;  %v922_v37 = vld [vmem:[%s2294_s3 + $0x40] sm:$0xff] }
 0x147   : > { %v2046_v1 = vadd.f32 %v1456_v36, %v1966_v49  ;;  %v2049_v4 = vadd.f32 %v1468_v40, %v1988_v56  ;;  %v808_v5 = vadd.f32 %v807_v42, %v1963_v41  ;;  %vm869_vm4 = vcmp.ge.f32.partialorder %v803_v46, 0.0  ;;  %v1232_v49 = vld [vmem:[%s2294_s3 + $0x110] sm:$0xff]  ;;  %v917_v56 = vld [vmem:[%s2294_s3 + $0x18] sm:$0xff]  ;;  %v918_v42 = vld [vmem:[%s2294_s3 + $0x20] sm:$0xff] }
 0x148   : > { %v2030_v54 = vpop.f32.mrb[38].mxu0  ;;  %vm868_vm5 = vcmp.ge.f32.partialorder %v798_v33, 0.0  ;;  %v884_v38 = vmul.f32 0.01, %v798_v33  ;;  %v891_v29 = vmul.f32 0.01, %v1995_v12  ;;  %v901_v41 = vsel %vm869_vm4, %v803_v46, %v885_v0 }
 0x149   : > { %v2032_v58 = vpop.f32.mrb[38].mxu1  ;;  %v2034_v59 = vpop.f32.mrb[39].mxu0  ;;  %v933_v17 = vmul.f32 %v917_v56, %v901_v41  ;;  %v1005_v9 = vmul.f32 %v1217_v7, %v901_v41  ;;  %v1075_v23 = vmul.f32 %v1233_v10, %v901_v41  ;;  %v906_v32 = vsel %vm874_vm7, %v2010_v19, %v890_v14  ;;  %v1234_v51 = vld [vmem:[%s2294_s3 + $0x120] sm:$0xff]  ;;  %v1235_v41 = vld [vmem:[%s2294_s3 + $0x128] sm:$0xff]  ;;  %v925_v7 = vld [vmem:[%s2294_s3 + $0x58] sm:$0xff] }
 0x14a   : > { %v2043_v63 = vpop.f32.mrb[39].mxu1  ;;  %v900_v8 = vsel %vm868_vm5, %v798_v33, %v884_v38  ;;  %v907_v61 = vsel %vm875_vm6, %v1995_v12, %v891_v29  ;;  %vm870_vm8 = vcmp.ge.f32.partialorder %v808_v5, 0.0  ;;  %v887_v39 = vmul.f32 0.01, %v2046_v1  ;;  %v1238_v53 = vld [vmem:[%s2294_s3 + $0x140] sm:$0xff]  ;;  %v1225_v14 = vld [vmem:[%s2294_s3 + $0xd8] sm:$0xff] }
 0x14b   : > { %v932_v13 = vmul.f32 %v916_v25, %v900_v8  ;;  %v1004_v16 = vmul.f32 %v1216_v6, %v900_v8  ;;  %v1074_v18 = vmul.f32 %v1232_v49, %v900_v8  ;;  %v939_v30 = vmul.f32 %v923_v21, %v907_v61 }
 0x14c   : > { %v1011_v11 = vmul.f32 %v1223_v22, %v907_v61  ;;  %v952_v34 = vsel %vm946_vm3, %v933_v17, 0.0  ;;  %v1023_v35 = vsel %vm946_vm3, %v1005_v9, 0.0  ;;  %v1093_v36 = vsel %vm946_vm3, %v1075_v23, 0.0 }
 0x14d   : > { %v950_v20 = vsel %vm946_vm3, %v932_v13, 0.0  ;;  %v1021_v26 = vsel %vm946_vm3, %v1004_v16, 0.0  ;;  %v1091_v27 = vsel %vm946_vm3, %v1074_v18, 0.0  ;;  %v886_v40 = vmul.f32 0.01, %v808_v5  ;;  %v1241_v16 = vld [vmem:[%s2294_s3 + $0x158] sm:$0xff] }
 0x14e   : > { %v951_v24 = vadd.f32 %v950_v20, %v949_v50  ;;  %v1022_v28 = vadd.f32 %v1021_v26, %v1020_v52  ;;  %v1092_v12 = vadd.f32 %v1091_v27, %v1090_v55  ;;  %v1081_v44 = vmul.f32 %v1239_v31, %v907_v61  ;;  %v1218_v50 = vld [vmem:[%s2294_s3 + $0xa0] sm:$0xff] }
 0x14f   : > { %v893_v46 = vmul.f32 0.01, %v2037_v60  ;;  %vm871_vm9 = vcmp.ge.f32.partialorder %v2046_v1, 0.0  ;;  %v902_v55 = vsel %vm870_vm8, %v808_v5, %v886_v40  ;;  %v2116_v33 = vadd.f32 %v2026_v48, %v1985_v47  ;;  %v919_v47 = vld [vmem:[%s2294_s3 + $0x28] sm:$0xff]  ;;  %v1220_v40 = vld [vmem:[%s2294_s3 + $0xb0] sm:$0xff] }
 0x150   : > { %v953_v43 = vadd.f32 %v952_v34, %v951_v24  ;;  %v1024_v19 = vadd.f32 %v1023_v35, %v1022_v28  ;;  %v1094_v52 = vadd.f32 %v1093_v36, %v1092_v12  ;;  %v823_v0 = vadd.f32 %v2030_v54, %v1972_v2  ;;  %v1237_v34 = vld [vmem:[%s2294_s3 + $0x138] sm:$0xff]  ;;  %v920_v35 = vld [vmem:[%s2294_s3 + $0x30] sm:$0xff] }
 0x151   : > { %v2122_v38 = vadd.f32 %v2032_v58, %v1998_v15  ;;  %v2125_v25 = vsel %vm946_vm3, %v939_v30, 0.0  ;;  %v938_v29 = vmul.f32 %v922_v37, %v906_v32  ;;  %vm877_vm10 = vcmp.ge.f32.partialorder %v2037_v60, 0.0  ;;  %v1219_v58 = vld [vmem:[%s2294_s3 + $0xa8] sm:$0xff] }
 0x152   : > { %v934_v6 = vmul.f32 %v918_v42, %v902_v55  ;;  %v1010_v49 = vmul.f32 %v1222_v45, %v906_v32  ;;  %v903_v5 = vsel %vm871_vm9, %v2046_v1, %v887_v39  ;;  %v1006_v48 = vmul.f32 %v1218_v50, %v902_v55  ;;  %v1236_v42 = vld [vmem:[%s2294_s3 + $0x130] sm:$0xff] }
 0x153   : > { %v1076_v2 = vmul.f32 %v1234_v51, %v902_v55  ;;  %v1080_v54 = vmul.f32 %v1238_v53, %v906_v32  ;;  %vm876_vm11 = vcmp.ge.f32.partialorder %v2041_v62, 0.0  ;;  %v892_v15 = vmul.f32 0.01, %v2041_v62  ;;  %v1221_v32 = vld [vmem:[%s2294_s3 + $0xb8] sm:$0xff] }
 0x154   : > { %v954_v1 = vsel %vm946_vm3, %v934_v6, 0.0  ;;  %v909_v56 = vsel %vm877_vm10, %v2037_v60, %v893_v46  ;;  %v1025_v10 = vsel %vm946_vm3, %v1006_v48, 0.0  ;;  %v935_v18 = vmul.f32 %v919_v47, %v903_v5 }
 0x155   : > { %v955_v8 = vadd.f32 %v954_v1, %v953_v43  ;;  %v1095_v13 = vsel %vm946_vm3, %v1076_v2, 0.0  ;;  %v1026_v61 = vadd.f32 %v1025_v10, %v1024_v19  ;;  %v889_v17 = vmul.f32 0.01, %v823_v0  ;;  %v924_v19 = vld [vmem:[%s2294_s3 + $0x50] sm:$0xff] }
 0x156   : > { %v1096_v60 = vadd.f32 %v1095_v13, %v1094_v52  ;;  %v1007_v9 = vmul.f32 %v1219_v58, %v903_v5  ;;  %v1077_v20 = vmul.f32 %v1235_v41, %v903_v5  ;;  %vm873_vm12 = vcmp.ge.f32.partialorder %v823_v0, 0.0  ;;  %v927_v13 = vld [vmem:[%s2294_s3 + $0x68] sm:$0xff] }
 0x157   : > { %v818_v21 = vadd.f32 %v2034_v59, %v1969_v57  ;;  %v2156_v22 = vsel %vm946_vm3, %v1011_v11, 0.0  ;;  %v2159_v23 = vsel %vm946_vm3, %v1081_v44, 0.0  ;;  %v2162_v24 = vsel %vm946_vm3, %v938_v29, 0.0  ;;  %v921_v57 = vld [vmem:[%s2294_s3 + $0x38] sm:$0xff]  ;;  %v1224_v44 = vld [vmem:[%s2294_s3 + $0xd0] sm:$0xff] }
 0x158   : > { %v941_v26 = vmul.f32 %v925_v7, %v909_v56  ;;  %v2165_v27 = vsel %vm946_vm3, %v1010_v49, 0.0  ;;  %v2168_v28 = vsel %vm946_vm3, %v1080_v54, 0.0  ;;  %v1013_v12 = vmul.f32 %v1225_v14, %v909_v56 }
 0x159   : > { %v1083_v30 = vmul.f32 %v1241_v16, %v909_v56  ;;  %v908_v59 = vsel %vm876_vm11, %v2041_v62, %v892_v15  ;;  %v956_v11 = vsel %vm946_vm3, %v935_v18, 0.0  ;;  %v905_v31 = vsel %vm873_vm12, %v823_v0, %v889_v17  ;;  %v926_v16 = vld [vmem:[%s2294_s3 + $0x60] sm:$0xff] }
 0x15a   : > { %vm872_vm13 = vcmp.ge.f32.partialorder %v818_v21, 0.0  ;;  %v1027_v36 = vsel %vm946_vm3, %v1007_v9, 0.0  ;;  %v1097_v62 = vsel %vm946_vm3, %v1077_v20, 0.0  ;;  %v888_v37 = vmul.f32 0.01, %v818_v21 }
 0x15b   : > { %v957_v39 = vadd.f32 %v956_v11, %v955_v8  ;;  %v2195_v43 = vsel %vm946_vm3, %v941_v26, 0.0  ;;  %v895_v45 = vmul.f32 0.01, %v2049_v4  ;;  %v1028_v46 = vadd.f32 %v1027_v36, %v1026_v61  ;;  %v1242_v26 = vld [vmem:[%s2294_s3 + $0x160] sm:$0xff] }
 0x15c   : > { %v1098_v50 = vadd.f32 %v1097_v62, %v1096_v60  ;;  %v937_v51 = vmul.f32 %v921_v57, %v905_v31  ;;  %v1009_v52 = vmul.f32 %v1221_v32, %v905_v31  ;;  %v904_v53 = vsel %vm872_vm13, %v818_v21, %v888_v37 }
 0x15d   : > { %v858_v55 = vadd.f32 %v2043_v63, %v1991_v3  ;;  %v1079_v0 = vmul.f32 %v1237_v34, %v905_v31  ;;  %v936_v29 = vmul.f32 %v920_v35, %v904_v53  ;;  %v1008_v6 = vmul.f32 %v1220_v40, %v904_v53  ;;  %v1240_v63 = vld [vmem:[%s2294_s3 + $0x150] sm:$0xff] }
 0x15e   : > { %v1078_v49 = vmul.f32 %v1236_v42, %v904_v53  ;;  %v940_v5 = vmul.f32 %v924_v19, %v908_v59  ;;  %v1012_v47 = vmul.f32 %v1224_v44, %v908_v59  ;;  %vm879_vm14 = vcmp.ge.f32.partialorder %v2049_v4, 0.0  ;;  %v928_v40 = vld [vmem:[%s2294_s3 + $0x70] sm:$0xff]  ;;  %v1229_v53 = vld [vmem:[%s2294_s3 + $0xf8] sm:$0x1] }
 0x15f   : > { %v894_v48 = vmul.f32 0.01, %v2116_v33  ;;  %vm878_vm15 = vcmp.ge.f32.partialorder %v2116_v33, 0.0  ;;  %v958_v2 = vsel %vm946_vm3, %v936_v29, 0.0  ;;  %v1029_v54 = vsel %vm946_vm3, %v1008_v6, 0.0 }
 0x160   : > { %v1099_v15 = vsel %vm946_vm3, %v1078_v49, 0.0  ;;  %v1039_v3 = vsel %vm946_vm3, %v1013_v12, 0.0  ;;  %v959_v58 = vadd.f32 %v958_v2, %v957_v39  ;;  %v1030_v41 = vadd.f32 %v1029_v54, %v1028_v46 }
 0x161   : > { %v1100_v1 = vadd.f32 %v1099_v15, %v1098_v50  ;;  %v911_v56 = vsel %vm879_vm14, %v2049_v4, %v895_v45  ;;  %v960_v7 = vsel %vm946_vm3, %v937_v51, 0.0  ;;  %v1031_v8 = vsel %vm946_vm3, %v1009_v52, 0.0  ;;  %v1226_v4 = vld [vmem:[%s2294_s3 + $0xe0] sm:$0xff]  ;;  %v929_v52 = vld [vmem:[%s2294_s3 + $0x78] sm:$0x1] }
 0x162   : > { %v1101_v10 = vsel %vm946_vm3, %v1079_v0, 0.0  ;;  %v910_v14 = vsel %vm878_vm15, %v2116_v33, %v894_v48  ;;  %v961_v18 = vadd.f32 %v960_v7, %v959_v58  ;;  %v1032_v61 = vadd.f32 %v1031_v8, %v1030_v41  ;;  %v1227_v33 = vld [vmem:[%s2294_s3 + $0xe8] sm:$0xff] }
 0x163   : > { %v1102_v60 = vadd.f32 %v1101_v10, %v1100_v1  ;;  %v1109_v17 = vsel %vm946_vm3, %v1083_v30, 0.0  ;;  %v966_v9 = vsel %vm946_vm3, %v940_v5, 0.0  ;;  %v1037_v20 = vsel %vm946_vm3, %v1012_v47, 0.0 }
 0x164   : > { %v1082_v21 = vmul.f32 %v1240_v63, %v908_v59  ;;  %v963_v12 = vadd.f32 %v2162_v24, %v961_v18  ;;  %v1034_v57 = vadd.f32 %v2165_v27, %v1032_v61  ;;  %v896_v30 = vmul.f32 0.01, %v858_v55  ;;  %v1243_v59 = vld [vmem:[%s2294_s3 + $0x168] sm:$0xff] }
 0x165   : > { %v1104_v11 = vadd.f32 %v2168_v28, %v1102_v60  ;;  %v943_v31 = vmul.f32 %v927_v13, %v911_v56  ;;  %v942_v32 = vmul.f32 %v926_v16, %v910_v14  ;;  %v1014_v34 = vmul.f32 %v1226_v4, %v910_v14 }
 0x166   : > { %vm880_vm0 = vcmp.ge.f32.partialorder %v858_v55, 0.0  ;;  %v897_v35 = vmul.f32 0.01, %v2122_v38  ;;  %v965_v36 = vadd.f32 %v2125_v25, %v963_v12  ;;  %v1036_v62 = vadd.f32 %v2156_v22, %v1034_v57  ;;  %v1228_v25 = vld [vmem:[%s2294_s3 + $0xf0] sm:$0xff] }
 0x167   : > { %v1106_v24 = vadd.f32 %v2159_v23, %v1104_v11  ;;  %v1107_v27 = vsel %vm946_vm3, %v1082_v21, 0.0  ;;  %v1015_v28 = vmul.f32 %v1227_v33, %v911_v56  ;;  %v1084_v37 = vmul.f32 %v1242_v26, %v910_v14  ;;  %v1244_v22 = vld [vmem:[%s2294_s3 + $0x170] sm:$0xff] }
 0x168   : > { %vm881_vm1 = vcmp.ge.f32.partialorder %v2122_v38, 0.0  ;;  %v912_v39 = vsel %vm880_vm0, %v858_v55, %v896_v30  ;;  %v967_v42 = vadd.f32 %v966_v9, %v965_v36  ;;  %v1038_v19 = vadd.f32 %v1037_v20, %v1036_v62  ;;  %v1245_v55 = vld [vmem:[%s2294_s3 + $0x178] sm:$0x1] }
 0x169   : > { %v1108_v23 = vadd.f32 %v1107_v27, %v1106_v24  ;;  %v972_v44 = vsel %vm946_vm3, %v943_v31, 0.0  ;;  %v1085_v45 = vmul.f32 %v1243_v59, %v911_v56  ;;  %v970_v46 = vsel %vm946_vm3, %v942_v32, 0.0 }
 0x16a   : > { %v1041_v50 = vsel %vm946_vm3, %v1014_v34, 0.0  ;;  %v913_v51 = vsel %vm881_vm1, %v2122_v38, %v897_v35  ;;  %v969_v0 = vadd.f32 %v2195_v43, %v967_v42  ;;  %v1040_v29 = vadd.f32 %v1039_v3, %v1038_v19  ;;  %v1133_v42 = vld [vmem:[%s2295_s4] sm:$0x7] }
 0x16b   : > { %v1110_v6 = vadd.f32 %v1109_v17, %v1108_v23  ;;  %v1111_v49 = vsel %vm946_vm3, %v1084_v37, 0.0  ;;  %v944_v5 = vmul.f32 %v928_v40, %v912_v39  ;;  %v1016_v38 = vmul.f32 %v1228_v25, %v912_v39 }
 0x16c   : > { %v1086_v47 = vmul.f32 %v1244_v22, %v912_v39  ;;  %v1043_v48 = vsel %vm946_vm3, %v1015_v28, 0.0  ;;  %v971_v2 = vadd.f32 %v970_v46, %v969_v0  ;;  %v1042_v54 = vadd.f32 %v1041_v50, %v1040_v29 }
 0x16d   : > { %v1112_v15 = vadd.f32 %v1111_v49, %v1110_v6  ;;  %v1113_v63 = vsel %vm946_vm3, %v1085_v45, 0.0  ;;  %v945_v58 = vmul.f32 %v929_v52, %v913_v51  ;;  %v1017_v41 = vmul.f32 %v1229_v53, %v913_v51 }
 0x16e   : > { %v1087_v1 = vmul.f32 %v1245_v55, %v913_v51  ;;  %vm976_vm2 = vcmask 253952   ;;  %v973_v56 = vadd.f32 %v972_v44, %v971_v2  ;;  %v1044_v43 = vadd.f32 %v1043_v48, %v1042_v54 }
 0x16f   : > { %v1114_v3 = vadd.f32 %v1113_v63, %v1112_v15  ;;  %v974_v7 = vsel %vm946_vm3, %v944_v5, 0.0  ;;  %v1045_v8 = vsel %vm946_vm3, %v1016_v38, 0.0  ;;  %v1115_v10 = vsel %vm946_vm3, %v1086_v47, 0.0 }
 0x170   : > { %v975_v13 = vadd.f32 %v974_v7, %v973_v56  ;;  %v1046_v14 = vadd.f32 %v1045_v8, %v1044_v43  ;;  %v977_v4 = vsel %vm976_vm2, %v945_v58, 0.0  ;;  %v1047_v18 = vsel %vm976_vm2, %v1017_v41, 0.0 }
 0x171   : > { %v1116_v16 = vadd.f32 %v1115_v10, %v1114_v3  ;;  %v1117_v61 = vsel %vm976_vm2, %v1087_v1, 0.0  ;;  %vm1125_vm3 = vcmask 1040384   ;;  %vm1127_vm4 = vcmask 1041408  }
 0x172   : > { %v978_v60 = vadd.f32 %v977_v4, %v975_v13  ;;  %v1048_v17 = vadd.f32 %v1047_v18, %v1046_v14  ;;  %vm1129_vm5 = vcmask 256000   ;;  %vm1135_vm6 = vcmask 2048  }
 0x173   : > { %v1118_v9 = vadd.f32 %v1117_v61, %v1116_v16 }
 0x174   : > { %v979_v20 = vrot.slane %v978_v60, 4  ;;  %v1049_v21 = vrot.slane %v1048_v17, 4 }
 0x175   : > { %v1119_v33 = vrot.slane %v1118_v9, 4 }
 0x176   : > { %v980_v26 = vadd.f32 %v979_v20, %v978_v60  ;;  %v1050_v12 = vadd.f32 %v1049_v21, %v1048_v17 }
 0x177   : > { %v1120_v57 = vadd.f32 %v1119_v33, %v1118_v9 }
 0x178   : > { %v981_v11 = vrot.slane %v980_v26, 2  ;;  %v1051_v30 = vrot.slane %v1050_v12, 2 }
 0x179   : > { %v1121_v31 = vrot.slane %v1120_v57, 2 }
 0x17a   : > { %v982_v32 = vadd.f32 %v981_v11, %v980_v26  ;;  %v1052_v34 = vadd.f32 %v1051_v30, %v1050_v12 }
 0x17b   : > { %v1122_v59 = vadd.f32 %v1121_v31, %v1120_v57 }
 0x17c   : > { %v983_v35 = vrot.slane %v982_v32, 1  ;;  %v1053_v36 = vrot.slane %v1052_v34, 1 }
 0x17d   : > { %v1123_v62 = vrot.slane %v1122_v59, 1 }
 0x17e   : > { %v984_v24 = vadd.f32 %v983_v35, %v982_v32  ;;  %v1054_v27 = vadd.f32 %v1053_v36, %v1052_v34 }
 0x17f   : > { %v1124_v28 = vadd.f32 %v1123_v62, %v1122_v59 }
 0x180   : > { %v1126_v37 = vsel %vm1125_vm3, %v984_v24, %v1054_v27 }
 0x181   : > { %v1128_v39 = vsel %vm1127_vm4, %v1126_v37, %v1124_v28 }
 0x182   : > { %v1130_v40 = vsel %vm1129_vm5, %v1128_v39, 0.0 }
 0x183   : > { %1131 = vadd.xlane.f32.xlu0 %v1130_v40 }
 0x210   : > { %v1132_v25 = vpop.xlane.xlu0 %1131 }
 0x211   : > { %v1134_v19 = vadd.f32 %v1133_v42, %v1132_v25 }
 0x213   : > { %1136 = vst.msk [vmem:[%s222_s21] sm:$0x7] %vm1135_vm6, %v1134_v19 }
 0x214 PF: > { %s15_s18 = sadd.s32 1, %s1575_s18  }
 0x215   : > { %p12_p4 = scmp.ge.s32.totalorder %s15_s18, 4  }
 0x217   :  { %14 = sbr.rel (!%p12_p4) target bundleno = 1 (0x1), region = 72 }

</bundles_post_ra>
